<compile_context>
chip_gen: v7x
topology: tpu7x:2x2x1
jax: 0.10.0
libtpu: 0.0.40
codegen_flags: <defaults>
</compile_context>

<pallas_src>
from functools import partial

import jax
import jax.numpy as jnp
from jax.experimental import pallas as pl
from jax.experimental.pallas import tpu as pltpu

_GN_EPS = 1e-5
_SQRT_HALF = 0.7071067811865476
_GROUPS = 32  # nn.GroupNorm(32, in_channels)


# ---------------------------------------------------------------------------
# In-kernel math helpers
# ---------------------------------------------------------------------------
def _erf_approx(x):
    """Abramowitz & Stegun 7.1.26 polynomial erf, |err| ~ 1.5e-7 (VPU/EUP ops only)."""
    a1, a2, a3, a4, a5 = (0.254829592, -0.284496736, 1.421413741,
                          -1.453152027, 1.061405429)
    p = 0.3275911
    ax = jnp.abs(x)
    t = 1.0 / (1.0 + p * ax)
    poly = t * (a1 + t * (a2 + t * (a3 + t * (a4 + t * a5))))
    y = 1.0 - poly * jnp.exp(-ax * ax)
    return jnp.where(x < 0.0, -y, y)


def _gelu_exact(x):
    """'Exact' GELU (matches nn.GELU(approximate='none') to ~1e-7)."""
    return 0.5 * x * (1.0 + _erf_approx(x * _SQRT_HALF))


# ---------------------------------------------------------------------------
# Fused Mlp kernel: fc1 -> GroupNorm -> GELU -> fc2  (per batch / group-block)
# ---------------------------------------------------------------------------
def _mlp_kernel(x_ref, w1_ref, b1_ref, gamma_ref, beta_ref, w2_ref, b2_ref, o_ref,
                *, groups_per_block, rows_per_group, eps):
    """
    x_ref     : (1, GB*R, Cin)   bf16 rows = (channel_of_dim1, h) for GB groups
    w1_ref    : (Cin, hidden)    bf16 (resident)
    b1_ref    : (1, hidden)      f32
    gamma_ref : (GB*R, 1)        f32 GroupNorm affine, pre-broadcast per row
    beta_ref  : (GB*R, 1)        f32
    w2_ref    : (hidden, Cin)    bf16 (resident)
    b2_ref    : (1, Cin)         f32
    o_ref     : (1, GB*R, Cin)
    """
    GB, R = groups_per_block, rows_per_group
    x = x_ref[0]                                                     # (GB*R, Cin)

    # fc1: bf16 x bf16 MXU matmul, f32 accumulation
    h = jnp.dot(x, w1_ref[...], preferred_element_type=jnp.float32) + b1_ref[...]
    hidden = h.shape[-1]

    # GroupNorm(32, C): ONE-PASS stats per group over (channels_per_group, H, hidden).
    h3 = h.reshape(GB, R, hidden)
    inv_cnt = 1.0 / float(R * hidden)
    s1 = jnp.sum(jnp.sum(h3, axis=2, keepdims=True), axis=1, keepdims=True)
    s2 = jnp.sum(jnp.sum(h3 * h3, axis=2, keepdims=True), axis=1, keepdims=True)
    mean = s1 * inv_cnt                                              # (GB,1,1)
    var = jnp.maximum(s2 * inv_cnt - mean * mean, 0.0)
    inv_std = jax.lax.rsqrt(var + eps)                               # (GB,1,1)

    # Fused normalize + per-channel affine + exact GELU (single pass over h).
    g3 = gamma_ref[...].reshape(GB, R, 1)
    b3 = beta_ref[...].reshape(GB, R, 1)
    scale = inv_std * g3                                             # (GB,R,1)
    shift = b3 - mean * scale                                        # (GB,R,1)
    a = _gelu_exact(h3 * scale + shift)                              # (GB,R,hidden)

    # fc2: bf16 x bf16 MXU matmul, f32 accumulation
    a2 = a.reshape(GB * R, hidden).astype(w2_ref.dtype)
    y = jnp.dot(a2, w2_ref[...], preferred_element_type=jnp.float32) + b2_ref[...]
    o_ref[0] = y.astype(o_ref.dtype)


# ---------------------------------------------------------------------------
# VMEM-budget-driven tile selection
# ---------------------------------------------------------------------------
def _vmem_capacity_bytes():
    try:
        return int(pltpu.get_tpu_info().vmem_capacity_bytes)
    except Exception:
        return 64 * 1024 * 1024  # conservative: v7x per-TensorCore VMEM


def _block_vmem_bytes(GB, R, C, hidden, in_bytes, w_bytes, out_bytes):
    rows = GB * R
    return (2 * rows * C * in_bytes                 # x block (double buffered)
            + 2 * rows * C * out_bytes              # out block (double buffered)
            + 2 * (C * hidden + hidden * C) * w_bytes   # weights (worst case: 2 bufs)
            + 2 * (hidden + C) * 4                  # biases
            + 2 * 2 * rows * 128 * 4                # gamma/beta (rows,1) lane-padded
            + 3 * rows * hidden * 4)                # f32 intermediates (h, gelu, temps)


def _pick_groups_per_block(N, G, R, C, hidden, in_bytes, w_bytes, out_bytes, budget):
    chosen = None
    for cand in (32, 16, 8, 4, 2, 1):
        if G % cand != 0:
            continue
        if _block_vmem_bytes(cand, R, C, hidden, in_bytes, w_bytes, out_bytes) <= budget:
            chosen = cand
            break
    if chosen is None:
        # TODO(synk): two-pass GroupNorm (stats kernel + apply kernel) for this regime.
        raise NotImplementedError(
            "Even a single group per block does not fit the VMEM budget; "
            "a two-pass GroupNorm kernel would be required.")
    # Keep at least ~8 grid steps so megacore (v7x) has work to shard and the
    # x/out DMA has steps to hide behind.
    while N * (G // chosen) < 8 and chosen > 1:
        chosen //= 2
    return chosen


# ---------------------------------------------------------------------------
# Wrapper
# ---------------------------------------------------------------------------
def mlp_forward(x, params, matmul_dtype=jnp.bfloat16):
    """x: (N, C, H, W) with W == C == in_channels (required by the PyTorch forward)."""
    N, d1, H, d3 = x.shape
    C, hidden = params["w1"].shape
    assert d1 == C and d3 == C, "forward requires dims 1 and 3 == in_channels"
    G = _GROUPS
    assert C % G == 0, "GroupNorm(32, C) requires C % 32 == 0"
    cpg = C // G                                  # channels per group (along dim 1)
    R = cpg * H                                   # rows per group in flattened layout
    # Lane/sublane alignment (MXU lane-dense operands, unmasked vst, aligned reshape).
    assert C % 128 == 0, "in_channels must be a multiple of 128 (pad if needed)"
    assert hidden % 128 == 0, "hidden_dim must be a multiple of 128 (pad if needed)"
    assert R % 8 == 0, "(C/32)*H must be a multiple of 8 (sublane alignment)"

    cap = _vmem_capacity_bytes()                  # 64 MiB v7x, 128 MiB v5e/v6e
    vmem_limit = int(cap * 0.75)
    GB = _pick_groups_per_block(
        N, G, R, C, hidden,
        in_bytes=jnp.dtype(matmul_dtype).itemsize,
        w_bytes=jnp.dtype(matmul_dtype).itemsize,
        out_bytes=x.dtype.itemsize,
        budget=int(vmem_limit * 0.85))
    rows_blk = GB * R

    # Layout plumbing (transpose + reshape + bf16 cast fuse into one XLA op):
    # (N,C,H,W) -> (N, W*H, C), bf16 so the kernel-side x DMA is halved.
    x1 = jnp.transpose(x, (0, 3, 2, 1)).reshape(N, C * H, C).astype(matmul_dtype)
    w1 = params["w1"].astype(matmul_dtype)
    w2 = params["w2"].astype(matmul_dtype)
    b1 = params["b1"].reshape(1, hidden).astype(jnp.float32)
    b2 = params["b2"].reshape(1, C).astype(jnp.float32)
    # GroupNorm affine broadcast to rows: row = w*H + h -> gamma[w]
    gamma_rows = jnp.repeat(params["gamma"], H).reshape(C * H, 1).astype(jnp.float32)
    beta_rows = jnp.repeat(params["beta"], H).reshape(C * H, 1).astype(jnp.float32)

    kern = partial(_mlp_kernel, groups_per_block=GB, rows_per_group=R, eps=_GN_EPS)
    out_shape = jax.ShapeDtypeStruct((N, C * H, C), x.dtype)

    def _call(buffered_weights):
        def resident(shape):
            # Weights/biases never change block index: single-buffer them to free VMEM.
            if buffered_weights:
                return pl.BlockSpec(shape, lambda n, g: (0, 0),
                                    pipeline_mode=pl.Buffered(1))
            return pl.BlockSpec(shape, lambda n, g: (0, 0))

        return pl.pallas_call(
            kern,
            out_shape=out_shape,
            grid=(N, G // GB),
            in_specs=[
                pl.BlockSpec((1, rows_blk, C), lambda n, g: (n, g, 0)),   # x rows
                resident((C, hidden)),                                    # w1
                resident((1, hidden)),                                    # b1
                pl.BlockSpec((rows_blk, 1), lambda n, g: (g, 0)),         # gamma rows
                pl.BlockSpec((rows_blk, 1), lambda n, g: (g, 0)),         # beta rows
                resident((hidden, C)),                                    # w2
                resident((1, C)),                                         # b2
            ],
            out_specs=pl.BlockSpec((1, rows_blk, C), lambda n, g: (n, g, 0)),
            compiler_params=pltpu.CompilerParams(
                dimension_semantics=("parallel", "parallel"),
                vmem_limit_bytes=vmem_limit,
            ),
        )(x1, w1, b1, gamma_rows, beta_rows, w2, b2)

    out = None
    last_err = None
    for buffered in (True, False):   # fall back if this build rejects Buffered(1)
        try:
            out = _call(buffered)
            jax.block_until_ready(out)
            break
        except Exception as e:       # noqa: BLE001 - retry with default buffering
            last_err = e
            out = None
    if out is None:
        raise last_err

    y = out.reshape(N, C, H, C)                   # (N, W, H, C_out)
    return jnp.transpose(y, (0, 3, 2, 1))         # back to (N, C_out, H, W)


# ---------------------------------------------------------------------------
# Parameter init (PyTorch-equivalent shapes, stored pre-transposed for x @ W)
# ---------------------------------------------------------------------------
def init_params(key, in_channels, hidden_dim):
    k1, k2, k3, k4, k5, k6 = jax.random.split(key, 6)
    limit = (6.0 / (in_channels + hidden_dim)) ** 0.5    # xavier_uniform
    w1 = jax.random.uniform(k1, (in_channels, hidden_dim), jnp.float32, -limit, limit)
    b1 = 1e-6 * jax.random.normal(k2, (hidden_dim,), jnp.float32)
    w2 = jax.random.uniform(k3, (hidden_dim, in_channels), jnp.float32, -limit, limit)
    b2 = 1e-6 * jax.random.normal(k4, (in_channels,), jnp.float32)
    # nn.GroupNorm default init is weight=1, bias=0; perturb slightly so the
    # affine path of the kernel is actually exercised by the correctness check.
    gamma = 1.0 + 0.1 * jax.random.normal(k5, (in_channels,), jnp.float32)
    beta = 0.05 * jax.random.normal(k6, (in_channels,), jnp.float32)
    return dict(w1=w1, b1=b1, w2=w2, b2=b2, gamma=gamma, beta=beta)


# ---------------------------------------------------------------------------
# Pure-JAX reference (mirrors the PyTorch forward; matmul inputs cast to the
# same dtype the kernel feeds the MXU so the check stays tight).
# ---------------------------------------------------------------------------
def reference(x, p, matmul_dtype=jnp.bfloat16, num_groups=_GROUPS, eps=_GN_EPS):
    x1 = jnp.transpose(x, (0, 3, 2, 1))                  # (N, W, H, C)
    h = jnp.dot(x1.astype(matmul_dtype), p["w1"].astype(matmul_dtype),
                preferred_element_type=jnp.float32) + p["b1"]
    N, Cd, Hd, Hh = h.shape
    cpg = Cd // num_groups
    hg = h.reshape(N, num_groups, cpg * Hd * Hh)
    mean = jnp.mean(hg, axis=-1, keepdims=True)
    var = jnp.var(hg, axis=-1, keepdims=True)            # biased, as in PyTorch
    hn = ((hg - mean) * jax.lax.rsqrt(var + eps)).reshape(N, Cd, Hd, Hh)
    hn = hn * p["gamma"][None, :, None, None] + p["beta"][None, :, None, None]
    a = jax.nn.gelu(hn, approximate=False)               # exact erf GELU
    y = jnp.dot(a.astype(matmul_dtype), p["w2"].astype(matmul_dtype),
                preferred_element_type=jnp.float32) + p["b2"]
    return jnp.transpose(y, (0, 3, 2, 1))


# ---------------------------------------------------------------------------
if __name__ == "__main__":
    # Shapes implied by the forward: x is (N, C, H, W) with W == C == in_channels,
    # in_channels divisible by 32 (GroupNorm) and by 128 (lane alignment).
    N, C, H, hidden = 2, 128, 4, 256
    key = jax.random.PRNGKey(0)
    kx, kp = jax.random.split(key)
    x = jax.random.normal(kx, (N, C, H, C), jnp.float32)
    params = init_params(kp, C, hidden)

    out = mlp_forward(x, params)
    out = jax.block_until_ready(out)
    assert out.shape == (N, C, H, C), out.shape

    ref = reference(x, params)
    max_err = float(jnp.max(jnp.abs(out - ref)))
    # Tolerance re-validated for the bf16-MXU / one-pass-variance path.
    assert jnp.allclose(out, ref, atol=5e-3, rtol=5e-3), max_err

    print("KERNEL_OK")
</pallas_src>

<mosaic_0001>
module attributes {stable_mosaic.version = 11 : i64} {
  func.func @_mlp_kernel(%arg0: i32, %arg1: i32, %arg2: memref<1x128x128xbf16, #tpu.memory_space<vmem>>, %arg3: memref<128x256xbf16, #tpu.memory_space<vmem>>, %arg4: memref<1x256xf32, #tpu.memory_space<vmem>>, %arg5: memref<128x1xf32, #tpu.memory_space<vmem>>, %arg6: memref<128x1xf32, #tpu.memory_space<vmem>>, %arg7: memref<256x128xbf16, #tpu.memory_space<vmem>>, %arg8: memref<1x128xf32, #tpu.memory_space<vmem>>, %arg9: memref<1x128x128xf32, #tpu.memory_space<vmem>>) attributes {dimension_semantics = [#tpu.dimension_semantics<parallel>, #tpu.dimension_semantics<parallel>], iteration_bounds = array<i64: 2, 4>, scalar_prefetch = 0 : i64, scratch_operands = 0 : i64, tpu.core_type = #tpu.core_type<tc>, window_params = [{transform_indices = @transform_0, window_bounds = array<i64: 1, 128, 128>}, {pipeline_mode = #tpu.pipeline_mode<synchronous>, transform_indices = @transform_1, window_bounds = array<i64: 128, 256>}, {pipeline_mode = #tpu.pipeline_mode<synchronous>, transform_indices = @transform_2, window_bounds = array<i64: 1, 256>}, {transform_indices = @transform_3, window_bounds = array<i64: 128, 1>}, {transform_indices = @transform_4, window_bounds = array<i64: 128, 1>}, {pipeline_mode = #tpu.pipeline_mode<synchronous>, transform_indices = @transform_5, window_bounds = array<i64: 256, 128>}, {pipeline_mode = #tpu.pipeline_mode<synchronous>, transform_indices = @transform_6, window_bounds = array<i64: 1, 128>}, {transform_indices = @transform_7, window_bounds = array<i64: 1, 128, 128>}]} {
    %c0 = arith.constant 0 : index
    %c0_0 = arith.constant 0 : index
    %c0_1 = arith.constant 0 : index
    %0 = vector.load %arg2[%c0, %c0_0, %c0_1] : memref<1x128x128xbf16, #tpu.memory_space<vmem>>, vector<1x128x128xbf16>
    %1 = vector.shape_cast %0 : vector<1x128x128xbf16> to vector<128x128xbf16>
    %c0_2 = arith.constant 0 : index
    %c0_3 = arith.constant 0 : index
    %2 = vector.load %arg3[%c0_2, %c0_3] : memref<128x256xbf16, #tpu.memory_space<vmem>>, vector<128x256xbf16>
    %cst = arith.constant dense<0.000000e+00> : vector<128x256xf32>
    %3 = tpu.matmul %1, %2, %cst {dimension_numbers = #tpu.dot_dimension_numbers<[1], [0], [0], [1], [0, 0, 1, 1], [], []>} : vector<128x128xbf16>, vector<128x256xbf16>, vector<128x256xf32> -> vector<128x256xf32>
    %c0_4 = arith.constant 0 : index
    %c0_5 = arith.constant 0 : index
    %4 = vector.load %arg4[%c0_4, %c0_5] : memref<1x256xf32, #tpu.memory_space<vmem>>, vector<1x256xf32>
    %5 = vector.broadcast %4 : vector<1x256xf32> to vector<128x256xf32>
    %6 = arith.addf %3, %5 : vector<128x256xf32>
    %7 = vector.shape_cast %6 : vector<128x256xf32> to vector<8x16x256xf32>
    %cst_6 = arith.constant dense<0.000000e+00> : vector<8x16xf32>
    %8 = vector.multi_reduction <add>, %7, %cst_6 [2] : vector<8x16x256xf32> to vector<8x16xf32>
    %9 = vector.shape_cast %8 : vector<8x16xf32> to vector<8x16x1xf32>
    %cst_7 = arith.constant dense<0.000000e+00> : vector<8x1xf32>
    %10 = vector.multi_reduction <add>, %9, %cst_7 [1] : vector<8x16x1xf32> to vector<8x1xf32>
    %11 = vector.shape_cast %10 : vector<8x1xf32> to vector<8x1x1xf32>
    %12 = arith.mulf %7, %7 : vector<8x16x256xf32>
    %cst_8 = arith.constant dense<0.000000e+00> : vector<8x16xf32>
    %13 = vector.multi_reduction <add>, %12, %cst_8 [2] : vector<8x16x256xf32> to vector<8x16xf32>
    %14 = vector.shape_cast %13 : vector<8x16xf32> to vector<8x16x1xf32>
    %cst_9 = arith.constant dense<0.000000e+00> : vector<8x1xf32>
    %15 = vector.multi_reduction <add>, %14, %cst_9 [1] : vector<8x16x1xf32> to vector<8x1xf32>
    %16 = vector.shape_cast %15 : vector<8x1xf32> to vector<8x1x1xf32>
    %cst_10 = arith.constant 2.44140625E-4 : f32
    %17 = vector.broadcast %cst_10 : f32 to vector<8x1x1xf32>
    %18 = arith.mulf %11, %17 : vector<8x1x1xf32>
    %cst_11 = arith.constant 2.44140625E-4 : f32
    %19 = vector.broadcast %cst_11 : f32 to vector<8x1x1xf32>
    %20 = arith.mulf %16, %19 : vector<8x1x1xf32>
    %21 = arith.mulf %18, %18 : vector<8x1x1xf32>
    %22 = arith.subf %20, %21 : vector<8x1x1xf32>
    %cst_12 = arith.constant 0.000000e+00 : f32
    %23 = vector.broadcast %cst_12 : f32 to vector<8x1x1xf32>
    %24 = arith.maximumf %22, %23 : vector<8x1x1xf32>
    %cst_13 = arith.constant 9.99999974E-6 : f32
    %25 = vector.broadcast %cst_13 : f32 to vector<8x1x1xf32>
    %26 = arith.addf %24, %25 : vector<8x1x1xf32>
    %27 = math.rsqrt %26 : vector<8x1x1xf32>
    %c0_14 = arith.constant 0 : index
    %c0_15 = arith.constant 0 : index
    %28 = vector.load %arg5[%c0_14, %c0_15] : memref<128x1xf32, #tpu.memory_space<vmem>>, vector<128x1xf32>
    %29 = vector.shape_cast %28 : vector<128x1xf32> to vector<8x16x1xf32>
    %c0_16 = arith.constant 0 : index
    %c0_17 = arith.constant 0 : index
    %30 = vector.load %arg6[%c0_16, %c0_17] : memref<128x1xf32, #tpu.memory_space<vmem>>, vector<128x1xf32>
    %31 = vector.shape_cast %30 : vector<128x1xf32> to vector<8x16x1xf32>
    %32 = vector.broadcast %27 : vector<8x1x1xf32> to vector<8x16x1xf32>
    %33 = arith.mulf %32, %29 : vector<8x16x1xf32>
    %34 = vector.broadcast %18 : vector<8x1x1xf32> to vector<8x16x1xf32>
    %35 = arith.mulf %34, %33 : vector<8x16x1xf32>
    %36 = arith.subf %31, %35 : vector<8x16x1xf32>
    %37 = vector.broadcast %33 : vector<8x16x1xf32> to vector<8x16x256xf32>
    %38 = arith.mulf %7, %37 : vector<8x16x256xf32>
    %39 = vector.broadcast %36 : vector<8x16x1xf32> to vector<8x16x256xf32>
    %40 = arith.addf %38, %39 : vector<8x16x256xf32>
    %cst_18 = arith.constant 5.000000e-01 : f32
    %41 = vector.broadcast %cst_18 : f32 to vector<8x16x256xf32>
    %42 = arith.mulf %41, %40 : vector<8x16x256xf32>
    %cst_19 = arith.constant 0.707106769 : f32
    %43 = vector.broadcast %cst_19 : f32 to vector<8x16x256xf32>
    %44 = arith.mulf %40, %43 : vector<8x16x256xf32>
    %45 = math.absf %44 : vector<8x16x256xf32>
    %cst_20 = arith.constant 0.327591091 : f32
    %46 = vector.broadcast %cst_20 : f32 to vector<8x16x256xf32>
    %47 = arith.mulf %46, %45 : vector<8x16x256xf32>
    %cst_21 = arith.constant 1.000000e+00 : f32
    %48 = vector.broadcast %cst_21 : f32 to vector<8x16x256xf32>
    %49 = arith.addf %48, %47 : vector<8x16x256xf32>
    %cst_22 = arith.constant 1.000000e+00 : f32
    %50 = vector.broadcast %cst_22 : f32 to vector<8x16x256xf32>
    %51 = arith.divf %50, %49 : vector<8x16x256xf32>
    %cst_23 = arith.constant 1.06140542 : f32
    %52 = vector.broadcast %cst_23 : f32 to vector<8x16x256xf32>
    %53 = arith.mulf %51, %52 : vector<8x16x256xf32>
    %cst_24 = arith.constant -1.45315206 : f32
    %54 = vector.broadcast %cst_24 : f32 to vector<8x16x256xf32>
    %55 = arith.addf %54, %53 : vector<8x16x256xf32>
    %56 = arith.mulf %51, %55 : vector<8x16x256xf32>
    %cst_25 = arith.constant 1.42141378 : f32
    %57 = vector.broadcast %cst_25 : f32 to vector<8x16x256xf32>
    %58 = arith.addf %57, %56 : vector<8x16x256xf32>
    %59 = arith.mulf %51, %58 : vector<8x16x256xf32>
    %cst_26 = arith.constant -0.284496725 : f32
    %60 = vector.broadcast %cst_26 : f32 to vector<8x16x256xf32>
    %61 = arith.addf %60, %59 : vector<8x16x256xf32>
    %62 = arith.mulf %51, %61 : vector<8x16x256xf32>
    %cst_27 = arith.constant 0.254829586 : f32
    %63 = vector.broadcast %cst_27 : f32 to vector<8x16x256xf32>
    %64 = arith.addf %63, %62 : vector<8x16x256xf32>
    %65 = arith.mulf %51, %64 : vector<8x16x256xf32>
    %cst_28 = arith.constant 0.000000e+00 : f32
    %66 = vector.broadcast %cst_28 : f32 to vector<8x16x256xf32>
    %67 = arith.subf %66, %45 : vector<8x16x256xf32>
    %68 = arith.mulf %67, %45 : vector<8x16x256xf32>
    %69 = math.exp %68 : vector<8x16x256xf32>
    %70 = arith.mulf %65, %69 : vector<8x16x256xf32>
    %cst_29 = arith.constant 1.000000e+00 : f32
    %71 = vector.broadcast %cst_29 : f32 to vector<8x16x256xf32>
    %72 = arith.subf %71, %70 : vector<8x16x256xf32>
    %cst_30 = arith.constant 0.000000e+00 : f32
    %73 = vector.broadcast %cst_30 : f32 to vector<8x16x256xf32>
    %74 = arith.cmpf olt, %44, %73 : vector<8x16x256xf32>
    %cst_31 = arith.constant 0.000000e+00 : f32
    %75 = vector.broadcast %cst_31 : f32 to vector<8x16x256xf32>
    %76 = arith.subf %75, %72 : vector<8x16x256xf32>
    %77 = arith.select %74, %76, %72 : vector<8x16x256xi1>, vector<8x16x256xf32>
    %cst_32 = arith.constant 1.000000e+00 : f32
    %78 = vector.broadcast %cst_32 : f32 to vector<8x16x256xf32>
    %79 = arith.addf %78, %77 : vector<8x16x256xf32>
    %80 = arith.mulf %42, %79 : vector<8x16x256xf32>
    %81 = vector.shape_cast %80 : vector<8x16x256xf32> to vector<128x256xf32>
    %82 = arith.truncf %81 : vector<128x256xf32> to vector<128x256xbf16>
    %c0_33 = arith.constant 0 : index
    %c0_34 = arith.constant 0 : index
    %83 = vector.load %arg7[%c0_33, %c0_34] : memref<256x128xbf16, #tpu.memory_space<vmem>>, vector<256x128xbf16>
    %cst_35 = arith.constant dense<0.000000e+00> : vector<128x128xf32>
    %84 = tpu.matmul %82, %83, %cst_35 {dimension_numbers = #tpu.dot_dimension_numbers<[1], [0], [0], [1], [0, 0, 1, 1], [], []>} : vector<128x256xbf16>, vector<256x128xbf16>, vector<128x128xf32> -> vector<128x128xf32>
    %c0_36 = arith.constant 0 : index
    %c0_37 = arith.constant 0 : index
    %85 = vector.load %arg8[%c0_36, %c0_37] : memref<1x128xf32, #tpu.memory_space<vmem>>, vector<1x128xf32>
    %86 = vector.broadcast %85 : vector<1x128xf32> to vector<128x128xf32>
    %87 = arith.addf %84, %86 : vector<128x128xf32>
    %c0_38 = arith.constant 0 : index
    %c0_39 = arith.constant 0 : index
    %c0_40 = arith.constant 0 : index
    %88 = vector.load %arg9[%c0_38, %c0_39, %c0_40] : memref<1x128x128xf32, #tpu.memory_space<vmem>>, vector<1x128x128xf32>
    %89 = vector.shape_cast %88 : vector<1x128x128xf32> to vector<128x128xf32>
    %90 = vector.shape_cast %87 : vector<128x128xf32> to vector<1x128x128xf32>
    tpu.vector_store %arg9[%c0_38, %c0_39, %c0_40], %90 {strides = array<i32>} : memref<1x128x128xf32, #tpu.memory_space<vmem>>, vector<1x128x128xf32>,
    return
  }
  func.func @transform_0(%arg0: i32, %arg1: i32) -> (i32, i32, i32) {
    %c0_i32 = arith.constant 0 : i32
    %c0_i32_0 = arith.constant 0 : i32
    return %arg0, %arg1, %c0_i32 : i32, i32, i32
  }
  func.func @transform_1(%arg0: i32, %arg1: i32) -> (i32, i32) {
    %c0_i32 = arith.constant 0 : i32
    %c0_i32_0 = arith.constant 0 : i32
    %c0_i32_1 = arith.constant 0 : i32
    return %c0_i32, %c0_i32_0 : i32, i32
  }
  func.func @transform_2(%arg0: i32, %arg1: i32) -> (i32, i32) {
    %c0_i32 = arith.constant 0 : i32
    %c0_i32_0 = arith.constant 0 : i32
    %c0_i32_1 = arith.constant 0 : i32
    return %c0_i32, %c0_i32_0 : i32, i32
  }
  func.func @transform_3(%arg0: i32, %arg1: i32) -> (i32, i32) {
    %c0_i32 = arith.constant 0 : i32
    %c0_i32_0 = arith.constant 0 : i32
    return %arg1, %c0_i32 : i32, i32
  }
  func.func @transform_4(%arg0: i32, %arg1: i32) -> (i32, i32) {
    %c0_i32 = arith.constant 0 : i32
    %c0_i32_0 = arith.constant 0 : i32
    return %arg1, %c0_i32 : i32, i32
  }
  func.func @transform_5(%arg0: i32, %arg1: i32) -> (i32, i32) {
    %c0_i32 = arith.constant 0 : i32
    %c0_i32_0 = arith.constant 0 : i32
    %c0_i32_1 = arith.constant 0 : i32
    return %c0_i32, %c0_i32_0 : i32, i32
  }
  func.func @transform_6(%arg0: i32, %arg1: i32) -> (i32, i32) {
    %c0_i32 = arith.constant 0 : i32
    %c0_i32_0 = arith.constant 0 : i32
    %c0_i32_1 = arith.constant 0 : i32
    return %c0_i32, %c0_i32_0 : i32, i32
  }
  func.func @transform_7(%arg0: i32, %arg1: i32) -> (i32, i32, i32) {
    %c0_i32 = arith.constant 0 : i32
    %c0_i32_0 = arith.constant 0 : i32
    return %arg0, %arg1, %c0_i32 : i32, i32, i32
  }
}

module attributes {stable_mosaic.version = 11 : i64} {
  func.func @_mlp_kernel(%arg0: i32, %arg1: i32, %arg2: memref<1x128x128xbf16, #tpu.memory_space<vmem>>, %arg3: memref<128x256xbf16, #tpu.memory_space<vmem>>, %arg4: memref<1x256xf32, #tpu.memory_space<vmem>>, %arg5: memref<128x1xf32, #tpu.memory_space<vmem>>, %arg6: memref<128x1xf32, #tpu.memory_space<vmem>>, %arg7: memref<256x128xbf16, #tpu.memory_space<vmem>>, %arg8: memref<1x128xf32, #tpu.memory_space<vmem>>, %arg9: memref<1x128x128xf32, #tpu.memory_space<vmem>>) attributes {dimension_semantics = [#tpu.dimension_semantics<parallel>, #tpu.dimension_semantics<parallel>], iteration_bounds = array<i64: 2, 4>, scalar_prefetch = 0 : i64, scratch_operands = 0 : i64, tpu.core_type = #tpu.core_type<tc>, window_params = [{transform_indices = @transform_0, window_bounds = array<i64: 1, 128, 128>}, {pipeline_mode = #tpu.pipeline_mode<synchronous>, transform_indices = @transform_1, window_bounds = array<i64: 128, 256>}, {pipeline_mode = #tpu.pipeline_mode<synchronous>, transform_indices = @transform_2, window_bounds = array<i64: 1, 256>}, {transform_indices = @transform_3, window_bounds = array<i64: 128, 1>}, {transform_indices = @transform_4, window_bounds = array<i64: 128, 1>}, {pipeline_mode = #tpu.pipeline_mode<synchronous>, transform_indices = @transform_5, window_bounds = array<i64: 256, 128>}, {pipeline_mode = #tpu.pipeline_mode<synchronous>, transform_indices = @transform_6, window_bounds = array<i64: 1, 128>}, {transform_indices = @transform_7, window_bounds = array<i64: 1, 128, 128>}]} {
    %c0 = arith.constant 0 : index
    %c0_0 = arith.constant 0 : index
    %c0_1 = arith.constant 0 : index
    %0 = vector.load %arg2[%c0, %c0_0, %c0_1] : memref<1x128x128xbf16, #tpu.memory_space<vmem>>, vector<1x128x128xbf16>
    %1 = vector.shape_cast %0 : vector<1x128x128xbf16> to vector<128x128xbf16>
    %c0_2 = arith.constant 0 : index
    %c0_3 = arith.constant 0 : index
    %2 = vector.load %arg3[%c0_2, %c0_3] : memref<128x256xbf16, #tpu.memory_space<vmem>>, vector<128x256xbf16>
    %cst = arith.constant dense<0.000000e+00> : vector<128x256xf32>
    %3 = tpu.matmul %1, %2, %cst {dimension_numbers = #tpu.dot_dimension_numbers<[1], [0], [0], [1], [0, 0, 1, 1], [], []>} : vector<128x128xbf16>, vector<128x256xbf16>, vector<128x256xf32> -> vector<128x256xf32>
    %c0_4 = arith.constant 0 : index
    %c0_5 = arith.constant 0 : index
    %4 = vector.load %arg4[%c0_4, %c0_5] : memref<1x256xf32, #tpu.memory_space<vmem>>, vector<1x256xf32>
    %5 = vector.broadcast %4 : vector<1x256xf32> to vector<128x256xf32>
    %6 = arith.addf %3, %5 : vector<128x256xf32>
    %7 = vector.shape_cast %6 : vector<128x256xf32> to vector<8x16x256xf32>
    %cst_6 = arith.constant dense<0.000000e+00> : vector<8x16xf32>
    %8 = vector.multi_reduction <add>, %7, %cst_6 [2] : vector<8x16x256xf32> to vector<8x16xf32>
    %9 = vector.shape_cast %8 : vector<8x16xf32> to vector<8x16x1xf32>
    %cst_7 = arith.constant dense<0.000000e+00> : vector<8x1xf32>
    %10 = vector.multi_reduction <add>, %9, %cst_7 [1] : vector<8x16x1xf32> to vector<8x1xf32>
    %11 = vector.shape_cast %10 : vector<8x1xf32> to vector<8x1x1xf32>
    %12 = arith.mulf %7, %7 : vector<8x16x256xf32>
    %cst_8 = arith.constant dense<0.000000e+00> : vector<8x16xf32>
    %13 = vector.multi_reduction <add>, %12, %cst_8 [2] : vector<8x16x256xf32> to vector<8x16xf32>
    %14 = vector.shape_cast %13 : vector<8x16xf32> to vector<8x16x1xf32>
    %cst_9 = arith.constant dense<0.000000e+00> : vector<8x1xf32>
    %15 = vector.multi_reduction <add>, %14, %cst_9 [1] : vector<8x16x1xf32> to vector<8x1xf32>
    %16 = vector.shape_cast %15 : vector<8x1xf32> to vector<8x1x1xf32>
    %cst_10 = arith.constant 2.44140625E-4 : f32
    %17 = vector.broadcast %cst_10 : f32 to vector<8x1x1xf32>
    %18 = arith.mulf %11, %17 : vector<8x1x1xf32>
    %cst_11 = arith.constant 2.44140625E-4 : f32
    %19 = vector.broadcast %cst_11 : f32 to vector<8x1x1xf32>
    %20 = arith.mulf %16, %19 : vector<8x1x1xf32>
    %21 = arith.mulf %18, %18 : vector<8x1x1xf32>
    %22 = arith.subf %20, %21 : vector<8x1x1xf32>
    %cst_12 = arith.constant 0.000000e+00 : f32
    %23 = vector.broadcast %cst_12 : f32 to vector<8x1x1xf32>
    %24 = arith.maximumf %22, %23 : vector<8x1x1xf32>
    %cst_13 = arith.constant 9.99999974E-6 : f32
    %25 = vector.broadcast %cst_13 : f32 to vector<8x1x1xf32>
    %26 = arith.addf %24, %25 : vector<8x1x1xf32>
    %27 = math.rsqrt %26 : vector<8x1x1xf32>
    %c0_14 = arith.constant 0 : index
    %c0_15 = arith.constant 0 : index
    %28 = vector.load %arg5[%c0_14, %c0_15] : memref<128x1xf32, #tpu.memory_space<vmem>>, vector<128x1xf32>
    %29 = vector.shape_cast %28 : vector<128x1xf32> to vector<8x16x1xf32>
    %c0_16 = arith.constant 0 : index
    %c0_17 = arith.constant 0 : index
    %30 = vector.load %arg6[%c0_16, %c0_17] : memref<128x1xf32, #tpu.memory_space<vmem>>, vector<128x1xf32>
    %31 = vector.shape_cast %30 : vector<128x1xf32> to vector<8x16x1xf32>
    %32 = vector.broadcast %27 : vector<8x1x1xf32> to vector<8x16x1xf32>
    %33 = arith.mulf %32, %29 : vector<8x16x1xf32>
    %34 = vector.broadcast %18 : vector<8x1x1xf32> to vector<8x16x1xf32>
    %35 = arith.mulf %34, %33 : vector<8x16x1xf32>
    %36 = arith.subf %31, %35 : vector<8x16x1xf32>
    %37 = vector.broadcast %33 : vector<8x16x1xf32> to vector<8x16x256xf32>
    %38 = arith.mulf %7, %37 : vector<8x16x256xf32>
    %39 = vector.broadcast %36 : vector<8x16x1xf32> to vector<8x16x256xf32>
    %40 = arith.addf %38, %39 : vector<8x16x256xf32>
    %cst_18 = arith.constant 5.000000e-01 : f32
    %41 = vector.broadcast %cst_18 : f32 to vector<8x16x256xf32>
    %42 = arith.mulf %41, %40 : vector<8x16x256xf32>
    %cst_19 = arith.constant 0.707106769 : f32
    %43 = vector.broadcast %cst_19 : f32 to vector<8x16x256xf32>
    %44 = arith.mulf %40, %43 : vector<8x16x256xf32>
    %45 = math.absf %44 : vector<8x16x256xf32>
    %cst_20 = arith.constant 0.327591091 : f32
    %46 = vector.broadcast %cst_20 : f32 to vector<8x16x256xf32>
    %47 = arith.mulf %46, %45 : vector<8x16x256xf32>
    %cst_21 = arith.constant 1.000000e+00 : f32
    %48 = vector.broadcast %cst_21 : f32 to vector<8x16x256xf32>
    %49 = arith.addf %48, %47 : vector<8x16x256xf32>
    %cst_22 = arith.constant 1.000000e+00 : f32
    %50 = vector.broadcast %cst_22 : f32 to vector<8x16x256xf32>
    %51 = arith.divf %50, %49 : vector<8x16x256xf32>
    %cst_23 = arith.constant 1.06140542 : f32
    %52 = vector.broadcast %cst_23 : f32 to vector<8x16x256xf32>
    %53 = arith.mulf %51, %52 : vector<8x16x256xf32>
    %cst_24 = arith.constant -1.45315206 : f32
    %54 = vector.broadcast %cst_24 : f32 to vector<8x16x256xf32>
    %55 = arith.addf %54, %53 : vector<8x16x256xf32>
    %56 = arith.mulf %51, %55 : vector<8x16x256xf32>
    %cst_25 = arith.constant 1.42141378 : f32
    %57 = vector.broadcast %cst_25 : f32 to vector<8x16x256xf32>
    %58 = arith.addf %57, %56 : vector<8x16x256xf32>
    %59 = arith.mulf %51, %58 : vector<8x16x256xf32>
    %cst_26 = arith.constant -0.284496725 : f32
    %60 = vector.broadcast %cst_26 : f32 to vector<8x16x256xf32>
    %61 = arith.addf %60, %59 : vector<8x16x256xf32>
    %62 = arith.mulf %51, %61 : vector<8x16x256xf32>
    %cst_27 = arith.constant 0.254829586 : f32
    %63 = vector.broadcast %cst_27 : f32 to vector<8x16x256xf32>
    %64 = arith.addf %63, %62 : vector<8x16x256xf32>
    %65 = arith.mulf %51, %64 : vector<8x16x256xf32>
    %cst_28 = arith.constant 0.000000e+00 : f32
    %66 = vector.broadcast %cst_28 : f32 to vector<8x16x256xf32>
    %67 = arith.subf %66, %45 : vector<8x16x256xf32>
    %68 = arith.mulf %67, %45 : vector<8x16x256xf32>
    %69 = math.exp %68 : vector<8x16x256xf32>
    %70 = arith.mulf %65, %69 : vector<8x16x256xf32>
    %cst_29 = arith.constant 1.000000e+00 : f32
    %71 = vector.broadcast %cst_29 : f32 to vector<8x16x256xf32>
    %72 = arith.subf %71, %70 : vector<8x16x256xf32>
    %cst_30 = arith.constant 0.000000e+00 : f32
    %73 = vector.broadcast %cst_30 : f32 to vector<8x16x256xf32>
    %74 = arith.cmpf olt, %44, %73 : vector<8x16x256xf32>
    %cst_31 = arith.constant 0.000000e+00 : f32
    %75 = vector.broadcast %cst_31 : f32 to vector<8x16x256xf32>
    %76 = arith.subf %75, %72 : vector<8x16x256xf32>
    %77 = arith.select %74, %76, %72 : vector<8x16x256xi1>, vector<8x16x256xf32>
    %cst_32 = arith.constant 1.000000e+00 : f32
    %78 = vector.broadcast %cst_32 : f32 to vector<8x16x256xf32>
    %79 = arith.addf %78, %77 : vector<8x16x256xf32>
    %80 = arith.mulf %42, %79 : vector<8x16x256xf32>
    %81 = vector.shape_cast %80 : vector<8x16x256xf32> to vector<128x256xf32>
    %82 = arith.truncf %81 : vector<128x256xf32> to vector<128x256xbf16>
    %c0_33 = arith.constant 0 : index
    %c0_34 = arith.constant 0 : index
    %83 = vector.load %arg7[%c0_33, %c0_34] : memref<256x128xbf16, #tpu.memory_space<vmem>>, vector<256x128xbf16>
    %cst_35 = arith.constant dense<0.000000e+00> : vector<128x128xf32>
    %84 = tpu.matmul %82, %83, %cst_35 {dimension_numbers = #tpu.dot_dimension_numbers<[1], [0], [0], [1], [0, 0, 1, 1], [], []>} : vector<128x256xbf16>, vector<256x128xbf16>, vector<128x128xf32> -> vector<128x128xf32>
    %c0_36 = arith.constant 0 : index
    %c0_37 = arith.constant 0 : index
    %85 = vector.load %arg8[%c0_36, %c0_37] : memref<1x128xf32, #tpu.memory_space<vmem>>, vector<1x128xf32>
    %86 = vector.broadcast %85 : vector<1x128xf32> to vector<128x128xf32>
    %87 = arith.addf %84, %86 : vector<128x128xf32>
    %c0_38 = arith.constant 0 : index
    %c0_39 = arith.constant 0 : index
    %c0_40 = arith.constant 0 : index
    %88 = vector.load %arg9[%c0_38, %c0_39, %c0_40] : memref<1x128x128xf32, #tpu.memory_space<vmem>>, vector<1x128x128xf32>
    %89 = vector.shape_cast %88 : vector<1x128x128xf32> to vector<128x128xf32>
    %90 = vector.shape_cast %87 : vector<128x128xf32> to vector<1x128x128xf32>
    tpu.vector_store %arg9[%c0_38, %c0_39, %c0_40], %90 {strides = array<i32>} : memref<1x128x128xf32, #tpu.memory_space<vmem>>, vector<1x128x128xf32>,
    return
  }
  func.func @transform_0(%arg0: i32, %arg1: i32) -> (i32, i32, i32) {
    %c0_i32 = arith.constant 0 : i32
    %c0_i32_0 = arith.constant 0 : i32
    return %arg0, %arg1, %c0_i32 : i32, i32, i32
  }
  func.func @transform_1(%arg0: i32, %arg1: i32) -> (i32, i32) {
    %c0_i32 = arith.constant 0 : i32
    %c0_i32_0 = arith.constant 0 : i32
    %c0_i32_1 = arith.constant 0 : i32
    return %c0_i32, %c0_i32_0 : i32, i32
  }
  func.func @transform_2(%arg0: i32, %arg1: i32) -> (i32, i32) {
    %c0_i32 = arith.constant 0 : i32
    %c0_i32_0 = arith.constant 0 : i32
    %c0_i32_1 = arith.constant 0 : i32
    return %c0_i32, %c0_i32_0 : i32, i32
  }
  func.func @transform_3(%arg0: i32, %arg1: i32) -> (i32, i32) {
    %c0_i32 = arith.constant 0 : i32
    %c0_i32_0 = arith.constant 0 : i32
    return %arg1, %c0_i32 : i32, i32
  }
  func.func @transform_4(%arg0: i32, %arg1: i32) -> (i32, i32) {
    %c0_i32 = arith.constant 0 : i32
    %c0_i32_0 = arith.constant 0 : i32
    return %arg1, %c0_i32 : i32, i32
  }
  func.func @transform_5(%arg0: i32, %arg1: i32) -> (i32, i32) {
    %c0_i32 = arith.constant 0 : i32
    %c0_i32_0 = arith.constant 0 : i32
    %c0_i32_1 = arith.constant 0 : i32
    return %c0_i32, %c0_i32_0 : i32, i32
  }
  func.func @transform_6(%arg0: i32, %arg1: i32) -> (i32, i32) {
    %c0_i32 = arith.constant 0 : i32
    %c0_i32_0 = arith.constant 0 : i32
    %c0_i32_1 = arith.constant 0 : i32
    return %c0_i32, %c0_i32_0 : i32, i32
  }
  func.func @transform_7(%arg0: i32, %arg1: i32) -> (i32, i32, i32) {
    %c0_i32 = arith.constant 0 : i32
    %c0_i32_0 = arith.constant 0 : i32
    return %arg0, %arg1, %c0_i32 : i32, i32, i32
  }
}

</mosaic_0001>

<bundles_post_ra>
// kernel: tpu_custom_call.1
= control target key start
LH: loop header
LB: loop body
LE: loop exit
PB: predicated region body
PF: predicated region fallthrough
CT: control target
= control target key end

     0   :  { %12 = vsyncpa [#allocation3], 0  ;;  %s4483_s0 = inlined_call_operand.vmem [shape: bf16[2,512,128], index: 0, kind: input, shape index: {}]   ;;  %s4484_s1 = inlined_call_operand.vmem [shape: bf16[128,256], index: 1, kind: input, shape index: {}]   ;;  %s4485_s2 = inlined_call_operand.vmem [shape: f32[1,256], index: 2, kind: input, shape index: {}]   ;;  %s4486_s3 = inlined_call_operand.vmem [shape: f32[512,1], index: 3, kind: input, shape index: {}]   ;;  %s4487_s4 = inlined_call_operand.vmem [shape: f32[512,1], index: 4, kind: input, shape index: {}]   ;;  %s4488_s5 = inlined_call_operand.vmem [shape: bf16[256,128], index: 5, kind: input, shape index: {}]   ;;  %s4489_s6 = inlined_call_operand.vmem [shape: f32[1,128], index: 6, kind: input, shape index: {}]   ;;  %s4490_s7 = inlined_call_operand.hbm [shape: f32[2,512,128], index: 7, kind: output, shape index: {}]  }
   0x1   :  { %14 = vsyncpa [#allocation3 + $0x1], 0  ;;  %s3020_s24 = smov 0   ;;  %s3022_s25 = smov 0  }
   0x2   :  { %s3024_s26 = smov 0   ;;  %s3026_s27 = smov 0  }
   0x3   :  { %s3028_s28 = smov 0   ;;  %s3030_s29 = smov 0  }
   0x4   :  { %s3032_s30 = smov 0   ;;  %s3034_s8 = smov 0  }
   0x5 LB: > { %4546 = sst [smem:[#allocation5_spill]] %s2970_s30  ;;  %s2488_s9 = sadd.s32 4294967295, %s2974_s8   ;;  %s2974_s8 = sphi %s3034_s8, %s20_s8   ;;  %s2970_s30 = sphi %s3032_s30, %s4656_s30   ;;  %s2966_s29 = sphi %s3030_s29, %s4661_s29   ;;  %s2962_s28 = sphi %s3028_s28, %s4654_s28   ;;  %s2958_s27 = sphi %s3026_s27, %s4660_s27   ;;  %s2954_s26 = sphi %s3024_s26, %s4659_s26   ;;  %s2950_s25 = sphi %s3022_s25, %s4658_s25   ;;  %s2946_s24 = sphi %s3020_s24, %s4657_s24  }
   0x6   : > { %s2489_s10 = sadd.s32 4294967294, %s2974_s8   ;;  %s29_s11 = sadd.s32 1, %s2966_s29 }
   0x7   : > { %p30_p0 = scmp.ge.s32.totalorder %s29_s11, 4  ;;  %s32_s12 = sadd.s32 1, %s2970_s30 }
   0x8   : > { %p215_p1 = scmp.ne.s32.totalorder %s2954_s26, %s2950_s25  ;;  %p216_p2 = scmp.eq.s32.totalorder %s2488_s9, 7 }
   0x9   : > { %s4663_s11 = smov (%p30_p0, %s29_s11), 0  ;;  %s4665_s12 = smov (!%p30_p0, %s32_s12), %s2970_s30 }
   0xa   : > { %4547 = sst [smem:[#allocation6_spill]] %s4663_s11  ;;  %s201_s13 = ssub.s32 %s2966_s29, %s4663_s11 }
   0xb   : > { %p3071_p3 = por %p216_p2, %p215_p1  ;;  %p34_p4 = scmp.ge.s32.totalorder %s4665_s12, 2 }
   0xc   : > { %p221_p5 = scmp.ne.s32.totalorder %s2950_s25, %s2946_s24  ;;  %p222_p6 = scmp.eq.s32.totalorder %s2489_s10, 7 }
   0xd   : > { %p2492_p7 = scmp.ge.s32.totalorder %s2974_s8, 1  ;;  %s4667_s12 = smov (%p34_p4, %s4665_s12), 0 }
   0xe   : > { %4549 = sst [smem:[#allocation7_spill]] %s4667_s12  ;;  %p3080_p8 = por %p222_p6, %p221_p5 }
   0xf   : > { %p283_p9 = scmp.lt.s32.totalorder %s2974_s8, 9  ;;  %s200_s16 = ssub.s32 %s2970_s30, %s4667_s12 }
  0x10   : > { %s205_s17 = sadd.s32 1, %s2954_s26  ;;  %s202_s18 = sor.u32 %s201_s13, %s200_s16 }
  0x11   : > { %p284_p10 = pnand %p2492_p7, %p283_p9  ;;  %p203_p11 = scmp.eq.s32.totalorder %s202_s18, 0 }
  0x13   : > { %s3089_s19 = scalar_select %p203_p11, %s2954_s26, %s205_s17  }
  0x14   : > { %287 = sbr.rel (%p284_p10) target bundleno = 1076 (0x434), region = 48 }
  0x1b   : > { %v2688_v0 = vld [vmem:[%s4484_s1 + $0x4] ss:$8 sps:$4 sm:$0xff]   ;;  %s3095_s22 = sshll.u32 %s2958_s27, 4  ;;  %v2690_v1 = vld [vmem:[%s4484_s1] ss:$8 sps:$4 sm:$0xff]   ;;  %v2976_v2 = vmov 0   ;;  %v387_v25 = vlaneseq }
  0x1c   : > { %557 = vmatprep.mubr.bf16.mxu0 %v2976_v2  ;;  %p330_p12 = scmp.lt.s32.totalorder %s2962_s28, 1  ;;  %p332_p13 = scmp.lt.s32.totalorder %s3095_s22, 63  ;;  %2687 = vset.pattern.permute.xlu1 %v2976_v2  ;;  %v2691_v3 = vld [vmem:[%s4484_s1 + $0x14] ss:$8 sps:$4 sm:$0xff]   ;;  %v2693_v4 = vld [vmem:[%s4484_s1 + $0x10] ss:$8 sps:$4 sm:$0xff]  }
  0x1d   : > { %525 = vmatprep.subr.bf16.mxu0 %v2688_v0  ;;  %2686 = vset.pattern.permute.xlu0 %v2976_v2  ;;  %v2694_v5 = vld [vmem:[%s4484_s1 + $0x24] ss:$8 sps:$4 sm:$0xff]   ;;  %v2696_v6 = vld [vmem:[%s4484_s1 + $0x20] ss:$8 sps:$4 sm:$0xff]   ;;  %v2697_v7 = vld [vmem:[%s4484_s1 + $0x34] ss:$8 sps:$4 sm:$0xff]  }
  0x1e   : > { %526 = vmatpush1.bf16.msra.mxu0 %v2690_v1  ;;  %s331_s17 = scalar_select %p330_p12, %s2962_s28, 1  ;;  %v2699_v8 = vld [vmem:[%s4484_s1 + $0x30] ss:$8 sps:$4 sm:$0xff]   ;;  %v2700_v9 = vld [vmem:[%s4484_s1 + $0x44] ss:$8 sps:$4 sm:$0xff]   ;;  %v388_v26 = vshrl.u32 %v387_v25, 7 }
  0x1f   : > { %527 = vmatprep.subr.bf16.mxu0 %v2691_v3  ;;  %s3113_s21 = scalar_select %p332_p13, %s3095_s22, 63  ;;  %v2702_v10 = vld [vmem:[%s4484_s1 + $0x40] ss:$8 sps:$4 sm:$0xff]   ;;  %v2703_v11 = vld [vmem:[%s4484_s1 + $0x54] ss:$8 sps:$4 sm:$0xff]  }
  0x20   : > { %s2495_s23 = sshll.u32 %s331_s17, 6  ;;  %v2705_v12 = vld [vmem:[%s4484_s1 + $0x50] ss:$8 sps:$4 sm:$0xff]   ;;  %v2706_v13 = vld [vmem:[%s4484_s1 + $0x64] ss:$8 sps:$4 sm:$0xff]   ;;  %v389_v27 = vsub.s32 0, %v388_v26 }
  0x21   : > { %s335_s9 = sadd.s32 %s2495_s23, %s3113_s21  ;;  %v2708_v14 = vld [vmem:[%s4484_s1 + $0x60] ss:$8 sps:$4 sm:$0xff]   ;;  %v2709_v15 = vld [vmem:[%s4484_s1 + $0x74] ss:$8 sps:$4 sm:$0xff]   ;;  %v2711_v16 = vld [vmem:[%s4484_s1 + $0x70] ss:$8 sps:$4 sm:$0xff]  }
  0x22   : > { %528 = vmatpush1.bf16.msra.mxu0 %v2693_v4  ;;  %s2496_s12 = sshll.u32 %s335_s9, 2  ;;  %v385_v28 = vld [vmem:[%s4485_s2] sm:$0x3]  ;;  %v393_v29 = vsub.s32 1, %v388_v26  ;;  %s2544_s17 = sshll.u32 %s2962_s28, 6 }
  0x23   : > { %529 = vmatprep.subr.bf16.mxu0 %v2694_v5  ;;  %s3125_s18 = scalar_lea.vmem %s4483_s0, %s2496_s12  ;;  %v3165_v30 = vrot.slane %v385_v28, %v389_v27  ;;  %s2977_s12 = smov [#allocation2]  }
  0x24   : > { %v2712_v17 = vld [vmem:[%s3125_s18] sm:$0xff]   ;;  %v2713_v18 = vld [vmem:[%s3125_s18 + $0x8] sm:$0xff]   ;;  %v2714_v19 = vld [vmem:[%s3125_s18 + $0x10] sm:$0xff]   ;;  %v3167_v31 = vrot.slane %v385_v28, %v393_v29 }
  0x25   : > { %v2715_v20 = vld [vmem:[%s3125_s18 + $0x18] sm:$0xff]   ;;  %v2716_v21 = vld [vmem:[%s3125_s18 + $0x20] sm:$0xff]   ;;  %v2717_v22 = vld [vmem:[%s3125_s18 + $0x28] sm:$0xff]  }
  0x26   : > { %530 = vmatpush1.bf16.msra.mxu0 %v2696_v6  ;;  %v2718_v23 = vld [vmem:[%s3125_s18 + $0x30] sm:$0xff]   ;;  %v2719_v24 = vld [vmem:[%s3125_s18 + $0x38] sm:$0xff]   ;;  %s2498_s18 = sshll.u32 %s3113_s21, 3 }
  0x27   : > { %531 = vmatprep.subr.bf16.mxu0 %v2697_v7  ;;  %s3375_s20 = scalar_lea.vmem %s4486_s3, %s2498_s18  ;;  %s3384_s23 = scalar_lea.vmem %s4487_s4, %s2498_s18 }
  0x28   : > { %s326_s18 = sand.u32 1, %s2950_s25  }
  0x29   : > { %s2493_s27 = sshll.u32 %s326_s18, 7 }
  0x2a   : > { %532 = vmatpush1.bf16.msra.mxu0 %v2699_v8  ;;  %s4386_s21 = scalar_lea.vmem [#allocation2], %s2493_s27  ;;  %s2884_s27 = sshll.u32 %s2977_s12, 4  ;;  %s2885_s27 = int_to_ptr.vmem [resolvable:$false] %s2884_s27 }
  0x2b   : > { %533 = vmatprep.subr.bf16.mxu0 %v2700_v9  ;;  %s2382_s28 = sshll.u32 %s4386_s21, 4  ;;  %s2886_s16 = scalar_lea.vmem %s2885_s27, 4096  ;;  %s4426_s28 = int_to_ptr.vmem [resolvable:$true] %s2382_s28 }
  0x2c   : > { %s2880_s11 = scalar_lea.vmem %s4426_s28, 2048  ;;  %p2887_p4 = scmp.lt.s32.totalorder %s4426_s28, %s2885_s27 }
  0x2d   : > { %p2881_p0 = scmp.ne.s32.totalorder %s4426_s28, %s2880_s11  ;;  %p2888_p5 = scmp.lt.s32.totalorder %s2886_s16, %s2880_s11 }
  0x2e   : > { %534 = vmatpush1.bf16.msra.mxu0 %v2702_v10 }
  0x2f   : > { %535 = vmatprep.subr.bf16.mxu0 %v2703_v11  ;;  %p2882_p1 = pnand %p2881_p0, %p3071_p3  ;;  %p2889_p6 = por %p2888_p5, %p2887_p4 }
  0x31   : > { %p2883_p2 = pneg %p2882_p1 }
  0x32   : > { %536 = vmatpush1.bf16.msra.mxu0 %v2705_v12 }
  0x33   : > { %537 = vmatprep.subr.bf16.mxu0 %v2706_v13  ;;  %p2890_p7 = pnand %p2889_p6, %p2883_p2 }
  0x36   : > { %538 = vmatpush1.bf16.msra.mxu0 %v2708_v14 }
  0x37   : > { %539 = vmatprep.subr.bf16.mxu0 %v2709_v15 }
  0x3a   : > { %540 = vmatpush1.bf16.msra.mxu0 %v2711_v16 }
  0x3d   : > { %558 = vmatmul.mubr.bf16.vlgmr.msra.gmra.mrb[0].mxu0 %v2712_v17 }
  0x3e   : > { %567 = vmatprep.mubr.bf16.mxu0 %v2976_v2 }
  0x45   : > { %568 = vmatmul.mubr.bf16.gmra.mrb[4].mxu0 %v2713_v18 }
  0x46   : > { %577 = vmatprep.mubr.bf16.mxu0 %v2976_v2 }
  0x4d   : > { %578 = vmatmul.mubr.bf16.gmra.mrb[8].mxu0 %v2714_v19 }
  0x4e   : > { %587 = vmatprep.mubr.bf16.mxu0 %v2976_v2 }
  0x55   : > { %588 = vmatmul.mubr.bf16.gmra.mrb[12].mxu0 %v2715_v20 }
  0x56   : > { %597 = vmatprep.mubr.bf16.mxu0 %v2976_v2 }
  0x5d   : > { %598 = vmatmul.mubr.bf16.gmra.mrb[16].mxu0 %v2716_v21 }
  0x5e   : > { %607 = vmatprep.mubr.bf16.mxu0 %v2976_v2 }
  0x65   : > { %608 = vmatmul.mubr.bf16.gmra.mrb[20].mxu0 %v2717_v22 }
  0x66   : > { %617 = vmatprep.mubr.bf16.mxu0 %v2976_v2 }
  0x6d   : > { %618 = vmatmul.mubr.bf16.gmra.mrb[24].mxu0 %v2718_v23 }
  0x6e   : > { %627 = vmatprep.mubr.bf16.mxu0 %v2976_v2 }
  0x75   : > { %628 = vmatmul.mubr.bf16.gmra.mrb[28].mxu0 %v2719_v24 }
 0x110   : > { %v559_v32 = vpop.f32.mrb[0].mxu0 }
 0x111   : > { %v3170_v33 = vadd.f32 %v559_v32, %v3165_v30  ;;  %v561_v34 = vpop.f32.mrb[1].mxu0 }
 0x112   : > { %v3173_v35 = vadd.f32 %v561_v34, %v3167_v31  ;;  %v563_v36 = vpop.f32.mrb[2].mxu0 }
 0x113   : > { %v3176_v37 = vadd.f32 %v563_v36, %v3165_v30  ;;  %v565_v38 = vpop.f32.mrb[3].mxu0  ;;  %v742_v39 = vmul.f32 %v3170_v33, %v3170_v33 }
 0x114   : > { %v3181_v40 = vadd.f32 %v565_v38, %v3167_v31  ;;  %v638_v41 = vadd.f32 %v3173_v35, %v3170_v33  ;;  %v743_v42 = vmul.f32 %v3173_v35, %v3173_v35 }
 0x115   : > { %v744_v44 = vmul.f32 %v3176_v37, %v3176_v37 }
 0x116   : > { %639 = vadd.xlane.f32.xlu0 %v638_v41  ;;  %v774_v43 = vadd.f32 %v743_v42, %v742_v39  ;;  %v745_v45 = vmul.f32 %v3181_v40, %v3181_v40  ;;  %v641_v47 = vadd.f32 %v3181_v40, %v3176_v37 }
 0x118   : > { %v569_v46 = vpop.f32.mrb[4].mxu0  ;;  %775 = vadd.xlane.f32.xlu1 %v774_v43  ;;  %v777_v52 = vadd.f32 %v745_v45, %v744_v44 }
 0x119   : > { %v3194_v48 = vadd.f32 %v569_v46, %v3165_v30  ;;  %v571_v49 = vpop.f32.mrb[5].mxu0 }
 0x11a   : > { %v3197_v50 = vadd.f32 %v571_v49, %v3167_v31  ;;  %v573_v51 = vpop.f32.mrb[6].mxu0  ;;  %642 = vadd.xlane.f32.xlu0 %v641_v47 }
 0x11b   : > { %v3200_v53 = vadd.f32 %v573_v51, %v3165_v30  ;;  %v575_v54 = vpop.f32.mrb[7].mxu0  ;;  %v746_v55 = vmul.f32 %v3194_v48, %v3194_v48 }
 0x11c   : > { %v3205_v56 = vadd.f32 %v575_v54, %v3167_v31  ;;  %778 = vadd.xlane.f32.xlu1 %v777_v52  ;;  %v644_v57 = vadd.f32 %v3197_v50, %v3194_v48  ;;  %v747_v58 = vmul.f32 %v3197_v50, %v3197_v50 }
 0x11d   : > { %v748_v59 = vmul.f32 %v3200_v53, %v3200_v53 }
 0x11e   : > { %645 = vadd.xlane.f32.xlu0 %v644_v57  ;;  %v647_v60 = vadd.f32 %v3205_v56, %v3200_v53  ;;  %v780_v61 = vadd.f32 %v747_v58, %v746_v55  ;;  %v749_v62 = vmul.f32 %v3205_v56, %v3205_v56 }
 0x120   : > { %v579_v63 = vpop.f32.mrb[8].mxu0  ;;  %648 = vadd.xlane.f32.xlu1 %v647_v60  ;;  %v783_v0 = vadd.f32 %v749_v62, %v748_v59 }
 0x121   : > { %v3218_v1 = vadd.f32 %v579_v63, %v3165_v30  ;;  %v581_v2 = vpop.f32.mrb[9].mxu0 }
 0x122   : > { %v3221_v3 = vadd.f32 %v581_v2, %v3167_v31  ;;  %v583_v4 = vpop.f32.mrb[10].mxu0  ;;  %781 = vadd.xlane.f32.xlu0 %v780_v61 }
 0x123   : > { %v3224_v5 = vadd.f32 %v583_v4, %v3165_v30  ;;  %v585_v6 = vpop.f32.mrb[11].mxu0  ;;  %v750_v7 = vmul.f32 %v3218_v1, %v3218_v1 }
 0x124   : > { %v3229_v8 = vadd.f32 %v585_v6, %v3167_v31  ;;  %784 = vadd.xlane.f32.xlu1 %v783_v0  ;;  %v650_v9 = vadd.f32 %v3221_v3, %v3218_v1  ;;  %v751_v10 = vmul.f32 %v3221_v3, %v3221_v3 }
 0x125   : > { %v752_v11 = vmul.f32 %v3224_v5, %v3224_v5 }
 0x126   : > { %v653_v12 = vadd.f32 %v3229_v8, %v3224_v5  ;;  %651 = vadd.xlane.f32.xlu0 %v650_v9  ;;  %v753_v13 = vmul.f32 %v3229_v8, %v3229_v8  ;;  %v786_v14 = vadd.f32 %v751_v10, %v750_v7 }
 0x128   : > { %v589_v15 = vpop.f32.mrb[12].mxu0  ;;  %654 = vadd.xlane.f32.xlu1 %v653_v12  ;;  %v789_v16 = vadd.f32 %v753_v13, %v752_v11 }
 0x129   : > { %v3242_v17 = vadd.f32 %v589_v15, %v3165_v30  ;;  %v591_v18 = vpop.f32.mrb[13].mxu0 }
 0x12a   : > { %v3245_v19 = vadd.f32 %v591_v18, %v3167_v31  ;;  %v593_v20 = vpop.f32.mrb[14].mxu0  ;;  %787 = vadd.xlane.f32.xlu0 %v786_v14 }
 0x12b   : > { %v3248_v21 = vadd.f32 %v593_v20, %v3165_v30  ;;  %v595_v22 = vpop.f32.mrb[15].mxu0  ;;  %v754_v23 = vmul.f32 %v3242_v17, %v3242_v17 }
 0x12c   : > { %v3253_v24 = vadd.f32 %v595_v22, %v3167_v31  ;;  %790 = vadd.xlane.f32.xlu1 %v789_v16  ;;  %v656_v25 = vadd.f32 %v3245_v19, %v3242_v17  ;;  %v755_v26 = vmul.f32 %v3245_v19, %v3245_v19 }
 0x12d   : > { %v756_v27 = vmul.f32 %v3248_v21, %v3248_v21 }
 0x12e   : > { %v659_v28 = vadd.f32 %v3253_v24, %v3248_v21  ;;  %657 = vadd.xlane.f32.xlu0 %v656_v25  ;;  %v757_v29 = vmul.f32 %v3253_v24, %v3253_v24  ;;  %v792_v32 = vadd.f32 %v755_v26, %v754_v23 }
 0x130   : > { %v599_v34 = vpop.f32.mrb[16].mxu0  ;;  %660 = vadd.xlane.f32.xlu1 %v659_v28  ;;  %v795_v36 = vadd.f32 %v757_v29, %v756_v27 }
 0x131   : > { %v3266_v38 = vadd.f32 %v599_v34, %v3165_v30  ;;  %v601_v39 = vpop.f32.mrb[17].mxu0 }
 0x132   : > { %v3269_v41 = vadd.f32 %v601_v39, %v3167_v31  ;;  %v603_v42 = vpop.f32.mrb[18].mxu0  ;;  %793 = vadd.xlane.f32.xlu0 %v792_v32 }
 0x133   : > { %4551 = vst [vmem:[#allocation8_spill] sm:$0xff] %v3266_v38  ;;  %v3272_v43 = vadd.f32 %v603_v42, %v3165_v30  ;;  %v605_v44 = vpop.f32.mrb[19].mxu0  ;;  %v758_v45 = vmul.f32 %v3266_v38, %v3266_v38 }
 0x134   : > { %4552 = vst [vmem:[#allocation9_spill] sm:$0xff] %v3269_v41  ;;  %v3277_v46 = vadd.f32 %v605_v44, %v3167_v31  ;;  %796 = vadd.xlane.f32.xlu1 %v795_v36  ;;  %v662_v47 = vadd.f32 %v3269_v41, %v3266_v38  ;;  %v759_v49 = vmul.f32 %v3269_v41, %v3269_v41 }
 0x135   : > { %v760_v51 = vmul.f32 %v3272_v43, %v3272_v43 }
 0x136   : > { %v665_v52 = vadd.f32 %v3277_v46, %v3272_v43  ;;  %663 = vadd.xlane.f32.xlu0 %v662_v47  ;;  %v761_v54 = vmul.f32 %v3277_v46, %v3277_v46  ;;  %v798_v55 = vadd.f32 %v759_v49, %v758_v45 }
 0x138   : > { %v609_v57 = vpop.f32.mrb[20].mxu0  ;;  %666 = vadd.xlane.f32.xlu1 %v665_v52  ;;  %v801_v58 = vadd.f32 %v761_v54, %v760_v51 }
 0x139   : > { %v3290_v59 = vadd.f32 %v609_v57, %v3165_v30  ;;  %v611_v60 = vpop.f32.mrb[21].mxu0 }
 0x13a   : > { %v3293_v61 = vadd.f32 %v611_v60, %v3167_v31  ;;  %v613_v62 = vpop.f32.mrb[22].mxu0  ;;  %799 = vadd.xlane.f32.xlu0 %v798_v55 }
 0x13b   : > { %4553 = vst [vmem:[#allocation10_spill] sm:$0xff] %v3290_v59  ;;  %v3296_v63 = vadd.f32 %v613_v62, %v3165_v30  ;;  %v615_v0 = vpop.f32.mrb[23].mxu0  ;;  %v762_v2 = vmul.f32 %v3290_v59, %v3290_v59 }
 0x13c   : > { %4554 = vst [vmem:[#allocation11_spill] sm:$0xff] %v3293_v61  ;;  %v3301_v4 = vadd.f32 %v615_v0, %v3167_v31  ;;  %802 = vadd.xlane.f32.xlu1 %v801_v58  ;;  %v668_v6 = vadd.f32 %v3293_v61, %v3290_v59  ;;  %v763_v7 = vmul.f32 %v3293_v61, %v3293_v61 }
 0x13d   : > { %v764_v9 = vmul.f32 %v3296_v63, %v3296_v63 }
 0x13e   : > { %v671_v10 = vadd.f32 %v3301_v4, %v3296_v63  ;;  %669 = vadd.xlane.f32.xlu0 %v668_v6  ;;  %v765_v11 = vmul.f32 %v3301_v4, %v3301_v4  ;;  %v804_v12 = vadd.f32 %v763_v7, %v762_v2 }
 0x140   : > { %v619_v13 = vpop.f32.mrb[24].mxu0  ;;  %672 = vadd.xlane.f32.xlu1 %v671_v10  ;;  %v807_v14 = vadd.f32 %v765_v11, %v764_v9 }
 0x141   : > { %v3314_v15 = vadd.f32 %v619_v13, %v3165_v30  ;;  %v621_v16 = vpop.f32.mrb[25].mxu0 }
 0x142   : > { %v3317_v18 = vadd.f32 %v621_v16, %v3167_v31  ;;  %v623_v20 = vpop.f32.mrb[26].mxu0  ;;  %805 = vadd.xlane.f32.xlu0 %v804_v12 }
 0x143   : > { %4555 = vst [vmem:[#allocation12_spill] sm:$0xff] %v3314_v15  ;;  %v3320_v22 = vadd.f32 %v623_v20, %v3165_v30  ;;  %v625_v23 = vpop.f32.mrb[27].mxu0  ;;  %v766_v25 = vmul.f32 %v3314_v15, %v3314_v15 }
 0x144   : > { %4556 = vst [vmem:[#allocation13_spill] sm:$0xff] %v3317_v18  ;;  %v3325_v26 = vadd.f32 %v625_v23, %v3167_v31  ;;  %808 = vadd.xlane.f32.xlu1 %v807_v14  ;;  %v674_v27 = vadd.f32 %v3317_v18, %v3314_v15  ;;  %v767_v28 = vmul.f32 %v3317_v18, %v3317_v18 }
 0x145   : > { %4557 = vst [vmem:[#allocation14_spill] sm:$0xff] %v3320_v22  ;;  %v768_v29 = vmul.f32 %v3320_v22, %v3320_v22 }
 0x146   : > { %4558 = vst [vmem:[#allocation15_spill] sm:$0xff] %v3325_v26  ;;  %v677_v32 = vadd.f32 %v3325_v26, %v3320_v22  ;;  %675 = vadd.xlane.f32.xlu0 %v674_v27  ;;  %v769_v34 = vmul.f32 %v3325_v26, %v3325_v26  ;;  %v810_v36 = vadd.f32 %v767_v28, %v766_v25 }
 0x148   : > { %v629_v39 = vpop.f32.mrb[28].mxu0  ;;  %678 = vadd.xlane.f32.xlu1 %v677_v32  ;;  %v813_v42 = vadd.f32 %v769_v34, %v768_v29 }
 0x149   : > { %v3338_v44 = vadd.f32 %v629_v39, %v3165_v30  ;;  %v631_v45 = vpop.f32.mrb[29].mxu0 }
 0x14a   : > { %v3341_v47 = vadd.f32 %v631_v45, %v3167_v31  ;;  %v633_v49 = vpop.f32.mrb[30].mxu0  ;;  %811 = vadd.xlane.f32.xlu0 %v810_v36 }
 0x14b   : > { %4559 = vst [vmem:[#allocation16_spill] sm:$0xff] %v3338_v44  ;;  %v3344_v51 = vadd.f32 %v633_v49, %v3165_v30  ;;  %v635_v52 = vpop.f32.mrb[31].mxu0  ;;  %v770_v54 = vmul.f32 %v3338_v44, %v3338_v44 }
 0x14c   : > { %4560 = vst [vmem:[#allocation17_spill] sm:$0xff] %v3341_v47  ;;  %v3349_v55 = vadd.f32 %v635_v52, %v3167_v31  ;;  %814 = vadd.xlane.f32.xlu1 %v813_v42  ;;  %v680_v57 = vadd.f32 %v3341_v47, %v3338_v44  ;;  %v771_v58 = vmul.f32 %v3341_v47, %v3341_v47  ;;  %v955_v47 = vld [vmem:[%s3384_s23 + $0x28] sm:$0xff] }
 0x14d   : > { %4561 = vst [vmem:[#allocation18_spill] sm:$0xff] %v3344_v51  ;;  %v772_v60 = vmul.f32 %v3344_v51, %v3344_v51 }
 0x14e   : > { %4562 = vst [vmem:[#allocation19_spill] sm:$0xff] %v3349_v55  ;;  %v683_v30 = vadd.f32 %v3349_v55, %v3344_v51  ;;  %681 = vadd.xlane.f32.xlu0 %v680_v57  ;;  %v773_v62 = vmul.f32 %v3349_v55, %v3349_v55  ;;  %v816_v0 = vadd.f32 %v771_v58, %v770_v54 }
 0x150   : > { %684 = vadd.xlane.f32.xlu1 %v683_v30  ;;  %v819_v31 = vadd.f32 %v773_v62, %v772_v60 }
 0x152   : > { %817 = vadd.xlane.f32.xlu0 %v816_v0 }
 0x154   : > { %820 = vadd.xlane.f32.xlu1 %v819_v31 }
 0x1a3   : > { %v640_v2 = vpop.xlane.xlu0 %639 }
 0x1a5   : > { %v776_v6 = vpop.xlane.xlu1 %775 }
 0x1a7   : > { %v643_v7 = vpop.xlane.xlu0 %642 }
 0x1a8   : > { %v686_v9 = vadd.f32 %v643_v7, %v640_v2 }
 0x1a9   : > { %v779_v10 = vpop.xlane.xlu1 %778 }
 0x1aa   : > { %v687_v11 = vrot.slane %v686_v9, 4  ;;  %v822_v12 = vadd.f32 %v779_v10, %v776_v6 }
 0x1ab   : > { %v646_v13 = vpop.xlane.xlu0 %645 }
 0x1ac   : > { %v688_v14 = vadd.f32 %v687_v11, %v686_v9  ;;  %v823_v16 = vrot.slane %v822_v12, 4 }
 0x1ad   : > { %v649_v20 = vpop.xlane.xlu1 %648 }
 0x1ae   : > { %v689_v23 = vrot.slane %v688_v14, 2  ;;  %v824_v25 = vadd.f32 %v823_v16, %v822_v12  ;;  %v693_v27 = vadd.f32 %v649_v20, %v646_v13 }
 0x1af   : > { %v782_v28 = vpop.xlane.xlu0 %781 }
 0x1b0   : > { %v690_v29 = vadd.f32 %v689_v23, %v688_v14  ;;  %v825_v32 = vrot.slane %v824_v25, 2  ;;  %v694_v34 = vrot.slane %v693_v27, 4 }
 0x1b1   : > { %v785_v36 = vpop.xlane.xlu1 %784 }
 0x1b2   : > { %v691_v39 = vrot.slane %v690_v29, 1  ;;  %v826_v42 = vadd.f32 %v825_v32, %v824_v25  ;;  %v695_v45 = vadd.f32 %v694_v34, %v693_v27  ;;  %v829_v49 = vadd.f32 %v785_v36, %v782_v28 }
 0x1b3   : > { %v652_v52 = vpop.xlane.xlu0 %651 }
 0x1b4   : > { %v692_v54 = vadd.f32 %v691_v39, %v690_v29  ;;  %v827_v57 = vrot.slane %v826_v42, 1  ;;  %v696_v58 = vrot.slane %v695_v45, 2  ;;  %v830_v60 = vrot.slane %v829_v49, 4 }
 0x1b5   : > { %v655_v30 = vpop.xlane.xlu1 %654 }
 0x1b6   : > { %v3361_v62 = vmul.f32 0.00024414063, %v692_v54  ;;  %v828_v0 = vadd.f32 %v827_v57, %v826_v42  ;;  %v697_v31 = vadd.f32 %v696_v58, %v695_v45  ;;  %v831_v2 = vadd.f32 %v830_v60, %v829_v49 }
 0x1b7   : > { %v700_v6 = vadd.f32 %v655_v30, %v652_v52  ;;  %v788_v7 = vpop.xlane.xlu0 %787 }
 0x1b8   : > { %v886_v9 = vmul.f32 0.00024414063, %v828_v0  ;;  %v894_v10 = vmul.f32 %v3361_v62, %v3361_v62  ;;  %v698_v11 = vrot.slane %v697_v31, 1  ;;  %v832_v12 = vrot.slane %v831_v2, 2 }
 0x1b9   : > { %v701_v13 = vrot.slane %v700_v6, 4  ;;  %v791_v14 = vpop.xlane.xlu1 %790 }
 0x1ba   : > { %v902_v16 = vsub.f32 %v886_v9, %v894_v10  ;;  %v699_v20 = vadd.f32 %v698_v11, %v697_v31  ;;  %v833_v23 = vadd.f32 %v832_v12, %v831_v2  ;;  %v836_v25 = vadd.f32 %v791_v14, %v788_v7 }
 0x1bb   : > { %v702_v27 = vadd.f32 %v701_v13, %v700_v6  ;;  %v658_v28 = vpop.xlane.xlu0 %657 }
 0x1bc   : > { %v910_v29 = vmax.f32 %v902_v16, 0.0  ;;  %v3365_v32 = vmul.f32 0.00024414063, %v699_v20  ;;  %v834_v34 = vrot.slane %v833_v23, 1  ;;  %v837_v36 = vrot.slane %v836_v25, 4 }
 0x1bd   : > { %v703_v39 = vrot.slane %v702_v27, 2  ;;  %v661_v42 = vpop.xlane.xlu1 %660 }
 0x1be   : > { %v918_v45 = vadd.f32 1e-05, %v910_v29  ;;  %v835_v49 = vadd.f32 %v834_v34, %v833_v23  ;;  %v838_v52 = vadd.f32 %v837_v36, %v836_v25  ;;  %v707_v57 = vadd.f32 %v661_v42, %v658_v28 }
 0x1bf   : > { %v704_v54 = vadd.f32 %v703_v39, %v702_v27  ;;  %v794_v58 = vpop.xlane.xlu0 %793  ;;  %v895_v30 = vmul.f32 %v3365_v32, %v3365_v32 }
 0x1c0   : > { %2736 = vrsqrt.f32 %v918_v45  ;;  %v887_v60 = vmul.f32 0.00024414063, %v835_v49  ;;  %v839_v0 = vrot.slane %v838_v52, 2  ;;  %v708_v2 = vrot.slane %v707_v57, 4 }
 0x1c1   : > { %v705_v31 = vrot.slane %v704_v54, 1  ;;  %v797_v6 = vpop.xlane.xlu1 %796 }
 0x1c2   : > { %v903_v7 = vsub.f32 %v887_v60, %v895_v30  ;;  %v840_v9 = vadd.f32 %v839_v0, %v838_v52  ;;  %v843_v10 = vadd.f32 %v797_v6, %v794_v58  ;;  %v709_v12 = vadd.f32 %v708_v2, %v707_v57  ;;  %v935_v57 = vld [vmem:[%s3375_s20 + $0x8] sm:$0xff]  ;;  %v934_v58 = vld [vmem:[%s3375_s20] sm:$0xff] }
 0x1c3   : > { %v706_v11 = vadd.f32 %v705_v31, %v704_v54  ;;  %v664_v13 = vpop.xlane.xlu0 %663 }
 0x1c4   : > { %v911_v14 = vmax.f32 %v903_v7, 0.0  ;;  %v841_v16 = vrot.slane %v840_v9, 1  ;;  %v844_v20 = vrot.slane %v843_v10, 4  ;;  %v710_v25 = vrot.slane %v709_v12, 2 }
 0x1c5   : > { %v3370_v23 = vmul.f32 0.00024414063, %v706_v11  ;;  %v667_v27 = vpop.xlane.xlu1 %666 }
 0x1c6   : > { %v919_v28 = vadd.f32 1e-05, %v911_v14  ;;  %v842_v29 = vadd.f32 %v841_v16, %v840_v9  ;;  %v845_v34 = vadd.f32 %v844_v20, %v843_v10  ;;  %v714_v36 = vadd.f32 %v667_v27, %v664_v13 }
 0x1c7   : > { %v896_v39 = vmul.f32 %v3370_v23, %v3370_v23  ;;  %v711_v42 = vadd.f32 %v710_v25, %v709_v12  ;;  %v800_v45 = vpop.xlane.xlu0 %799  ;;  %v950_v25 = vld [vmem:[%s3384_s23] sm:$0xff] }
 0x1c8   : > { %v888_v49 = vmul.f32 0.00024414063, %v842_v29  ;;  %v846_v52 = vrot.slane %v845_v34, 2  ;;  %v715_v54 = vrot.slane %v714_v36, 4  ;;  %2738 = vrsqrt.f32 %v919_v28 }
 0x1c9   : > { %v712_v60 = vrot.slane %v711_v42, 1  ;;  %v803_v30 = vpop.xlane.xlu1 %802 }
 0x1ca   : > { %v2737_v0 = vpop.eup %2736  ;;  %v904_v31 = vsub.f32 %v888_v49, %v896_v39  ;;  %v847_v2 = vadd.f32 %v846_v52, %v845_v34  ;;  %v716_v6 = vadd.f32 %v715_v54, %v714_v36  ;;  %v850_v7 = vadd.f32 %v803_v30, %v800_v45 }
 0x1cb   : > { %v713_v9 = vadd.f32 %v712_v60, %v711_v42  ;;  %v967_v10 = vmul.f32 %v2737_v0, %v935_v57  ;;  %v966_v11 = vmul.f32 %v2737_v0, %v934_v58  ;;  %v670_v12 = vpop.xlane.xlu0 %669  ;;  %v951_v0 = vld [vmem:[%s3384_s23 + $0x8] sm:$0xff] }
 0x1cc   : > { %v912_v13 = vmax.f32 %v904_v31, 0.0  ;;  %v848_v14 = vrot.slane %v847_v2, 1  ;;  %v717_v16 = vrot.slane %v716_v6, 2  ;;  %v851_v20 = vrot.slane %v850_v7, 4 }
 0x1cd   : > { %v3387_v27 = vmul.f32 0.00024414063, %v713_v9  ;;  %v673_v28 = vpop.xlane.xlu1 %672  ;;  %1021 = vperm.xlu1 %2687, %v967_v10   ;;  %1016 = vperm.xlu0 %2686, %v966_v11   ;;  %v982_v29 = vmul.f32 %v966_v11, %v3361_v62  ;;  %v983_v57 = vmul.f32 %v967_v10, %v3361_v62 }
 0x1ce   : > { %v920_v34 = vadd.f32 1e-05, %v912_v13  ;;  %v849_v36 = vadd.f32 %v848_v14, %v847_v2  ;;  %v718_v39 = vadd.f32 %v717_v16, %v716_v6  ;;  %v852_v42 = vadd.f32 %v851_v20, %v850_v7 }
 0x1cf   : > { %v897_v45 = vmul.f32 %v3387_v27, %v3387_v27  ;;  %v721_v49 = vadd.f32 %v673_v28, %v670_v12  ;;  %v998_v52 = vsub.f32 %v950_v25, %v982_v29  ;;  %v806_v54 = vpop.xlane.xlu0 %805  ;;  %v999_v14 = vsub.f32 %v951_v0, %v983_v57  ;;  %v936_v28 = vld [vmem:[%s3375_s20 + $0x10] sm:$0xff]  ;;  %v939_v0 = vld [vmem:[%s3375_s20 + $0x28] sm:$0xff] }
 0x1d0   : > { %2740 = vrsqrt.f32 %v920_v34  ;;  %v889_v58 = vmul.f32 0.00024414063, %v849_v36  ;;  %v719_v60 = vrot.slane %v718_v39, 1  ;;  %v853_v30 = vrot.slane %v852_v42, 2 }
 0x1d1   : > { %v722_v31 = vrot.slane %v721_v49, 4  ;;  %v809_v9 = vpop.xlane.xlu1 %808  ;;  %1128 = vperm.xlu1 %2687, %v998_v52   ;;  %v937_v52 = vld [vmem:[%s3375_s20 + $0x18] sm:$0xff] }
 0x1d2   : > { %v905_v2 = vsub.f32 %v889_v58, %v897_v45  ;;  %v720_v6 = vadd.f32 %v719_v60, %v718_v39  ;;  %v854_v7 = vadd.f32 %v853_v30, %v852_v42  ;;  %v857_v11 = vadd.f32 %v809_v9, %v806_v54  ;;  %v2739_v13 = vpop.eup %2738 }
 0x1d3   : > { %v723_v12 = vadd.f32 %v722_v31, %v721_v49  ;;  %v676_v16 = vpop.xlane.xlu0 %675  ;;  %v968_v57 = vmul.f32 %v2739_v13, %v936_v28 }
 0x1d4   : > { %v913_v20 = vmax.f32 %v905_v2, 0.0  ;;  %v3394_v62 = vmul.f32 0.00024414063, %v720_v6  ;;  %v855_v10 = vrot.slane %v854_v7, 1  ;;  %v858_v25 = vrot.slane %v857_v11, 4 }
 0x1d5   : > { %v724_v29 = vrot.slane %v723_v12, 2  ;;  %v679_v34 = vpop.xlane.xlu1 %678  ;;  %1133 = vperm.xlu1 %2687, %v999_v14   ;;  %v969_v6 = vmul.f32 %v2739_v13, %v937_v52  ;;  %v984_v28 = vmul.f32 %v968_v57, %v3365_v32 }
 0x1d6   : > { %v921_v36 = vadd.f32 1e-05, %v913_v20  ;;  %v898_v39 = vmul.f32 %v3394_v62, %v3394_v62  ;;  %v856_v42 = vadd.f32 %v855_v10, %v854_v7  ;;  %v859_v45 = vadd.f32 %v858_v25, %v857_v11 }
 0x1d7   : > { %v725_v49 = vadd.f32 %v724_v29, %v723_v12  ;;  %v728_v54 = vadd.f32 %v679_v34, %v676_v16  ;;  %v812_v58 = vpop.xlane.xlu0 %811 }
 0x1d8   : > { %2742 = vrsqrt.f32 %v921_v36  ;;  %v890_v60 = vmul.f32 0.00024414063, %v856_v42  ;;  %v860_v30 = vrot.slane %v859_v45, 2  ;;  %v952_v42 = vld [vmem:[%s3384_s23 + $0x10] sm:$0xff] }
 0x1d9   : > { %v726_v31 = vrot.slane %v725_v49, 1  ;;  %v729_v9 = vrot.slane %v728_v54, 4  ;;  %v815_v2 = vpop.xlane.xlu1 %814  ;;  %1026 = vperm.xlu1 %2687, %v968_v57  }
 0x1da   : > { %v2741_v14 = vpop.eup %2740  ;;  %v906_v20 = vsub.f32 %v890_v60, %v898_v39  ;;  %v861_v7 = vadd.f32 %v860_v30, %v859_v45  ;;  %v864_v11 = vadd.f32 %v815_v2, %v812_v58  ;;  %v985_v39 = vmul.f32 %v969_v6, %v3365_v32 }
 0x1db   : > { %v727_v10 = vadd.f32 %v726_v31, %v725_v49  ;;  %v730_v12 = vadd.f32 %v729_v9, %v728_v54  ;;  %v971_v16 = vmul.f32 %v2741_v14, %v939_v0  ;;  %v682_v25 = vpop.xlane.xlu0 %681  ;;  %v1000_v60 = vsub.f32 %v952_v42, %v984_v28 }
 0x1dc   : > { %v914_v29 = vmax.f32 %v906_v20, 0.0  ;;  %v862_v34 = vrot.slane %v861_v7, 1  ;;  %v865_v36 = vrot.slane %v864_v11, 4  ;;  %v953_v20 = vld [vmem:[%s3384_s23 + $0x18] sm:$0xff] }
 0x1dd   : > { %v3404_v44 = vmul.f32 0.00024414063, %v727_v10  ;;  %v731_v18 = vrot.slane %v730_v12, 2  ;;  %v685_v15 = vpop.xlane.xlu1 %684  ;;  %1031 = vperm.xlu1 %2687, %v969_v6   ;;  %1041 = vperm.xlu0 %2686, %v971_v16   ;;  %v987_v13 = vmul.f32 %v971_v16, %v3370_v23  ;;  %v941_v10 = vld [vmem:[%s3375_s20 + $0x38] sm:$0xff]  ;;  %v938_v16 = vld [vmem:[%s3375_s20 + $0x20] sm:$0xff] }
 0x1de   : > { %v922_v45 = vadd.f32 1e-05, %v914_v29  ;;  %v863_v52 = vadd.f32 %v862_v34, %v861_v7  ;;  %v866_v49 = vadd.f32 %v865_v36, %v864_v11  ;;  %v735_v54 = vadd.f32 %v685_v15, %v682_v25 }
 0x1df   : > { %v899_v57 = vmul.f32 %v3404_v44, %v3404_v44  ;;  %v732_v58 = vadd.f32 %v731_v18, %v730_v12  ;;  %v1003_v30 = vsub.f32 %v955_v47, %v987_v13  ;;  %v818_v0 = vpop.xlane.xlu0 %817  ;;  %v1001_v47 = vsub.f32 %v953_v20, %v985_v39  ;;  %v943_v20 = vld [vmem:[%s3375_s20 + $0x48] sm:$0xff] }
 0x1e0   : > { %2744 = vrsqrt.f32 %v922_v45  ;;  %v891_v31 = vmul.f32 0.00024414063, %v863_v52  ;;  %v867_v9 = vrot.slane %v866_v49, 2  ;;  %v736_v2 = vrot.slane %v735_v54, 4  ;;  %v957_v45 = vld [vmem:[%s3384_s23 + $0x38] sm:$0xff] }
 0x1e1   : > { %v733_v32 = vrot.slane %v732_v58, 1  ;;  %v821_v6 = vpop.xlane.xlu1 %820  ;;  %1138 = vperm.xlu1 %2687, %v1000_v60   ;;  %1153 = vperm.xlu0 %2686, %v1003_v30   ;;  %v970_v29 = vmul.f32 %v2741_v14, %v938_v16 }
 0x1e2   : > { %v2743_v15 = vpop.eup %2742  ;;  %v907_v7 = vsub.f32 %v891_v31, %v899_v57  ;;  %v868_v11 = vadd.f32 %v867_v9, %v866_v49  ;;  %v737_v25 = vadd.f32 %v736_v2, %v735_v54  ;;  %v871_v18 = vadd.f32 %v821_v6, %v818_v0  ;;  %v954_v2 = vld [vmem:[%s3384_s23 + $0x20] sm:$0xff] }
 0x1e3   : > { %v734_v12 = vadd.f32 %v733_v32, %v732_v58  ;;  %v973_v28 = vmul.f32 %v2743_v15, %v941_v10  ;;  %v986_v30 = vmul.f32 %v970_v29, %v3370_v23  ;;  %v940_v10 = vld [vmem:[%s3375_s20 + $0x30] sm:$0xff] }
 0x1e4   : > { %v915_v34 = vmax.f32 %v907_v7, 0.0  ;;  %v869_v36 = vrot.slane %v868_v11, 1  ;;  %v738_v42 = vrot.slane %v737_v25, 2  ;;  %v872_v13 = vrot.slane %v871_v18, 4 }
 0x1e5   : > { %v3414_v52 = vmul.f32 0.00024414063, %v734_v12  ;;  %1143 = vperm.xlu1 %2687, %v1001_v47   ;;  %1051 = vperm.xlu0 %2686, %v973_v28   ;;  %v989_v49 = vmul.f32 %v973_v28, %v3387_v27  ;;  %v959_v28 = vld [vmem:[%s3384_s23 + $0x48] sm:$0xff] }
 0x1e6   : > { %v923_v54 = vadd.f32 1e-05, %v915_v34  ;;  %v870_v57 = vadd.f32 %v869_v36, %v868_v11  ;;  %v739_v58 = vadd.f32 %v738_v42, %v737_v25  ;;  %v873_v39 = vadd.f32 %v872_v13, %v871_v18 }
 0x1e7   : > { %v900_v14 = vmul.f32 %v3414_v52, %v3414_v52  ;;  %v1005_v60 = vsub.f32 %v957_v45, %v989_v49  ;;  %v1002_v11 = vsub.f32 %v954_v2, %v986_v30  ;;  %v972_v18 = vmul.f32 %v2743_v15, %v940_v10  ;;  %v956_v49 = vld [vmem:[%s3384_s23 + $0x30] sm:$0xff]  ;;  %v958_v10 = vld [vmem:[%s3384_s23 + $0x40] sm:$0xff] }
 0x1e8   : > { %2746 = vrsqrt.f32 %v923_v54  ;;  %v892_v0 = vmul.f32 0.00024414063, %v870_v57  ;;  %v740_v31 = vrot.slane %v739_v58, 1  ;;  %v874_v9 = vrot.slane %v873_v39, 2  ;;  %v945_v54 = vld [vmem:[%s3375_s20 + $0x58] sm:$0xff]  ;;  %v942_v57 = vld [vmem:[%s3375_s20 + $0x40] sm:$0xff] }
 0x1e9   : > { %1036 = vperm.xlu1 %2687, %v970_v29   ;;  %1163 = vperm.xlu0 %2686, %v1005_v60   ;;  %v988_v15 = vmul.f32 %v972_v18, %v3387_v27 }
 0x1ea   : > { %v2745_v16 = vpop.eup %2744  ;;  %v908_v32 = vsub.f32 %v892_v0, %v900_v14  ;;  %v741_v6 = vadd.f32 %v740_v31, %v739_v58  ;;  %v875_v7 = vadd.f32 %v874_v9, %v873_v39  ;;  %v961_v31 = vld [vmem:[%s3384_s23 + $0x58] sm:$0xff] }
 0x1eb   : > { %v975_v25 = vmul.f32 %v2745_v16, %v943_v20  ;;  %v1004_v14 = vsub.f32 %v956_v49, %v988_v15  ;;  %v974_v30 = vmul.f32 %v2745_v16, %v942_v57  ;;  %v964_v57 = vld [vmem:[%s3384_s23 + $0x70] sm:$0xff] }
 0x1ec   : > { %v916_v23 = vmax.f32 %v908_v32, 0.0  ;;  %v3423_v12 = vmul.f32 0.00024414063, %v741_v6  ;;  %v876_v47 = vrot.slane %v875_v7, 1  ;;  %v947_v32 = vld [vmem:[%s3375_s20 + $0x68] sm:$0xff]  ;;  %v944_v6 = vld [vmem:[%s3375_s20 + $0x50] sm:$0xff] }
 0x1ed   : > { %1148 = vperm.xlu1 %2687, %v1002_v11   ;;  %1061 = vperm.xlu0 %2686, %v975_v25   ;;  %v991_v29 = vmul.f32 %v975_v25, %v3394_v62  ;;  %v990_v20 = vmul.f32 %v974_v30, %v3394_v62 }
 0x1ee   : > { %v924_v34 = vadd.f32 1e-05, %v916_v23  ;;  %v901_v36 = vmul.f32 %v3423_v12, %v3423_v12  ;;  %v877_v42 = vadd.f32 %v876_v47, %v875_v7  ;;  %v960_v47 = vld [vmem:[%s3384_s23 + $0x50] sm:$0xff] }
 0x1ef   : > { %v1007_v13 = vsub.f32 %v959_v28, %v991_v29  ;;  %v1006_v7 = vsub.f32 %v958_v10, %v990_v20  ;;  %v949_v29 = vld [vmem:[%s3375_s20 + $0x78] sm:$0xff] }
 0x1f0   : > { %2748 = vrsqrt.f32 %v924_v34  ;;  %v893_v45 = vmul.f32 0.00024414063, %v877_v42  ;;  %v946_v34 = vld [vmem:[%s3375_s20 + $0x60] sm:$0xff]  ;;  %v2726_v20 = vld [vmem:[%s4488_s5 + $0x58] sm:$0xff]  }
 0x1f1   : > { %1046 = vperm.xlu1 %2687, %v972_v18   ;;  %1173 = vperm.xlu0 %2686, %v1007_v13   ;;  %v963_v18 = vld [vmem:[%s3384_s23 + $0x68] sm:$0xff]  ;;  %v2727_v10 = vld [vmem:[%s4488_s5 + $0x18] sm:$0xff]  }
 0x1f2   : > { %v2747_v58 = vpop.eup %2746  ;;  %v909_v39 = vsub.f32 %v893_v45, %v901_v36  ;;  %v948_v36 = vld [vmem:[%s3375_s20 + $0x70] sm:$0xff] }
 0x1f3   : > { %v977_v60 = vmul.f32 %v2747_v58, %v945_v54  ;;  %v976_v25 = vmul.f32 %v2747_v58, %v944_v6  ;;  %v965_v54 = vld [vmem:[%s3384_s23 + $0x78] sm:$0xff]  ;;  %v2729_v6 = vld [vmem:[%s4488_s5 + $0x20] sm:$0xff]  }
 0x1f4   : > { %v917_v0 = vmax.f32 %v909_v39, 0.0 }
 0x1f5   : > { %1158 = vperm.xlu1 %2687, %v1004_v14   ;;  %1071 = vperm.xlu0 %2686, %v977_v60   ;;  %v993_v27 = vmul.f32 %v977_v60, %v3404_v44  ;;  %v992_v28 = vmul.f32 %v976_v25, %v3404_v44 }
 0x1f6   : > { %v925_v9 = vadd.f32 1e-05, %v917_v0 }
 0x1f7   : > { %v1009_v2 = vsub.f32 %v961_v31, %v993_v27  ;;  %v1008_v13 = vsub.f32 %v960_v47, %v992_v28  ;;  %v2720_v31 = vld [vmem:[%s4488_s5 + $0x40] sm:$0xff]   ;;  %v2730_v28 = vld [vmem:[%s4488_s5 + $0x68] sm:$0xff]  }
 0x1f8   : > { %2750 = vrsqrt.f32 %v925_v9  ;;  %v2721_v27 = vld [vmem:[%s4488_s5] sm:$0xff]   ;;  %2548 = vmatprep.subr.bf16.mxu1 %v2720_v31  ;;  %v2724_v9 = vld [vmem:[%s4488_s5 + $0x50] sm:$0xff]  }
 0x1f9   : > { %1056 = vperm.xlu1 %2687, %v974_v30   ;;  %1183 = vperm.xlu0 %2686, %v1009_v2   ;;  %v962_v30 = vld [vmem:[%s3384_s23 + $0x60] sm:$0xff]  ;;  %v2725_v2 = vld [vmem:[%s4488_s5 + $0x10] sm:$0xff]   ;;  %s2379_s23 = sadd.s32 %s2544_s17, %s3095_s22  ;;  %s4431_s22 = scalar_lea.sflag [#allocation3], %s326_s18 }
 0x1fa   : > { %v2749_v16 = vpop.eup %2748  ;;  %2549 = vmatpush3.bf16.msra.mxu1 %v2721_v27  ;;  %s2545_s10 = sshll.u32 %s2379_s23, 7 }
 0x1fb   : > { %v979_v11 = vmul.f32 %v2749_v16, %v947_v32  ;;  %v978_v45 = vmul.f32 %v2749_v16, %v946_v34  ;;  %v2728_v32 = vld [vmem:[%s4488_s5 + $0x60] sm:$0xff]   ;;  %s4421_s30 = scalar_lea.hbm %s4490_s7, %s2545_s10 }
 0x1fd   : > { %1168 = vperm.xlu1 %2687, %v1006_v7   ;;  %1081 = vperm.xlu0 %2686, %v979_v11   ;;  %v995_v62 = vmul.f32 %v979_v11, %v3414_v52  ;;  %v994_v14 = vmul.f32 %v978_v45, %v3414_v52  ;;  %v2722_v52 = vld [vmem:[%s4488_s5 + $0x48] sm:$0xff]  }
 0x1fe   : > { %2550 = vmatprep.subr.bf16.mxu1 %v2722_v52 }
 0x1ff   : > { %v1011_v23 = vsub.f32 %v963_v18, %v995_v62  ;;  %v1010_v0 = vsub.f32 %v962_v30, %v994_v14  ;;  %v2732_v30 = vld [vmem:[%s4488_s5 + $0x70] sm:$0xff]  }
 0x201   : > { %1066 = vperm.xlu1 %2687, %v976_v25   ;;  %1193 = vperm.xlu0 %2686, %v1011_v23  }
 0x202   : > { %v2751_v42 = vpop.eup %2750 }
 0x203   : > { %v981_v15 = vmul.f32 %v2751_v42, %v949_v29  ;;  %v980_v49 = vmul.f32 %v2751_v42, %v948_v36 }
 0x205   : > { %1178 = vperm.xlu1 %2687, %v1008_v13   ;;  %1091 = vperm.xlu0 %2686, %v981_v15   ;;  %v997_v58 = vmul.f32 %v981_v15, %v3423_v12  ;;  %v996_v39 = vmul.f32 %v980_v49, %v3423_v12  ;;  %v2723_v12 = vld [vmem:[%s4488_s5 + $0x8] sm:$0xff]  }
 0x206   : > { %2551 = vmatpush3.bf16.msra.mxu1 %v2723_v12 }
 0x207   : > { %v1013_v44 = vsub.f32 %v965_v54, %v997_v58  ;;  %v1012_v60 = vsub.f32 %v964_v57, %v996_v39  ;;  %2552 = vmatprep.subr.bf16.mxu1 %v2724_v9 }
 0x209   : > { %1076 = vperm.xlu1 %2687, %v978_v45   ;;  %1203 = vperm.xlu0 %2686, %v1013_v44  }
 0x20a   : > { %2553 = vmatpush3.bf16.msra.mxu1 %v2725_v2 }
 0x20b   : > { %2554 = vmatprep.subr.bf16.mxu1 %v2726_v20 }
 0x20d   : > { %1188 = vperm.xlu1 %2687, %v1010_v0  }
 0x20e   : > { %2555 = vmatpush3.bf16.msra.mxu1 %v2727_v10 }
 0x20f   : > { %2556 = vmatprep.subr.bf16.mxu1 %v2728_v32  ;;  %v2734_v32 = vld [vmem:[%s4488_s5 + $0x78] sm:$0xff]  }
 0x211   : > { %1086 = vperm.xlu1 %2687, %v980_v49  }
 0x212   : > { %2557 = vmatpush3.bf16.msra.mxu1 %v2729_v6  ;;  %v2735_v6 = vld [vmem:[%s4488_s5 + $0x38] sm:$0xff]  }
 0x213   : > { %2558 = vmatprep.subr.bf16.mxu1 %v2730_v28 }
 0x215   : > { %1198 = vperm.xlu1 %2687, %v1012_v60  }
 0x24c   : > { %v1022_v16 = vpop.permute.xlu1 %1021  ;;  %v1017_v7 = vpop.permute.xlu0 %1016 }
 0x24d   : > { %v1094_v25 = vmul.f32 %v1017_v7, %v3170_v33  ;;  %v1096_v62 = vmul.f32 %v1022_v16, %v3176_v37  ;;  %v2731_v33 = vld [vmem:[%s4488_s5 + $0x28] sm:$0xff]  }
 0x24e   : > { %2559 = vmatpush3.bf16.msra.mxu1 %v2731_v33 }
 0x24f   : > { %2560 = vmatprep.subr.bf16.mxu1 %v2732_v30 }
 0x250   : > { %v1129_v11 = vpop.permute.xlu1 %1128 }
 0x251   : > { %v3483_v18 = vadd.f32 %v1129_v11, %v1094_v25  ;;  %v1095_v25 = vmul.f32 %v1017_v7, %v3173_v35 }
 0x253   : > { %v3492_v29 = vmul.f32 0.70710677, %v3483_v18 }
 0x254   : > { %v1134_v23 = vpop.permute.xlu1 %1133 }
 0x255   : > { %v3486_v47 = vadd.f32 %v1134_v23, %v1096_v62  ;;  %v3501_v37 = vand.u32 2147483647, %v3492_v29  ;;  %vm1942_vm0 = vcmp.lt.f32.partialorder %v3492_v29, 0.0 }
 0x257   : > { %v3495_v36 = vmul.f32 0.70710677, %v3486_v47  ;;  %v1334_v45 = vmul.f32 0.3275911, %v3501_v37 }
 0x258   : > { %v1027_v34 = vpop.permute.xlu1 %1026 }
 0x259   : > { %v3504_v15 = vand.u32 2147483647, %v3495_v36  ;;  %v1098_v49 = vmul.f32 %v1027_v34, %v3194_v48  ;;  %v1099_v54 = vmul.f32 %v1027_v34, %v3197_v50  ;;  %v1366_v0 = vadd.f32 1.0, %v1334_v45  ;;  %v2733_v50 = vld [vmem:[%s4488_s5 + $0x30] sm:$0xff]  }
 0x25a   : > { %2561 = vmatpush3.bf16.msra.mxu1 %v2733_v50  ;;  %vm1944_vm1 = vcmp.lt.f32.partialorder %v3495_v36, 0.0 }
 0x25b   : > { %v1336_v58 = vmul.f32 0.3275911, %v3504_v15  ;;  %2752 = vrcp.f32 %v1366_v0  ;;  %2562 = vmatprep.subr.bf16.mxu1 %v2734_v32 }
 0x25c   : > { %v1032_v42 = vpop.permute.xlu1 %1031  ;;  %v1042_v13 = vpop.permute.xlu0 %1041 }
 0x25d   : > { %v1104_v60 = vmul.f32 %v1042_v13, %v3224_v5  ;;  %v1105_v31 = vmul.f32 %v1042_v13, %v3229_v8  ;;  %v1368_v5 = vadd.f32 1.0, %v1336_v58  ;;  %v1207_v13 = vadd.f32 %v1129_v11, %v1095_v25 }
 0x25e   : > { %2563 = vmatpush3.bf16.msra.mxu1 %v2735_v6  ;;  %v1100_v30 = vmul.f32 %v1032_v42, %v3200_v53  ;;  %v1101_v0 = vmul.f32 %v1032_v42, %v3205_v56 }
 0x25f   : > { %2754 = vrcp.f32 %v1368_v5  ;;  %v3564_v7 = vmul.f32 0.70710677, %v1207_v13  ;;  %v3608_v55 = vmul.f32 0.5, %v1207_v13 }
 0x260   : > { %v1139_v57 = vpop.permute.xlu1 %1138  ;;  %v1154_v14 = vpop.permute.xlu0 %1153 }
 0x261   : > { %v3510_v39 = vadd.f32 %v1139_v57, %v1098_v49  ;;  %v3512_v44 = vadd.f32 %v1139_v57, %v1099_v54  ;;  %v3528_v52 = vadd.f32 %v1154_v14, %v1104_v60  ;;  %v3533_v9 = vadd.f32 %v1154_v14, %v1105_v31  ;;  %4563 = vst [vmem:[#allocation20_spill] sm:$0xff] %v3564_v7 }
 0x262   : > { %v1097_v57 = vmul.f32 %v1022_v16, %v3181_v40  ;;  %v1303_v16 = vand.u32 2147483647, %v3564_v7  ;;  %4567 = vst [vmem:[#allocation24_spill] sm:$0xff] %v3608_v55 }
 0x263   : > { %v3520_v48 = vmul.f32 0.70710677, %v3510_v39  ;;  %v3526_v27 = vmul.f32 0.70710677, %v3512_v44  ;;  %v3539_v2 = vmul.f32 0.70710677, %v3528_v52 }
 0x264   : > { %v3543_v10 = vmul.f32 0.70710677, %v3533_v9  ;;  %v1144_v58 = vpop.permute.xlu1 %1143  ;;  %v3568_v60 = vadd.f32 %v1134_v23, %v1097_v57  ;;  %v1750_v23 = vsub.f32 0.0, %v3501_v37  ;;  %v1335_v42 = vmul.f32 0.3275911, %v1303_v16 }
 0x265   : > { %v3531_v12 = vand.u32 2147483647, %v3520_v48  ;;  %v3536_v8 = vand.u32 2147483647, %v3526_v27  ;;  %v3554_v28 = vand.u32 2147483647, %v3539_v2  ;;  %v3560_v54 = vpop.eup %2752  ;;  %v3573_v40 = vadd.f32 %v1144_v58, %v1100_v30 }
 0x266   : > { %v3557_v33 = vand.u32 2147483647, %v3543_v10  ;;  %v1462_v11 = vmul.f32 1.0614054, %v3560_v54  ;;  %v3581_v53 = vmul.f32 0.70710677, %v3568_v60 }
 0x267   : > { %v1338_v20 = vmul.f32 0.3275911, %v3531_v12  ;;  %v1339_v62 = vmul.f32 0.3275911, %v3536_v8  ;;  %v1344_v49 = vmul.f32 0.3275911, %v3554_v28 }
 0x268   : > { %v1345_v35 = vmul.f32 0.3275911, %v3557_v33  ;;  %v1494_v32 = vadd.f32 -1.4531521, %v1462_v11  ;;  %4564 = vst [vmem:[#allocation21_spill] sm:$0xff] %v3581_v53  ;;  %v1367_v11 = vadd.f32 1.0, %v1335_v42 }
 0x269   : > { %v1370_v34 = vadd.f32 1.0, %v1338_v20  ;;  %v1371_v45 = vadd.f32 1.0, %v1339_v62  ;;  %v3566_v14 = vpop.eup %2754  ;;  %v1376_v31 = vadd.f32 1.0, %v1344_v49  ;;  %v3577_v20 = vadd.f32 %v1144_v58, %v1101_v0  ;;  %v1052_v62 = vpop.permute.xlu0 %1051 }
 0x26a   : > { %v1377_v50 = vadd.f32 1.0, %v1345_v35  ;;  %v1464_v5 = vmul.f32 1.0614054, %v3566_v14  ;;  %v3584_v56 = vmul.f32 0.70710677, %v3573_v40  ;;  %v1782_v49 = vmul.f32 %v1750_v23, %v3501_v37 }
 0x26b   : > { %2756 = vrcp.f32 %v1370_v34  ;;  %v3587_v25 = vmul.f32 0.70710677, %v3577_v20  ;;  %v1526_v57 = vmul.f32 %v3560_v54, %v1494_v32  ;;  %v1305_v35 = vand.u32 2147483647, %v3581_v53 }
 0x26c   : > { %2758 = vrcp.f32 %v1371_v45  ;;  %4565 = vst [vmem:[#allocation22_spill] sm:$0xff] %v3584_v56  ;;  %v1496_v6 = vadd.f32 -1.4531521, %v1464_v5  ;;  %v1751_v45 = vsub.f32 0.0, %v1303_v16  ;;  %v3595_v58 = vand.u32 2147483647, %v3584_v56 }
 0x26d   : > { %2760 = vrcp.f32 %v1376_v31  ;;  %4566 = vst [vmem:[#allocation23_spill] sm:$0xff] %v3587_v25  ;;  %v1814_v7 = vmul.f32 1.442695, %v1782_v49  ;;  %v3605_v37 = vmul.f32 0.5, %v3483_v18  ;;  %v1558_v23 = vadd.f32 1.4214138, %v1526_v57  ;;  %v1164_v51 = vpop.permute.xlu0 %1163 }
 0x26e   : > { %2762 = vrcp.f32 %v1377_v50  ;;  %v1528_v0 = vmul.f32 %v3566_v14, %v1496_v6  ;;  %v3602_v50 = vand.u32 2147483647, %v3587_v25  ;;  %v1783_v5 = vmul.f32 %v1751_v45, %v1303_v16 }
 0x26f   : > { %v1752_v32 = vsub.f32 0.0, %v3504_v15  ;;  %v1753_v53 = vsub.f32 0.0, %v1305_v35  ;;  %v1340_v6 = vmul.f32 0.3275911, %v3595_v58  ;;  %v1108_v22 = vmul.f32 %v1052_v62, %v3248_v21 }
 0x270   : > { %2764 = vrcp.f32 %v1367_v11  ;;  %v1560_v16 = vadd.f32 1.4214138, %v1528_v0  ;;  %v1341_v18 = vmul.f32 0.3275911, %v3602_v50  ;;  %v1816_v57 = vmul.f32 1.442695, %v1783_v5 }
 0x271   : > { %2766 = vpow2.f32 %v1814_v7  ;;  %v1337_v59 = vmul.f32 0.3275911, %v1305_v35  ;;  %v3618_v13 = vadd.f32 %v1164_v51, %v1108_v22  ;;  %v1590_v55 = vmul.f32 %v3560_v54, %v1558_v23 }
 0x272   : > { %v1784_v26 = vmul.f32 %v1752_v32, %v3504_v15  ;;  %v1785_v41 = vmul.f32 %v1753_v53, %v1305_v35  ;;  %v1754_v21 = vsub.f32 0.0, %v3531_v12  ;;  %v1372_v0 = vadd.f32 1.0, %v1340_v6 }
 0x273   : > { %v1592_v25 = vmul.f32 %v3566_v14, %v1560_v16  ;;  %v1373_v5 = vadd.f32 1.0, %v1341_v18  ;;  %2768 = vpow2.f32 %v1816_v57  ;;  %v1369_v23 = vadd.f32 1.0, %v1337_v59  ;;  %v1037_v59 = vpop.permute.xlu1 %1036 }
 0x274   : > { %v3631_v15 = vmul.f32 0.70710677, %v3618_v13  ;;  %v1818_v53 = vmul.f32 1.442695, %v1784_v26  ;;  %v1820_v35 = vmul.f32 1.442695, %v1785_v41  ;;  %2770 = vrcp.f32 %v1372_v0 }
 0x275   : > { %v3589_v34 = vpop.eup %2756  ;;  %v1755_v32 = vsub.f32 0.0, %v3536_v8  ;;  %v1624_v16 = vadd.f32 -0.28449672, %v1592_v25  ;;  %2772 = vrcp.f32 %v1373_v5  ;;  %v1760_v25 = vsub.f32 0.0, %v3554_v28 }
 0x276   : > { %v3597_v30 = vpop.eup %2758  ;;  %v1466_v31 = vmul.f32 1.0614054, %v3589_v34  ;;  %2774 = vrcp.f32 %v1369_v23  ;;  %v3643_v26 = vand.u32 2147483647, %v3631_v15  ;;  %vm1946_vm2 = vcmp.lt.f32.partialorder %v3520_v48, 0.0 }
 0x277   : > { %v1467_v42 = vmul.f32 1.0614054, %v3597_v30  ;;  %v3613_v61 = vpop.eup %2760  ;;  %2776 = vpow2.f32 %v1818_v53  ;;  %v1656_v0 = vmul.f32 %v3566_v14, %v1624_v16  ;;  %v1102_v16 = vmul.f32 %v1037_v59, %v3218_v1 }
 0x278   : > { %v1498_v45 = vadd.f32 -1.4531521, %v1466_v31  ;;  %v3616_v49 = vpop.eup %2762  ;;  %v1472_v11 = vmul.f32 1.0614054, %v3613_v61  ;;  %v1109_v31 = vmul.f32 %v1052_v62, %v3253_v24  ;;  %v1786_v24 = vmul.f32 %v1754_v21, %v3531_v12 }
 0x279   : > { %v1499_v38 = vadd.f32 -1.4531521, %v1467_v42  ;;  %v1473_v22 = vmul.f32 1.0614054, %v3616_v49  ;;  %v1622_v62 = vadd.f32 -0.28449672, %v1590_v55  ;;  %v1787_v12 = vmul.f32 %v1755_v32, %v3536_v8 }
 0x27a   : > { %v1530_v7 = vmul.f32 %v3589_v34, %v1498_v45  ;;  %v3628_v56 = vadd.f32 %v1164_v51, %v1109_v31  ;;  %v1504_v6 = vadd.f32 -1.4531521, %v1472_v11  ;;  %v3637_v51 = vmul.f32 0.5, %v3486_v47  ;;  %v3645_v55 = vpop.eup %2764 }
 0x27b   : > { %v1531_v42 = vmul.f32 %v3597_v30, %v1499_v38  ;;  %v1505_v18 = vadd.f32 -1.4531521, %v1473_v22  ;;  %4568 = vst [vmem:[#allocation25_spill] sm:$0xff] %v3645_v55  ;;  %v3648_v38 = vmul.f32 0.5, %v3568_v60  ;;  %v2767_v57 = vpop.eup %2766  ;;  %v1654_v47 = vmul.f32 %v3560_v54, %v1622_v62  ;;  %v1149_v62 = vpop.permute.xlu1 %1148 }
 0x27c   : > { %v1562_v45 = vadd.f32 1.4214138, %v1530_v7  ;;  %v3640_v41 = vmul.f32 0.70710677, %v3628_v56  ;;  %2778 = vpow2.f32 %v1820_v35  ;;  %v1536_v11 = vmul.f32 %v3613_v61, %v1504_v6 }
 0x27d   : > { %4569 = vst [vmem:[#allocation26_spill] sm:$0xff] %v3648_v38  ;;  %v1563_v21 = vadd.f32 1.4214138, %v1531_v42  ;;  %v1822_v7 = vmul.f32 1.442695, %v1786_v24  ;;  %v1537_v60 = vmul.f32 %v3616_v49, %v1505_v18  ;;  %v3658_v22 = vmul.f32 0.5, %v3510_v39  ;;  %v3672_v42 = vpop.eup %2768 }
 0x27e   : > { %v1594_v31 = vmul.f32 %v3589_v34, %v1562_v45  ;;  %v3661_v8 = vmul.f32 0.5, %v3512_v44  ;;  %v3664_v5 = vand.u32 2147483647, %v3640_v41  ;;  %v1348_v23 = vmul.f32 0.3275911, %v3643_v26  ;;  %4570 = vst [vmem:[#allocation27_spill] sm:$0xff] %v3672_v42  ;;  %v3676_v38 = vpop.eup %2770 }
 0x27f   : > { %v1824_v53 = vmul.f32 1.442695, %v1787_v12  ;;  %v3668_v35 = vmul.f32 0.5, %v3528_v52  ;;  %v1761_v32 = vsub.f32 0.0, %v3557_v33  ;;  %v1792_v24 = vmul.f32 %v1760_v25, %v3554_v28  ;;  %v3682_v42 = vpop.eup %2772 }
 0x280   : > { %v1686_v39 = vadd.f32 0.2548296, %v1654_v47  ;;  %v1595_v44 = vmul.f32 %v3597_v30, %v1563_v21  ;;  %v1568_v6 = vadd.f32 1.4214138, %v1536_v11  ;;  %v1688_v45 = vadd.f32 0.2548296, %v1656_v0  ;;  %v3688_v11 = vpop.eup %2774 }
 0x281   : > { %v1626_v18 = vadd.f32 -0.28449672, %v1594_v31  ;;  %2780 = vpow2.f32 %v1822_v7  ;;  %v1569_v12 = vadd.f32 1.4214138, %v1537_v60  ;;  %v1103_v52 = vmul.f32 %v1037_v59, %v3221_v3  ;;  %4571 = vst [vmem:[#allocation28_spill] sm:$0xff] %v3688_v11  ;;  %v2777_v7 = vpop.eup %2776 }
 0x282   : > { %v1349_v55 = vmul.f32 0.3275911, %v3664_v5  ;;  %v1380_v28 = vadd.f32 1.0, %v1348_v23  ;;  %v3680_v25 = vadd.f32 %v1149_v62, %v1102_v16  ;;  %2782 = vpow2.f32 %v1824_v53 }
 0x283   : > { %v3685_v47 = vmul.f32 0.5, %v3533_v9  ;;  %v1793_v1 = vmul.f32 %v1761_v32, %v3557_v33  ;;  %v1834_v21 = vmul.f32 1.442695, %v1792_v24  ;;  %v1718_v0 = vmul.f32 %v3560_v54, %v1686_v39 }
 0x284   : > { %v1627_v31 = vadd.f32 -0.28449672, %v1595_v44  ;;  %v1600_v3 = vmul.f32 %v3613_v61, %v1568_v6  ;;  %v3692_v59 = vadd.f32 %v1149_v62, %v1103_v52  ;;  %v1720_v60 = vmul.f32 %v3566_v14, %v1688_v45 }
 0x285   : > { %v1658_v23 = vmul.f32 %v3589_v34, %v1626_v18  ;;  %v1601_v9 = vmul.f32 %v3616_v49, %v1569_v12  ;;  %v1468_v53 = vmul.f32 1.0614054, %v3676_v38  ;;  %v1469_v32 = vmul.f32 1.0614054, %v3682_v42 }
 0x286   : > { %v3698_v33 = vpop.eup %2778  ;;  %v1381_v24 = vadd.f32 1.0, %v1349_v55  ;;  %2784 = vrcp.f32 %v1380_v28  ;;  %v3702_v54 = vmul.f32 0.70710677, %v3680_v25  ;;  %v1836_v62 = vmul.f32 1.442695, %v1793_v1  ;;  %v1062_v55 = vpop.permute.xlu0 %1061 }
 0x287   : > { %4572 = vst [vmem:[#allocation29_spill] sm:$0xff] %v3698_v33  ;;  %v1756_v39 = vsub.f32 0.0, %v3595_v58  ;;  %v1757_v14 = vsub.f32 0.0, %v3602_v50  ;;  %v3707_v44 = vmul.f32 0.70710677, %v3692_v59  ;;  %v3709_v6 = vmul.f32 %v2767_v57, %v1718_v0 }
 0x288   : > { %4573 = vst [vmem:[#allocation30_spill] sm:$0xff] %v3702_v54  ;;  %v1659_v16 = vmul.f32 %v3597_v30, %v1627_v31  ;;  %v1632_v45 = vadd.f32 -0.28449672, %v1600_v3  ;;  %v3713_v18 = vand.u32 2147483647, %v3702_v54  ;;  %v3715_v12 = vmul.f32 %v2777_v7, %v1720_v60 }
 0x289   : > { %4574 = vst [vmem:[#allocation31_spill] sm:$0xff] %v3707_v44  ;;  %v1690_v52 = vadd.f32 0.2548296, %v1658_v23  ;;  %v1633_v28 = vadd.f32 -0.28449672, %v1601_v9  ;;  %2786 = vrcp.f32 %v1381_v24  ;;  %v3722_v31 = vmul.f32 0.5, %v3573_v40 }
 0x28a   : > { %v3718_v1 = vand.u32 2147483647, %v3707_v44  ;;  %v1500_v33 = vadd.f32 -1.4531521, %v1468_v53  ;;  %v1501_v11 = vadd.f32 -1.4531521, %v1469_v32  ;;  %v1788_v3 = vmul.f32 %v1756_v39, %v3595_v58  ;;  %v1047_v32 = vpop.permute.xlu1 %1046 }
 0x28b   : > { %v1342_v57 = vmul.f32 0.3275911, %v3713_v18  ;;  %v2781_v0 = vpop.eup %2780  ;;  %4575 = vst [vmem:[#allocation32_spill] sm:$0xff] %v3722_v31  ;;  %v1789_v54 = vmul.f32 %v1757_v14, %v3602_v50  ;;  %v1910_v60 = vsub.f32 1.0, %v3709_v6  ;;  %v1691_v23 = vadd.f32 0.2548296, %v1659_v16  ;;  %v1174_v6 = vpop.permute.xlu0 %1173 }
 0x28c   : > { %v1343_v7 = vmul.f32 0.3275911, %v3718_v1  ;;  %v1664_v9 = vmul.f32 %v3613_v61, %v1632_v45  ;;  %v3730_v53 = vmul.f32 0.5, %v3577_v20  ;;  %v2783_v24 = vpop.eup %2782  ;;  %v1912_v44 = vsub.f32 1.0, %v3715_v12 }
 0x28d   : > { %v1722_v40 = vmul.f32 %v3589_v34, %v1690_v52  ;;  %v1665_v58 = vmul.f32 %v3616_v49, %v1633_v28  ;;  %2788 = vpow2.f32 %v1834_v21  ;;  %v1532_v50 = vmul.f32 %v3676_v38, %v1500_v33 }
 0x28e   : > { %4576 = vst [vmem:[#allocation33_spill] sm:$0xff] %v3730_v53  ;;  %2790 = vpow2.f32 %v1836_v62  ;;  %v1533_v39 = vmul.f32 %v3682_v42, %v1501_v11  ;;  %v1374_v14 = vadd.f32 1.0, %v1342_v57  ;;  %v1826_v20 = vmul.f32 1.442695, %v1788_v3 }
 0x28f   : > { %v1828_v16 = vmul.f32 1.442695, %v1789_v54  ;;  %v1375_v45 = vadd.f32 1.0, %v1343_v7  ;;  %v1112_v53 = vmul.f32 %v1062_v55, %v3272_v43  ;;  %v1974_v34 = vsub.f32 0.0, %v1910_v60  ;;  %v1159_v7 = vpop.permute.xlu1 %1158 }
 0x290   : > { %v3739_v12 = vpop.eup %2784  ;;  %v1723_v52 = vmul.f32 %v3597_v30, %v1691_v23  ;;  %v1696_v21 = vadd.f32 0.2548296, %v1664_v9  ;;  %v1113_v62 = vmul.f32 %v1062_v55, %v3277_v46  ;;  %v1976_v11 = vsub.f32 0.0, %v1912_v44 }
 0x291   : > { %v3744_v33 = vmul.f32 %v2781_v0, %v1722_v40  ;;  %v1697_v28 = vadd.f32 0.2548296, %v1665_v58  ;;  %v3746_v57 = vadd.f32 %v1174_v6, %v1112_v53  ;;  %v1564_v54 = vadd.f32 1.4214138, %v1532_v50 }
 0x292   : > { %v1565_v3 = vadd.f32 1.4214138, %v1533_v39  ;;  %2792 = vrcp.f32 %v1374_v14  ;;  %v3748_v43 = vadd.f32 %v1174_v6, %v1113_v62  ;;  %v1476_v31 = vmul.f32 1.0614054, %v3739_v12 }
 0x293   : > { %2794 = vrcp.f32 %v1375_v45  ;;  %v1106_v30 = vmul.f32 %v1047_v32, %v3242_v17  ;;  %v3753_v46 = vmul.f32 0.70710677, %v3746_v57  ;;  %v3755_v55 = vpop.eup %2786  ;;  %v3757_v0 = vmul.f32 %v2783_v24, %v1723_v52 }
 0x294   : > { %v1728_v23 = vmul.f32 %v3613_v61, %v1696_v21  ;;  %v1107_v9 = vmul.f32 %v1047_v32, %v3245_v19  ;;  %v3762_v53 = vmul.f32 0.70710677, %v3748_v43  ;;  %v1914_v40 = vsub.f32 1.0, %v3744_v33 }
 0x295   : > { %4577 = vst [vmem:[#allocation34_spill] sm:$0xff] %v3753_v46  ;;  %v1729_v17 = vmul.f32 %v3616_v49, %v1697_v28  ;;  %v3768_v58 = vand.u32 2147483647, %v3753_v46  ;;  %v3770_v50 = vadd.f32 %v1159_v7, %v1106_v30  ;;  %v1596_v24 = vmul.f32 %v3676_v38, %v1564_v54 }
 0x296   : > { %4578 = vst [vmem:[#allocation35_spill] sm:$0xff] %v3762_v53  ;;  %v1597_v61 = vmul.f32 %v3682_v42, %v1565_v3  ;;  %v3775_v19 = vand.u32 2147483647, %v3762_v53  ;;  %v3777_v32 = vadd.f32 %v1159_v7, %v1107_v9  ;;  %2796 = vpow2.f32 %v1826_v20 }
 0x297   : > { %4579 = vst [vmem:[#allocation36_spill] sm:$0xff] %v3770_v50  ;;  %v2789_v39 = vpop.eup %2788  ;;  %v1477_v14 = vmul.f32 1.0614054, %v3755_v55  ;;  %v1508_v6 = vadd.f32 -1.4531521, %v1476_v31  ;;  %v2006_v52 = vsel %vm1942_vm0, %v1974_v34, %v1910_v60  ;;  %2798 = vpow2.f32 %v1828_v16 }
 0x298   : > { %4580 = vst [vmem:[#allocation37_spill] sm:$0xff] %v3777_v32  ;;  %v1352_v49 = vmul.f32 0.3275911, %v3768_v58  ;;  %v2791_v45 = vpop.eup %2790  ;;  %v1888_v21 = vmul.f32 %v2789_v39, %v1728_v23  ;;  %v1353_v62 = vmul.f32 0.3275911, %v3775_v19  ;;  %v1915_v33 = vsub.f32 1.0, %v3757_v0 }
 0x299   : > { %v1978_v28 = vsub.f32 0.0, %v1914_v40  ;;  %v1889_v54 = vmul.f32 %v2791_v45, %v1729_v17  ;;  %v3786_v3 = vmul.f32 0.70710677, %v3770_v50  ;;  %v2008_v31 = vsel %vm1944_vm1, %v1976_v11, %v1912_v44 }
 0x29a   : > { %vm1947_vm3 = vcmp.lt.f32.partialorder %v3526_v27, 0.0  ;;  %v1628_v20 = vadd.f32 -0.28449672, %v1596_v24  ;;  %v1629_v7 = vadd.f32 -0.28449672, %v1597_v61  ;;  %v2038_v60 = vadd.f32 1.0, %v2006_v52 }
 0x29b   : > { %4581 = vst [vmem:[#allocation38_spill] sm:$0xff] %v3786_v3  ;;  %v3792_v29 = vmul.f32 0.70710677, %v3777_v32  ;;  %vm1952_vm4 = vcmp.lt.f32.partialorder %v3539_v2, 0.0  ;;  %v1509_v16 = vadd.f32 -1.4531521, %v1477_v14  ;;  %v1540_v34 = vmul.f32 %v3739_v12, %v1508_v6 }
 0x29c   : > { %v1384_v30 = vadd.f32 1.0, %v1352_v49  ;;  %v3796_v0 = vpop.eup %2792  ;;  %v1920_v23 = vsub.f32 1.0, %v1888_v21  ;;  %vm1953_vm5 = vcmp.lt.f32.partialorder %v3543_v10, 0.0  ;;  %v3800_v36 = vmul.f32 0.5, %v3618_v13  ;;  %v1072_v21 = vpop.permute.xlu0 %1071 }
 0x29d   : > { %4582 = vst [vmem:[#allocation39_spill] sm:$0xff] %v3792_v29  ;;  %v3803_v44 = vmul.f32 0.5, %v3628_v56  ;;  %v1385_v11 = vadd.f32 1.0, %v1353_v62  ;;  %v3805_v9 = vpop.eup %2794  ;;  %v2040_v17 = vadd.f32 1.0, %v2008_v31  ;;  %v1979_v24 = vsub.f32 0.0, %v1915_v33 }
 0x29e   : > { %4583 = vst [vmem:[#allocation40_spill] sm:$0xff] %v3800_v36  ;;  %v1921_v61 = vsub.f32 1.0, %v1889_v54  ;;  %v3808_v39 = vand.u32 2147483647, %v3786_v3  ;;  %v2010_v14 = vsel %vm1946_vm2, %v1978_v28, %v1914_v40  ;;  %v1660_v6 = vmul.f32 %v3676_v38, %v1628_v20 }
 0x29f   : > { %4584 = vst [vmem:[#allocation41_spill] sm:$0xff] %v3803_v44  ;;  %v1661_v13 = vmul.f32 %v3682_v42, %v1629_v7  ;;  %v3815_v49 = vand.u32 2147483647, %v3792_v29  ;;  %v1541_v56 = vmul.f32 %v3755_v55, %v1509_v16  ;;  %v1572_v45 = vadd.f32 1.4214138, %v1540_v34 }
 0x2a0   : > { %v1470_v52 = vmul.f32 1.0614054, %v3796_v0  ;;  %2800 = vrcp.f32 %v1384_v30  ;;  %v1984_v62 = vsub.f32 0.0, %v1920_v23  ;;  %v1471_v54 = vmul.f32 1.0614054, %v3805_v9  ;;  %v2797_v40 = vpop.eup %2796  ;;  %v1184_v27 = vpop.permute.xlu0 %1183 }
 0x2a1   : > { %4585 = vst [vmem:[#allocation42_spill] sm:$0xff] %v3815_v49  ;;  %2802 = vrcp.f32 %v1385_v11  ;;  %v1346_v48 = vmul.f32 0.3275911, %v3808_v39  ;;  %v1985_v28 = vsub.f32 0.0, %v1921_v61  ;;  %v1764_v31 = vsub.f32 0.0, %v3643_v26  ;;  %v2799_v16 = vpop.eup %2798 }
 0x2a2   : > { %v1765_v20 = vsub.f32 0.0, %v3664_v5  ;;  %v1347_v7 = vmul.f32 0.3275911, %v3815_v49  ;;  %v3825_v34 = vmul.f32 %v2038_v60, %v3605_v37  ;;  %v3828_v30 = vmul.f32 %v2040_v17, %v3637_v51 }
 0x2a3   : > { %v1692_v29 = vadd.f32 0.2548296, %v1660_v6  ;;  %v1693_v3 = vadd.f32 0.2548296, %v1661_v13  ;;  %v2011_v11 = vsel %vm1947_vm3, %v1979_v24, %v1915_v33  ;;  %v1573_v44 = vadd.f32 1.4214138, %v1541_v56 }
 0x2a4   : > { %v1604_v53 = vmul.f32 %v3739_v12, %v1572_v45  ;;  %v1502_v46 = vadd.f32 -1.4531521, %v1470_v52  ;;  %v2042_v36 = vadd.f32 1.0, %v2010_v14  ;;  %v2016_v32 = vsel %vm1952_vm4, %v1984_v62, %v1920_v23 }
 0x2a5   : > { %v1503_v50 = vadd.f32 -1.4531521, %v1471_v54  ;;  %v1378_v49 = vadd.f32 1.0, %v1346_v48  ;;  %v2017_v37 = vsel %vm1953_vm5, %v1985_v28, %v1921_v61  ;;  %v1796_v51 = vmul.f32 %v1764_v31, %v3643_v26 }
 0x2a6   : > { %v1797_v60 = vmul.f32 %v1765_v20, %v3664_v5  ;;  %v1379_v17 = vadd.f32 1.0, %v1347_v7  ;;  %v1724_v33 = vmul.f32 %v3676_v38, %v1692_v29  ;;  %v1725_v24 = vmul.f32 %v3682_v42, %v1693_v3  ;;  %v4586_v20 = vld [vmem:[#allocation22_spill] sm:$0xff]  ;;  %v4587_v7 = vld [vmem:[#allocation23_spill] sm:$0xff] }
 0x2a7   : > { %v1116_v14 = vmul.f32 %v1072_v21, %v3296_v63  ;;  %v1117_v2 = vmul.f32 %v1072_v21, %v3301_v4  ;;  %v2043_v23 = vadd.f32 1.0, %v2011_v11  ;;  %v1605_v6 = vmul.f32 %v3755_v55, %v1573_v44  ;;  %v1057_v21 = vpop.permute.xlu1 %1056 }
 0x2a8   : > { %v1636_v13 = vadd.f32 -0.28449672, %v1604_v53  ;;  %v1534_v10 = vmul.f32 %v3796_v0, %v1502_v46  ;;  %v1535_v26 = vmul.f32 %v3805_v9, %v1503_v50  ;;  %2804 = vrcp.f32 %v1378_v49 }
 0x2a9   : > { %v3846_v5 = vadd.f32 %v1184_v27, %v1116_v14  ;;  %v3848_v61 = vadd.f32 %v1184_v27, %v1117_v2  ;;  %v3853_v42 = vmul.f32 %v2042_v36, %v3658_v22  ;;  %v2048_v63 = vadd.f32 1.0, %v2016_v32 }
 0x2aa   : > { %v3850_v38 = vpop.eup %2800  ;;  %v2049_v4 = vadd.f32 1.0, %v2017_v37  ;;  %2806 = vrcp.f32 %v1379_v17  ;;  %v1884_v53 = vmul.f32 %v2797_v40, %v1724_v33  ;;  %v1885_v29 = vmul.f32 %v2799_v16, %v1725_v24 }
 0x2ab   : > { %v3855_v3 = vpop.eup %2802  ;;  %v1842_v46 = vmul.f32 1.442695, %v1796_v51  ;;  %v1844_v44 = vmul.f32 1.442695, %v1797_v60  ;;  %v1758_v50 = vsub.f32 0.0, %v3713_v18  ;;  %v1759_v49 = vsub.f32 0.0, %v3718_v1 }
 0x2ac   : > { %v3860_v56 = vmul.f32 0.70710677, %v3846_v5  ;;  %v3863_v45 = vmul.f32 0.70710677, %v3848_v61  ;;  %v1637_v22 = vadd.f32 -0.28449672, %v1605_v6  ;;  %v1668_v32 = vmul.f32 %v3739_v12, %v1636_v13  ;;  %v1169_v13 = vpop.permute.xlu1 %1168 }
 0x2ad   : > { %v1566_v36 = vadd.f32 1.4214138, %v1534_v10  ;;  %v1567_v52 = vadd.f32 1.4214138, %v1535_v26  ;;  %v3867_v62 = vmul.f32 %v2043_v23, %v3661_v8  ;;  %v1480_v54 = vmul.f32 1.0614054, %v3850_v38 }
 0x2ae   : > { %v1481_v48 = vmul.f32 1.0614054, %v3855_v3  ;;  %v3872_v40 = vand.u32 2147483647, %v3860_v56  ;;  %v1916_v28 = vsub.f32 1.0, %v1884_v53  ;;  %v1917_v31 = vsub.f32 1.0, %v1885_v29 }
 0x2af   : > { %vm1948_vm6 = vcmp.lt.f32.partialorder %v4586_v20, 0.0  ;;  %vm1949_vm7 = vcmp.lt.f32.partialorder %v4587_v7, 0.0  ;;  %2808 = vpow2.f32 %v1842_v46  ;;  %v3877_v16 = vand.u32 2147483647, %v3863_v45  ;;  %v4589_v53 = vld [vmem:[#allocation8_spill] sm:$0xff] }
 0x2b0   : > { %v3880_v8 = vmul.f32 %v2048_v63, %v3668_v35  ;;  %v1790_v11 = vmul.f32 %v1758_v50, %v3713_v18  ;;  %v1791_v37 = vmul.f32 %v1759_v49, %v3718_v1  ;;  %v1356_v51 = vmul.f32 0.3275911, %v3872_v40 }
 0x2b1   : > { %v1669_v60 = vmul.f32 %v3755_v55, %v1637_v22  ;;  %v1700_v17 = vadd.f32 0.2548296, %v1668_v32  ;;  %v1598_v27 = vmul.f32 %v3796_v0, %v1566_v36  ;;  %v1599_v33 = vmul.f32 %v3805_v9, %v1567_v52  ;;  %v4590_v22 = vld [vmem:[#allocation9_spill] sm:$0xff] }
 0x2b2   : > { %4588 = vst [vmem:[#allocation22_spill] sm:$0xff] %v3880_v8  ;;  %v3889_v24 = vmul.f32 %v2049_v4, %v3685_v47  ;;  %2810 = vpow2.f32 %v1844_v44  ;;  %v1512_v14 = vadd.f32 -1.4531521, %v1480_v54  ;;  %v1513_v35 = vadd.f32 -1.4531521, %v1481_v48  ;;  %v3891_v2 = vpop.eup %2804 }
 0x2b3   : > { %v1980_v18 = vsub.f32 0.0, %v1916_v28  ;;  %v1981_v23 = vsub.f32 0.0, %v1917_v31  ;;  %v3894_v1 = vmul.f32 0.5, %v3680_v25  ;;  %v1357_v6 = vmul.f32 0.3275911, %v3877_v16 }
 0x2b4   : > { %v3897_v10 = vpop.eup %2806  ;;  %v1830_v26 = vmul.f32 1.442695, %v1790_v11  ;;  %v1832_v63 = vmul.f32 1.442695, %v1791_v37  ;;  %v1110_v47 = vmul.f32 %v1057_v21, %v4589_v53  ;;  %v1388_v4 = vadd.f32 1.0, %v1356_v51 }
 0x2b5   : > { %v1701_v29 = vadd.f32 0.2548296, %v1669_v60  ;;  %v1732_v46 = vmul.f32 %v3739_v12, %v1700_v17  ;;  %v1630_v44 = vadd.f32 -0.28449672, %v1598_v27  ;;  %v1631_v50 = vadd.f32 -0.28449672, %v1599_v33 }
 0x2b6   : > { %v1544_v49 = vmul.f32 %v3850_v38, %v1512_v14  ;;  %v1545_v25 = vmul.f32 %v3855_v3, %v1513_v35  ;;  %v1111_v32 = vmul.f32 %v1057_v21, %v4590_v22  ;;  %v3904_v36 = vadd.f32 %v1169_v13, %v1110_v47 }
 0x2b7   : > { %v1474_v52 = vmul.f32 1.0614054, %v3891_v2  ;;  %v1475_v54 = vmul.f32 1.0614054, %v3897_v10  ;;  %v1389_v48 = vadd.f32 1.0, %v1357_v6  ;;  %2812 = vrcp.f32 %v1388_v4 }
 0x2b8   : > { %v2012_v11 = vsel %vm1948_vm6, %v1980_v18, %v1916_v28  ;;  %v2013_v12 = vsel %vm1949_vm7, %v1981_v23, %v1917_v31  ;;  %v1768_v37 = vsub.f32 0.0, %v3768_v58  ;;  %v3913_v51 = vadd.f32 %v1169_v13, %v1111_v32 }
 0x2b9   : > { %v2809_v60 = vpop.eup %2808  ;;  %v1733_v21 = vmul.f32 %v3755_v55, %v1701_v29  ;;  %v1662_v17 = vmul.f32 %v3796_v0, %v1630_v44  ;;  %v1663_v27 = vmul.f32 %v3805_v9, %v1631_v50  ;;  %2814 = vpow2.f32 %v1830_v26 }
 0x2ba   : > { %v1892_v33 = vmul.f32 %v2809_v60, %v1732_v46  ;;  %2816 = vpow2.f32 %v1832_v63  ;;  %v1576_v14 = vadd.f32 1.4214138, %v1544_v49  ;;  %v1577_v20 = vadd.f32 1.4214138, %v1545_v25  ;;  %v4591_v60 = vld [vmem:[#allocation42_spill] sm:$0xff] }
 0x2bb   : > { %v1506_v28 = vadd.f32 -1.4531521, %v1474_v52  ;;  %v1507_v35 = vadd.f32 -1.4531521, %v1475_v54  ;;  %2818 = vrcp.f32 %v1389_v48  ;;  %v3919_v31 = vmul.f32 0.70710677, %v3904_v36 }
 0x2bc   : > { %v2811_v7 = vpop.eup %2810  ;;  %v3922_v18 = vmul.f32 0.5, %v3692_v59  ;;  %v1769_v55 = vsub.f32 0.0, %v3775_v19  ;;  %v1800_v23 = vmul.f32 %v1768_v37, %v3768_v58  ;;  %v3927_v6 = vmul.f32 0.70710677, %v3913_v51 }
 0x2bd   : > { %v2044_v13 = vadd.f32 1.0, %v2012_v11  ;;  %v1893_v26 = vmul.f32 %v2811_v7, %v1733_v21  ;;  %vm1956_vm8 = vcmp.lt.f32.partialorder %v3631_v15, 0.0  ;;  %v1694_v63 = vadd.f32 0.2548296, %v1662_v17  ;;  %v4592_v17 = vld [vmem:[#allocation32_spill] sm:$0xff] }
 0x2be   : > { %v1695_v53 = vadd.f32 0.2548296, %v1663_v27  ;;  %v2045_v47 = vadd.f32 1.0, %v2013_v12  ;;  %v1924_v4 = vsub.f32 1.0, %v1892_v33  ;;  %v1608_v29 = vmul.f32 %v3850_v38, %v1576_v14 }
 0x2bf   : > { %v1609_v59 = vmul.f32 %v3855_v3, %v1577_v20  ;;  %v3933_v46 = vmul.f32 0.5, %v3746_v57  ;;  %v1538_v58 = vmul.f32 %v3891_v2, %v1506_v28  ;;  %v1539_v44 = vmul.f32 %v3897_v10, %v1507_v35  ;;  %v4593_v35 = vld [vmem:[#allocation33_spill] sm:$0xff] }
 0x2c0   : > { %v3938_v50 = vand.u32 2147483647, %v3919_v31  ;;  %v3941_v49 = vmul.f32 0.5, %v3748_v43  ;;  %v1801_v25 = vmul.f32 %v1769_v55, %v3775_v19  ;;  %v1850_v22 = vmul.f32 1.442695, %v1800_v23 }
 0x2c1   : > { %v3945_v32 = vand.u32 2147483647, %v3927_v6  ;;  %v3947_v52 = vpop.eup %2812  ;;  %v1925_v57 = vsub.f32 1.0, %v1893_v26  ;;  %vm1957_vm9 = vcmp.lt.f32.partialorder %v3640_v41, 0.0  ;;  %v1726_v54 = vmul.f32 %v3796_v0, %v1694_v63  ;;  %v4598_v41 = vld [vmem:[#allocation40_spill] sm:$0xff] }
 0x2c2   : > { %v1727_v48 = vmul.f32 %v3805_v9, %v1695_v53  ;;  %v1762_v11 = vsub.f32 0.0, %v3808_v39  ;;  %v1988_v12 = vsub.f32 0.0, %v1924_v4  ;;  %v1640_v43 = vadd.f32 -0.28449672, %v1608_v29 }
 0x2c3   : > { %v1641_v37 = vadd.f32 -0.28449672, %v1609_v59  ;;  %v1763_v19 = vsub.f32 0.0, %v4591_v60  ;;  %v2815_v21 = vpop.eup %2814  ;;  %v3955_v27 = vmul.f32 %v2044_v13, %v4592_v17  ;;  %v1570_v33 = vadd.f32 1.4214138, %v1538_v58 }
 0x2c4   : > { %v1571_v14 = vadd.f32 1.4214138, %v1539_v44  ;;  %v1350_v20 = vmul.f32 0.3275911, %v3938_v50  ;;  %v2817_v28 = vpop.eup %2816  ;;  %v3959_v0 = vmul.f32 %v2045_v47, %v4593_v35  ;;  %v1852_v9 = vmul.f32 1.442695, %v1801_v25 }
 0x2c5   : > { %v1484_v7 = vmul.f32 1.0614054, %v3947_v52  ;;  %v1351_v55 = vmul.f32 0.3275911, %v3945_v32  ;;  %v3963_v23 = vpop.eup %2818  ;;  %v1886_v26 = vmul.f32 %v2815_v21, %v1726_v54  ;;  %v1887_v63 = vmul.f32 %v2817_v28, %v1727_v48  ;;  %v4594_v54 = vld [vmem:[#allocation30_spill] sm:$0xff]  ;;  %v1082_v48 = vpop.permute.xlu0 %1081 }
 0x2c6   : > { %2820 = vpow2.f32 %v1850_v22  ;;  %v1794_v13 = vmul.f32 %v1762_v11, %v3808_v39  ;;  %v1989_v53 = vsub.f32 0.0, %v1925_v57  ;;  %v2020_v29 = vsel %vm1956_vm8, %v1988_v12, %v1924_v4  ;;  %v4595_v22 = vld [vmem:[#allocation31_spill] sm:$0xff] }
 0x2c7   : > { %v1672_v59 = vmul.f32 %v3850_v38, %v1640_v43  ;;  %v1795_v47 = vmul.f32 %v1763_v19, %v4591_v60  ;;  %v1673_v58 = vmul.f32 %v3855_v3, %v1641_v37  ;;  %v1602_v44 = vmul.f32 %v3891_v2, %v1570_v33  ;;  %v4596_v43 = vld [vmem:[#allocation36_spill] sm:$0xff] }
 0x2c8   : > { %v1603_v25 = vmul.f32 %v3897_v10, %v1571_v14  ;;  %v1382_v17 = vadd.f32 1.0, %v1350_v20  ;;  %vm1950_vm10 = vcmp.lt.f32.partialorder %v4594_v54, 0.0  ;;  %vm1951_vm11 = vcmp.lt.f32.partialorder %v4595_v22, 0.0 }
 0x2c9   : > { %2822 = vpow2.f32 %v1852_v9  ;;  %v1485_v39 = vmul.f32 1.0614054, %v3963_v23  ;;  %v1516_v15 = vadd.f32 -1.4531521, %v1484_v7  ;;  %v1383_v4 = vadd.f32 1.0, %v1351_v55  ;;  %v1067_v9 = vpop.permute.xlu1 %1066  ;;  %v4597_v7 = vld [vmem:[#allocation37_spill] sm:$0xff] }
 0x2ca   : > { %v1918_v11 = vsub.f32 1.0, %v1886_v26  ;;  %v1919_v12 = vsub.f32 1.0, %v1887_v63  ;;  %v3977_v60 = vmul.f32 0.5, %v4596_v43  ;;  %v1838_v37 = vmul.f32 1.442695, %v1794_v13 }
 0x2cb   : > { %v2021_v19 = vsel %vm1957_vm9, %v1989_v53, %v1925_v57  ;;  %v2052_v21 = vadd.f32 1.0, %v2020_v29  ;;  %v1704_v33 = vadd.f32 0.2548296, %v1672_v59  ;;  %v1840_v14 = vmul.f32 1.442695, %v1795_v47  ;;  %v1194_v59 = vpop.permute.xlu0 %1193 }
 0x2cc   : > { %v1705_v20 = vadd.f32 0.2548296, %v1673_v58  ;;  %v1634_v28 = vadd.f32 -0.28449672, %v1602_v44  ;;  %v1635_v35 = vadd.f32 -0.28449672, %v1603_v25  ;;  %2824 = vrcp.f32 %v1382_v17 }
 0x2cd   : > { %v3982_v55 = vmul.f32 0.5, %v4597_v7  ;;  %v1517_v26 = vadd.f32 -1.4531521, %v1485_v39  ;;  %v1548_v63 = vmul.f32 %v3947_v52, %v1516_v15  ;;  %2826 = vrcp.f32 %v1383_v4  ;;  %v4600_v17 = vld [vmem:[#allocation15_spill] sm:$0xff] }
 0x2ce   : > { %v2053_v43 = vadd.f32 1.0, %v2021_v19  ;;  %v1982_v13 = vsub.f32 0.0, %v1918_v11  ;;  %v1983_v8 = vsub.f32 0.0, %v1919_v12  ;;  %2828 = vpow2.f32 %v1838_v37 }
 0x2cf   : > { %v3986_v57 = vmul.f32 %v2052_v21, %v4598_v41  ;;  %v1736_v53 = vmul.f32 %v3850_v38, %v1704_v33  ;;  %2830 = vpow2.f32 %v1840_v14  ;;  %v1772_v29 = vsub.f32 0.0, %v3872_v40  ;;  %v1179_v14 = vpop.permute.xlu1 %1178 }
 0x2d0   : > { %v2821_v47 = vpop.eup %2820  ;;  %v1737_v58 = vmul.f32 %v3855_v3, %v1705_v20  ;;  %v1666_v44 = vmul.f32 %v3891_v2, %v1634_v28  ;;  %v1667_v25 = vmul.f32 %v3897_v10, %v1635_v35  ;;  %v1121_v39 = vmul.f32 %v1082_v48, %v4600_v17  ;;  %v4604_v35 = vld [vmem:[#allocation10_spill] sm:$0xff] }
 0x2d1   : > { %4599 = vst [vmem:[#allocation23_spill] sm:$0xff] %v3986_v57  ;;  %v3995_v15 = vmul.f32 0.5, %v3846_v5  ;;  %v3998_v4 = vmul.f32 0.5, %v3848_v61  ;;  %v1549_v38 = vmul.f32 %v3963_v23, %v1517_v26  ;;  %v1580_v37 = vadd.f32 1.4214138, %v1548_v63 }
 0x2d2   : > { %v2014_v19 = vsel %vm1950_vm10, %v1982_v13, %v1918_v11  ;;  %v2015_v3 = vsel %vm1951_vm11, %v1983_v8, %v1919_v12  ;;  %v4006_v21 = vmul.f32 0.5, %v3904_v36  ;;  %v4008_v33 = vadd.f32 %v1194_v59, %v1121_v39  ;;  %v4605_v8 = vld [vmem:[#allocation11_spill] sm:$0xff] }
 0x2d3   : > { %4601 = vst [vmem:[#allocation8_spill] sm:$0xff] %v3995_v15  ;;  %v2823_v5 = vpop.eup %2822  ;;  %v4010_v20 = vmul.f32 %v2821_v47, %v1736_v53  ;;  %v1773_v61 = vsub.f32 0.0, %v3877_v16  ;;  %v1804_v28 = vmul.f32 %v1772_v29, %v3872_v40  ;;  %v1114_v7 = vmul.f32 %v1067_v9, %v4604_v35  ;;  %v4608_v40 = vld [vmem:[#allocation14_spill] sm:$0xff]  ;;  %v4612_v35 = vld [vmem:[#allocation35_spill] sm:$0xff] }
 0x2d4   : > { %4602 = vst [vmem:[#allocation9_spill] sm:$0xff] %v4006_v21  ;;  %4603 = vst [vmem:[#allocation42_spill] sm:$0xff] %v4008_v33  ;;  %v4015_v54 = vmul.f32 %v2823_v5, %v1737_v58  ;;  %v1698_v11 = vadd.f32 0.2548296, %v1666_v44  ;;  %v1699_v22 = vadd.f32 0.2548296, %v1667_v25  ;;  %v1115_v12 = vmul.f32 %v1067_v9, %v4605_v8 }
 0x2d5   : > { %v1581_v36 = vadd.f32 1.4214138, %v1549_v38  ;;  %v1612_v26 = vmul.f32 %v3947_v52, %v1580_v37  ;;  %v4020_v63 = vmul.f32 0.5, %v3913_v51  ;;  %v4022_v13 = vadd.f32 %v1179_v14, %v1114_v7  ;;  %v4610_v37 = vld [vmem:[#allocation34_spill] sm:$0xff] }
 0x2d6   : > { %v4024_v41 = vpop.eup %2824  ;;  %v2046_v53 = vadd.f32 1.0, %v2014_v19  ;;  %v1120_v29 = vmul.f32 %v1082_v48, %v4608_v40  ;;  %v4028_v47 = vmul.f32 0.70710677, %v4008_v33  ;;  %v4030_v58 = vadd.f32 %v1179_v14, %v1115_v12 }
 0x2d7   : > { %4606 = vst [vmem:[#allocation32_spill] sm:$0xff] %v4020_v63  ;;  %4607 = vst [vmem:[#allocation33_spill] sm:$0xff] %v4022_v13  ;;  %v4032_v44 = vpop.eup %2826  ;;  %v2047_v9 = vadd.f32 1.0, %v2015_v3  ;;  %v1928_v25 = vsub.f32 1.0, %v4010_v20  ;;  %v1805_v51 = vmul.f32 %v1773_v61, %v3877_v16  ;;  %v1858_v17 = vmul.f32 1.442695, %v1804_v28 }
 0x2d8   : > { %4609 = vst [vmem:[#allocation30_spill] sm:$0xff] %v4028_v47  ;;  %v2829_v39 = vpop.eup %2828  ;;  %v1929_v38 = vsub.f32 1.0, %v4015_v54  ;;  %vm1960_vm12 = vcmp.lt.f32.partialorder %v4610_v37, 0.0  ;;  %v1730_v48 = vmul.f32 %v3891_v2, %v1698_v11  ;;  %v1731_v19 = vmul.f32 %v3897_v10, %v1699_v22  ;;  %v4614_v28 = vld [vmem:[#allocation41_spill] sm:$0xff]  ;;  %v4619_v37 = vld [vmem:[#allocation19_spill] sm:$0xff] }
 0x2d9   : > { %v4040_v5 = vadd.f32 %v1194_v59, %v1120_v29  ;;  %v2831_v14 = vpop.eup %2830  ;;  %vm1961_vm13 = vcmp.lt.f32.partialorder %v4612_v35, 0.0  ;;  %v1613_v3 = vmul.f32 %v3963_v23, %v1581_v36  ;;  %v1644_v20 = vadd.f32 -0.28449672, %v1612_v26  ;;  %v1092_v26 = vpop.permute.xlu0 %1091  ;;  %v4620_v35 = vld [vmem:[#allocation18_spill] sm:$0xff] }
 0x2da   : > { %v1478_v16 = vmul.f32 1.0614054, %v4024_v41  ;;  %v4046_v61 = vmul.f32 0.70710677, %v4022_v13  ;;  %v4049_v7 = vmul.f32 %v2053_v43, %v4614_v28  ;;  %v1479_v2 = vmul.f32 1.0614054, %v4032_v44 }
 0x2db   : > { %4611 = vst [vmem:[#allocation31_spill] sm:$0xff] %v4040_v5  ;;  %v4053_v10 = vand.u32 2147483647, %v4028_v47  ;;  %v4056_v59 = vmul.f32 0.70710677, %v4030_v58  ;;  %v4059_v54 = vmul.f32 %v2046_v53, %v3894_v1  ;;  %2832 = vpow2.f32 %v1858_v17 }
 0x2dc   : > { %4613 = vst [vmem:[#allocation36_spill] sm:$0xff] %v4046_v61  ;;  %v1860_v11 = vmul.f32 1.442695, %v1805_v51  ;;  %v4062_v22 = vand.u32 2147483647, %v4046_v61  ;;  %v1890_v8 = vmul.f32 %v2829_v39, %v1730_v48  ;;  %v1891_v12 = vmul.f32 %v2831_v14, %v1731_v19  ;;  %v4617_v48 = vld [vmem:[#allocation38_spill] sm:$0xff] }
 0x2dd   : > { %4615 = vst [vmem:[#allocation37_spill] sm:$0xff] %v4056_v59  ;;  %v4065_v43 = vmul.f32 0.70710677, %v4040_v5  ;;  %v4068_v36 = vand.u32 2147483647, %v4056_v59  ;;  %v1992_v40 = vsub.f32 0.0, %v1928_v25  ;;  %v1676_v1 = vmul.f32 %v3947_v52, %v1644_v20  ;;  %v1204_v47 = vpop.permute.xlu0 %1203 }
 0x2de   : > { %v1993_v29 = vsub.f32 0.0, %v1929_v38  ;;  %v1645_v28 = vadd.f32 -0.28449672, %v1613_v3  ;;  %v1510_v15 = vadd.f32 -1.4531521, %v1478_v16  ;;  %v4074_v39 = vmul.f32 %v2047_v9, %v3922_v18  ;;  %v4618_v16 = vld [vmem:[#allocation39_spill] sm:$0xff] }
 0x2df   : > { %4616 = vst [vmem:[#allocation40_spill] sm:$0xff] %v4065_v43  ;;  %v1511_v53 = vadd.f32 -1.4531521, %v1479_v2  ;;  %v1361_v51 = vmul.f32 0.3275911, %v4053_v10  ;;  %vm1954_vm14 = vcmp.lt.f32.partialorder %v4617_v48, 0.0  ;;  %2834 = vpow2.f32 %v1860_v11 }
 0x2e0   : > { %v1355_v17 = vmul.f32 0.3275911, %v4068_v36  ;;  %v1766_v19 = vsub.f32 0.0, %v3938_v50  ;;  %v1354_v14 = vmul.f32 0.3275911, %v4062_v22  ;;  %v1922_v5 = vsub.f32 1.0, %v1890_v8 }
 0x2e1   : > { %v1923_v3 = vsub.f32 1.0, %v1891_v12  ;;  %vm1955_vm15 = vcmp.lt.f32.partialorder %v4618_v16, 0.0  ;;  %v1328_v20 = vand.u32 2147483647, %v4065_v43  ;;  %v2024_v33 = vsel %vm1960_vm12, %v1992_v40, %v1928_v25 }
 0x2e2   : > { %v1387_v2 = vadd.f32 1.0, %v1355_v17  ;;  %v1677_v18 = vmul.f32 %v3963_v23, %v1645_v28  ;;  %v1542_v9 = vmul.f32 %v4024_v41, %v1510_v15  ;;  %v1767_v11 = vsub.f32 0.0, %v3945_v32 }
 0x2e3   : > { %v2025_v13 = vsel %vm1961_vm13, %v1993_v29, %v1929_v38  ;;  %v1708_v57 = vadd.f32 0.2548296, %v1676_v1  ;;  %v1543_v8 = vmul.f32 %v4032_v44, %v1511_v53  ;;  %v1393_v12 = vadd.f32 1.0, %v1361_v51 }
 0x2e4   : > { %v1798_v43 = vmul.f32 %v1766_v19, %v3938_v50  ;;  %v1386_v17 = vadd.f32 1.0, %v1354_v14  ;;  %2836 = vrcp.f32 %v1387_v2  ;;  %v1125_v25 = vmul.f32 %v1092_v26, %v4619_v37  ;;  %v4622_v50 = vld [vmem:[#allocation25_spill] sm:$0xff] }
 0x2e5   : > { %v2056_v40 = vadd.f32 1.0, %v2024_v33  ;;  %v1986_v28 = vsub.f32 0.0, %v1922_v5  ;;  %v1987_v63 = vsub.f32 0.0, %v1923_v3  ;;  %v1360_v15 = vmul.f32 0.3275911, %v1328_v20  ;;  %v2833_v59 = vpop.eup %2832 }
 0x2e6   : > { %v1709_v21 = vadd.f32 0.2548296, %v1677_v18  ;;  %v1574_v61 = vadd.f32 1.4214138, %v1542_v9  ;;  %v1124_v38 = vmul.f32 %v1092_v26, %v4620_v35  ;;  %v4092_v29 = vadd.f32 %v1204_v47, %v1125_v25  ;;  %v4626_v25 = vld [vmem:[#allocation28_spill] sm:$0xff] }
 0x2e7   : > { %v1740_v1 = vmul.f32 %v3947_v52, %v1708_v57  ;;  %v1575_v53 = vadd.f32 1.4214138, %v1543_v8  ;;  %2838 = vrcp.f32 %v1393_v12  ;;  %v1463_v51 = vmul.f32 1.0614054, %v4622_v50 }
 0x2e8   : > { %4621 = vst [vmem:[#allocation15_spill] sm:$0xff] %v4092_v29  ;;  %v1799_v19 = vmul.f32 %v1767_v11, %v3945_v32  ;;  %v1846_v14 = vmul.f32 1.442695, %v1798_v43  ;;  %2840 = vrcp.f32 %v1386_v17  ;;  %v4097_v33 = vadd.f32 %v1204_v47, %v1124_v38  ;;  %v1077_v17 = vpop.permute.xlu1 %1076 }
 0x2e9   : > { %v2057_v2 = vadd.f32 1.0, %v2025_v13  ;;  %v2018_v18 = vsel %vm1954_vm14, %v1986_v28, %v1922_v5  ;;  %v1392_v9 = vadd.f32 1.0, %v1360_v15  ;;  %v4102_v26 = vmul.f32 0.70710677, %v4092_v29  ;;  %v2835_v37 = vpop.eup %2834 }
 0x2ea   : > { %4623 = vst [vmem:[#allocation10_spill] sm:$0xff] %v4097_v33  ;;  %v2019_v52 = vsel %vm1955_vm15, %v1987_v63, %v1923_v3  ;;  %v1741_v57 = vmul.f32 %v3963_v23, %v1709_v21  ;;  %v1606_v32 = vmul.f32 %v4024_v41, %v1574_v61  ;;  %v1776_v43 = vsub.f32 0.0, %v1328_v20 }
 0x2eb   : > { %4624 = vst [vmem:[#allocation11_spill] sm:$0xff] %v4102_v26  ;;  %v4108_v11 = vmul.f32 %v2833_v59, %v1740_v1  ;;  %v1607_v13 = vmul.f32 %v4032_v44, %v1575_v53  ;;  %v1777_v47 = vsub.f32 0.0, %v4053_v10  ;;  %v1495_v5 = vadd.f32 -1.4531521, %v1463_v51 }
 0x2ec   : > { %v2050_v48 = vadd.f32 1.0, %v2018_v18  ;;  %2842 = vpow2.f32 %v1846_v14  ;;  %v1848_v8 = vmul.f32 1.442695, %v1799_v19  ;;  %v4113_v12 = vmul.f32 0.70710677, %v4097_v33 }
 0x2ed   : > { %v4116_v63 = vmul.f32 %v2056_v40, %v3933_v46  ;;  %v2051_v23 = vadd.f32 1.0, %v2019_v52  ;;  %2844 = vrcp.f32 %v1392_v9  ;;  %v4119_v21 = vand.u32 2147483647, %v4102_v26 }
 0x2ee   : > { %4625 = vst [vmem:[#allocation14_spill] sm:$0xff] %v4113_v12  ;;  %v4121_v61 = vpop.eup %2836  ;;  %v1901_v59 = vmul.f32 %v2835_v37, %v1741_v57  ;;  %v1638_v3 = vadd.f32 -0.28449672, %v1606_v32  ;;  %v1808_v16 = vmul.f32 %v1776_v43, %v1328_v20  ;;  %v1465_v28 = vmul.f32 1.0614054, %v4626_v25  ;;  %v4627_v32 = vld [vmem:[#allocation12_spill] sm:$0xff] }
 0x2ef   : > { %v4541_v15 = vsub.f32 1.0, %v4108_v11  ;;  %v1639_v35 = vadd.f32 -0.28449672, %v1607_v13  ;;  %v1809_v38 = vmul.f32 %v1777_v47, %v4053_v10  ;;  %v1527_v46 = vmul.f32 %v4622_v50, %v1495_v5  ;;  %v1189_v5 = vpop.permute.xlu1 %1188 }
 0x2f0   : > { %v4128_v40 = vmul.f32 %v2057_v2, %v3941_v49  ;;  %v4131_v1 = vmul.f32 %v2050_v48, %v3977_v60  ;;  %2846 = vpow2.f32 %v1848_v8  ;;  %v4134_v53 = vand.u32 2147483647, %v4113_v12 }
 0x2f1   : > { %v4136_v20 = vpop.eup %2838  ;;  %v4139_v51 = vmul.f32 %v2051_v23, %v3982_v55  ;;  %v4142_v19 = vmul.f32 0.5, %v4030_v58  ;;  %v1483_v10 = vmul.f32 1.0614054, %v4121_v61  ;;  %v1365_v49 = vmul.f32 0.3275911, %v4119_v21 }
 0x2f2   : > { %v4146_v14 = vpop.eup %2840  ;;  %v1933_v60 = vsub.f32 1.0, %v1901_v59  ;;  %vm1965_vm0 = vcmp.lt.f32.partialorder %v3863_v45, 0.0  ;;  %v1670_v2 = vmul.f32 %v4024_v41, %v1638_v3  ;;  %v1866_v18 = vmul.f32 1.442695, %v1808_v16 }
 0x2f3   : > { %v1497_v9 = vadd.f32 -1.4531521, %v1465_v28  ;;  %v4152_v55 = vsub.f32 0.0, %v4541_v15  ;;  %v1671_v58 = vmul.f32 %v4032_v44, %v1639_v35  ;;  %v1868_v37 = vmul.f32 1.442695, %v1809_v38  ;;  %v4628_v28 = vld [vmem:[#allocation13_spill] sm:$0xff] }
 0x2f4   : > { %v1559_v52 = vadd.f32 1.4214138, %v1527_v46  ;;  %v1489_v57 = vmul.f32 1.0614054, %v4136_v20  ;;  %v1118_v43 = vmul.f32 %v1077_v17, %v4627_v32  ;;  %v1364_v13 = vmul.f32 0.3275911, %v4134_v53 }
 0x2f5   : > { %v1529_v47 = vmul.f32 %v4626_v25, %v1497_v9  ;;  %v1482_v48 = vmul.f32 1.0614054, %v4146_v14  ;;  %v1515_v8 = vadd.f32 -1.4531521, %v1483_v10  ;;  %v1397_v23 = vadd.f32 1.0, %v1365_v49 }
 0x2f6   : > { %v1591_v59 = vmul.f32 %v4622_v50, %v1559_v52  ;;  %v2843_v3 = vpop.eup %2842  ;;  %v1702_v16 = vadd.f32 0.2548296, %v1670_v2  ;;  %2848 = vpow2.f32 %v1866_v18  ;;  %v1119_v35 = vmul.f32 %v1077_v17, %v4628_v28 }
 0x2f7   : > { %v1561_v38 = vadd.f32 1.4214138, %v1529_v47  ;;  %v4162_v46 = vpop.eup %2844  ;;  %v1997_v32 = vsub.f32 0.0, %v1933_v60  ;;  %v1703_v15 = vadd.f32 0.2548296, %v1671_v58  ;;  %v4164_v29 = vadd.f32 %v1189_v5, %v1118_v43 }
 0x2f8   : > { %v1623_v33 = vadd.f32 -0.28449672, %v1591_v59  ;;  %v1521_v9 = vadd.f32 -1.4531521, %v1489_v57  ;;  %v1396_v12 = vadd.f32 1.0, %v1364_v13  ;;  %v4167_v49 = vadd.f32 %v1189_v5, %v1119_v35  ;;  %v4630_v35 = vld [vmem:[#allocation21_spill] sm:$0xff] }
 0x2f9   : > { %v1593_v10 = vmul.f32 %v4626_v25, %v1561_v38  ;;  %v1514_v52 = vadd.f32 -1.4531521, %v1482_v48  ;;  %v1547_v2 = vmul.f32 %v4121_v61, %v1515_v8  ;;  %2850 = vrcp.f32 %v1397_v23 }
 0x2fa   : > { %v1655_v17 = vmul.f32 %v4622_v50, %v1623_v33  ;;  %v2847_v18 = vpop.eup %2846  ;;  %v1734_v47 = vmul.f32 %v4024_v41, %v1702_v16  ;;  %v1488_v58 = vmul.f32 1.0614054, %v4162_v46  ;;  %2852 = vpow2.f32 %v1868_v37 }
 0x2fb   : > { %v1625_v43 = vadd.f32 -0.28449672, %v1593_v10  ;;  %v2029_v57 = vsel %vm1965_vm0, %v1997_v32, %v1933_v60  ;;  %v1735_v13 = vmul.f32 %v4032_v44, %v1703_v15  ;;  %v1770_v5 = vsub.f32 0.0, %v4062_v22  ;;  %v4629_v15 = vld [vmem:[#allocation20_spill] sm:$0xff] }
 0x2fc   : > { %v4178_v48 = vmul.f32 0.70710677, %v4164_v29  ;;  %v1553_v8 = vmul.f32 %v4136_v20, %v1521_v9  ;;  %v1771_v33 = vsub.f32 0.0, %v4068_v36  ;;  %v4184_v23 = vmul.f32 0.70710677, %v4167_v49 }
 0x2fd   : > { %v1657_v41 = vmul.f32 %v4626_v25, %v1625_v43  ;;  %vm1964_vm1 = vcmp.lt.f32.partialorder %v3860_v56, 0.0  ;;  %v1546_v45 = vmul.f32 %v4146_v14, %v1514_v52  ;;  %v1579_v60 = vadd.f32 1.4214138, %v1547_v2 }
 0x2fe   : > { %2854 = vrcp.f32 %v1396_v12  ;;  %v1687_v44 = vadd.f32 0.2548296, %v1655_v17  ;;  %vm1943_vm2 = vcmp.lt.f32.partialorder %v4629_v15, 0.0  ;;  %v2061_v37 = vadd.f32 1.0, %v2029_v57 }
 0x2ff   : > { %v4189_v59 = vmul.f32 %v2843_v3, %v1734_v47  ;;  %v1520_v16 = vadd.f32 -1.4531521, %v1488_v58  ;;  %v1689_v28 = vadd.f32 0.2548296, %v1657_v41  ;;  %vm1945_vm3 = vcmp.lt.f32.partialorder %v4630_v35, 0.0  ;;  %v4631_v58 = vld [vmem:[#allocation27_spill] sm:$0xff] }
 0x300   : > { %v4192_v38 = vmul.f32 %v2847_v18, %v1735_v13  ;;  %v1802_v32 = vmul.f32 %v1770_v5, %v4062_v22  ;;  %v1719_v9 = vmul.f32 %v4622_v50, %v1687_v44  ;;  %v4197_v10 = vand.u32 2147483647, %v4178_v48  ;;  %v4199_v12 = vpop.eup %2848  ;;  %v4632_v13 = vld [vmem:[#allocation29_spill] sm:$0xff]  ;;  %v4635_v35 = vld [vmem:[#allocation26_spill] sm:$0xff] }
 0x301   : > { %v1585_v52 = vadd.f32 1.4214138, %v1553_v8  ;;  %v1803_v2 = vmul.f32 %v1771_v33, %v4068_v36  ;;  %v1721_v3 = vmul.f32 %v4626_v25, %v1689_v28  ;;  %v4204_v17 = vand.u32 2147483647, %v4184_v23 }
 0x302   : > { %v1578_v47 = vadd.f32 1.4214138, %v1546_v45  ;;  %v1611_v18 = vmul.f32 %v4121_v61, %v1579_v60  ;;  %v1879_v22 = vmul.f32 %v4631_v58, %v1719_v9  ;;  %v1358_v50 = vmul.f32 0.3275911, %v4197_v10 }
 0x303   : > { %v1926_v43 = vsub.f32 1.0, %v4189_v59  ;;  %v1552_v57 = vmul.f32 %v4162_v46, %v1520_v16  ;;  %v1881_v5 = vmul.f32 %v4632_v13, %v1721_v3  ;;  %v1359_v36 = vmul.f32 0.3275911, %v4204_v17  ;;  %v4213_v8 = vpop.eup %2850  ;;  %v1087_v13 = vpop.permute.xlu1 %1086 }
 0x304   : > { %v1927_v25 = vsub.f32 1.0, %v4192_v38  ;;  %v1854_v33 = vmul.f32 1.442695, %v1802_v32  ;;  %v1911_v41 = vsub.f32 1.0, %v1879_v22  ;;  %v1390_v45 = vadd.f32 1.0, %v1358_v50  ;;  %v4216_v60 = vpop.eup %2852 }
 0x305   : > { %v1617_v44 = vmul.f32 %v4136_v20, %v1585_v52  ;;  %v1856_v28 = vmul.f32 1.442695, %v1803_v2  ;;  %v1913_v9 = vsub.f32 1.0, %v1881_v5  ;;  %v1391_v59 = vadd.f32 1.0, %v1359_v36 }
 0x306   : > { %v1610_v16 = vmul.f32 %v4146_v14, %v1578_v47  ;;  %v1643_v58 = vadd.f32 -0.28449672, %v1611_v18  ;;  %v1975_v3 = vsub.f32 0.0, %v1911_v41  ;;  %2856 = vrcp.f32 %v1390_v45 }
 0x307   : > { %v4633_v26 = vsub.f32 1.0, %v4108_v11  ;;  %vm1958_vm4 = vcmp.lt.f32.partialorder %v3919_v31, 0.0  ;;  %v1584_v22 = vadd.f32 1.4214138, %v1552_v57  ;;  %v1493_v52 = vmul.f32 1.0614054, %v4213_v8 }
 0x308   : > { %v1977_v2 = vsub.f32 0.0, %v1913_v9  ;;  %v4229_v50 = vpop.eup %2854  ;;  %v4232_v47 = vmul.f32 %v2061_v37, %v3998_v4  ;;  %v1990_v18 = vsub.f32 0.0, %v1926_v43  ;;  %v2007_v11 = vsel %vm1943_vm2, %v1975_v3, %v1911_v41 }
 0x309   : > { %v4225_v32 = vsel %vm1964_vm1, %v4152_v55, %v4633_v26  ;;  %2858 = vrcp.f32 %v1391_v59  ;;  %v1649_v5 = vadd.f32 -0.28449672, %v1617_v44  ;;  %v2039_v26 = vadd.f32 1.0, %v2007_v11 }
 0x30a   : > { %2860 = vpow2.f32 %v1854_v33  ;;  %v2009_v56 = vsel %vm1945_vm3, %v1977_v2, %v1913_v9  ;;  %v1991_v55 = vsub.f32 0.0, %v1927_v25  ;;  %v1642_v57 = vadd.f32 -0.28449672, %v1610_v16  ;;  %v4634_v33 = vld [vmem:[#allocation24_spill] sm:$0xff]  ;;  %v1199_v16 = vpop.permute.xlu1 %1198 }
 0x30b   : > { %v1675_v36 = vmul.f32 %v4121_v61, %v1643_v58  ;;  %v2041_v45 = vadd.f32 1.0, %v2009_v56  ;;  %vm1959_vm5 = vcmp.lt.f32.partialorder %v3927_v6, 0.0  ;;  %v1616_v4 = vmul.f32 %v4162_v46, %v1584_v22  ;;  %v4636_v2 = vld [vmem:[#allocation16_spill] sm:$0xff] }
 0x30c   : > { %2862 = vpow2.f32 %v1856_v28  ;;  %v1492_v15 = vmul.f32 1.0614054, %v4229_v50  ;;  %v1525_v37 = vadd.f32 -1.4531521, %v1493_v52  ;;  %v2071_v41 = vmul.f32 %v2039_v26, %v4634_v33  ;;  %v4637_v28 = vld [vmem:[#allocation17_spill] sm:$0xff] }
 0x30d   : > { %v2073_v44 = vmul.f32 %v2041_v45, %v4635_v35  ;;  %v2102_v9 = vpack.c.bf16 %v3828_v30, %v3825_v34  ;;  %v1774_v59 = vsub.f32 0.0, %v4197_v10  ;;  %v1681_v58 = vmul.f32 %v4136_v20, %v1649_v5 }
 0x30e   : > { %v1775_v3 = vsub.f32 0.0, %v4204_v17  ;;  %v1122_v22 = vmul.f32 %v1087_v13, %v4636_v2  ;;  %v1123_v11 = vmul.f32 %v1087_v13, %v4637_v28  ;;  %v1674_v52 = vmul.f32 %v4146_v14, %v1642_v57 }
 0x30f   : > { %v1707_v56 = vadd.f32 0.2548296, %v1675_v36  ;;  %v2103_v26 = vpack.c.bf16 %v2073_v44, %v2071_v41  ;;  %v2105_v45 = vpack.c.bf16 %v3959_v0, %v3867_v62  ;;  %v1524_v33 = vadd.f32 -1.4531521, %v1492_v15 }
 0x310   : > { %v1557_v34 = vmul.f32 %v4213_v8, %v1525_v37  ;;  %v4257_v30 = vadd.f32 %v1199_v16, %v1122_v22  ;;  %v4259_v35 = vadd.f32 %v1199_v16, %v1123_v11  ;;  %v4261_v5 = vpop.eup %2856  ;;  %v2022_v2 = vsel %vm1958_vm4, %v1990_v18, %v1926_v43 }
 0x311   : > { %v1648_v13 = vadd.f32 -0.28449672, %v1616_v4  ;;  %v1780_v57 = vsub.f32 0.0, %v4134_v53  ;;  %2285 = vmatprep.mubr.bf16.mxu1 %v2103_v26  ;;  %v1806_v36 = vmul.f32 %v1774_v59, %v4197_v10  ;;  %v1713_v41 = vadd.f32 0.2548296, %v1681_v58 }
 0x312   : > { %v1781_v62 = vsub.f32 0.0, %v4119_v21  ;;  %2286 = vmatmul.mubr.bf16.vlgmr.msra.gmra.mrb[0].mxu1 %v2102_v9  ;;  %v1486_v0 = vmul.f32 1.0614054, %v4261_v5  ;;  %v1807_v15 = vmul.f32 %v1775_v3, %v4204_v17  ;;  %v1706_v44 = vadd.f32 0.2548296, %v1674_v52 }
 0x313   : > { %v4270_v37 = vpop.eup %2858  ;;  %v1739_v31 = vmul.f32 %v4121_v61, %v1707_v56  ;;  %v4274_v43 = vmul.f32 0.70710677, %v4257_v30  ;;  %v4277_v18 = vmul.f32 0.70710677, %v4259_v35  ;;  %2293 = vmatprep.mubr.bf16.mxu1 %v2105_v45  ;;  %v1556_v4 = vmul.f32 %v4229_v50, %v1524_v33 }
 0x314   : > { %v2861_v10 = vpop.eup %2860  ;;  %v1589_v9 = vadd.f32 1.4214138, %v1557_v34  ;;  %v1487_v59 = vmul.f32 1.0614054, %v4270_v37  ;;  %v1518_v16 = vadd.f32 -1.4531521, %v1486_v0  ;;  %v2023_v17 = vsel %vm1959_vm5, %v1991_v55, %v1927_v25 }
 0x315   : > { %v1862_v61 = vmul.f32 1.442695, %v1806_v36  ;;  %v4286_v58 = vand.u32 2147483647, %v4274_v43  ;;  %v4289_v3 = vand.u32 2147483647, %v4277_v18  ;;  %v2104_v56 = vpack.c.bf16 %v3955_v27, %v3853_v42 }
 0x316   : > { %v2863_v22 = vpop.eup %2862  ;;  %v1519_v28 = vadd.f32 -1.4531521, %v1487_v59  ;;  %v1550_v11 = vmul.f32 %v4261_v5, %v1518_v16  ;;  %v1864_v52 = vmul.f32 1.442695, %v1807_v15  ;;  %v1738_v38 = vmul.f32 %v4146_v14, %v1706_v44 }
 0x317   : > { %v1362_v6 = vmul.f32 0.3275911, %v4286_v58  ;;  %v1363_v25 = vmul.f32 0.3275911, %v4289_v3  ;;  %v2107_v55 = vpack.c.bf16 %v3889_v24, %v4074_v39  ;;  %v1899_v26 = vmul.f32 %v2863_v22, %v1739_v31 }
 0x318   : > { %v1588_v45 = vadd.f32 1.4214138, %v1556_v4  ;;  %v1551_v33 = vmul.f32 %v4270_v37, %v1519_v28  ;;  %v1582_v34 = vadd.f32 1.4214138, %v1550_v11  ;;  %v1621_v36 = vmul.f32 %v4213_v8, %v1589_v9 }
 0x319   : > { %2864 = vpow2.f32 %v1862_v61  ;;  %v1394_v0 = vadd.f32 1.0, %v1362_v6  ;;  %v1395_v15 = vadd.f32 1.0, %v1363_v25  ;;  %v1680_v42 = vmul.f32 %v4162_v46, %v1648_v13 }
 0x31a   : > { %v1583_v27 = vadd.f32 1.4214138, %v1551_v33  ;;  %v1614_v14 = vmul.f32 %v4261_v5, %v1582_v34  ;;  %2866 = vpow2.f32 %v1864_v52  ;;  %2294 = vmatmul.mubr.bf16.gmra.mrb[4].mxu1 %v2104_v56  ;;  %v1745_v44 = vmul.f32 %v4136_v20, %v1713_v41  ;;  %v4642_v33 = vld [vmem:[#allocation32_spill] sm:$0xff] }
 0x31b   : > { %v1812_v24 = vmul.f32 %v1780_v57, %v4134_v53  ;;  %v1813_v39 = vmul.f32 %v1781_v62, %v4119_v21  ;;  %2868 = vrcp.f32 %v1394_v0  ;;  %2301 = vmatprep.mubr.bf16.mxu1 %v2107_v55  ;;  %v1931_v31 = vsub.f32 1.0, %v1899_v26  ;;  %v4638_v53 = vld [vmem:[#allocation22_spill] sm:$0xff]  ;;  %v4640_v55 = vld [vmem:[#allocation9_spill] sm:$0xff] }
 0x31c   : > { %v1615_v4 = vmul.f32 %v4270_v37, %v1583_v27  ;;  %v1646_v9 = vadd.f32 -0.28449672, %v1614_v14  ;;  %2870 = vrcp.f32 %v1395_v15  ;;  %v2054_v59 = vadd.f32 1.0, %v2022_v2  ;;  %v4639_v2 = vld [vmem:[#allocation36_spill] sm:$0xff]  ;;  %v4643_v0 = vld [vmem:[#allocation30_spill] sm:$0xff] }
 0x31d   : > { %v1898_v13 = vmul.f32 %v2861_v10, %v1738_v38  ;;  %v1620_v16 = vmul.f32 %v4229_v50, %v1588_v45  ;;  %v1653_v61 = vadd.f32 -0.28449672, %v1621_v36  ;;  %v2055_v22 = vadd.f32 1.0, %v2023_v17  ;;  %v4641_v45 = vld [vmem:[#allocation37_spill] sm:$0xff] }
 0x31e   : > { %v1647_v28 = vadd.f32 -0.28449672, %v1615_v4  ;;  %v1678_v20 = vmul.f32 %v4261_v5, %v1646_v9  ;;  %v2106_v57 = vpack.c.bf16 %v4638_v53, %v4059_v54  ;;  %v1712_v21 = vadd.f32 0.2548296, %v1680_v42 }
 0x31f   : > { %v1874_v41 = vmul.f32 1.442695, %v1812_v24  ;;  %v1876_v62 = vmul.f32 1.442695, %v1813_v39  ;;  %v2109_v11 = vpack.c.bf16 %v4049_v7, %v4139_v51  ;;  %v1905_v52 = vmul.f32 %v4216_v60, %v1745_v44 }
 0x320   : > { %vm1962_vm6 = vcmp.lt.f32.partialorder %v4639_v2, 0.0  ;;  %v1995_v10 = vsub.f32 0.0, %v1931_v31  ;;  %v1679_v56 = vmul.f32 %v4270_v37, %v1647_v28  ;;  %v1710_v17 = vadd.f32 0.2548296, %v1678_v20 }
 0x321   : > { %v1930_v38 = vsub.f32 1.0, %v1898_v13  ;;  %v1652_v6 = vadd.f32 -0.28449672, %v1620_v16  ;;  %v1685_v25 = vmul.f32 %v4213_v8, %v1653_v61  ;;  %v1778_v54 = vsub.f32 0.0, %v4286_v58 }
 0x322   : > { %v4319_v26 = vmul.f32 %v2054_v59, %v4640_v55  ;;  %vm1963_vm7 = vcmp.lt.f32.partialorder %v4641_v45, 0.0  ;;  %v1711_v7 = vadd.f32 0.2548296, %v1679_v56  ;;  %v1779_v51 = vsub.f32 0.0, %v4289_v3  ;;  %2302 = vmatmul.mubr.bf16.gmra.mrb[8].mxu1 %v2106_v57 }
 0x323   : > { %v2865_v60 = vpop.eup %2864  ;;  %v2087_v34 = vmul.f32 %v2055_v22, %v4642_v33  ;;  %v1744_v36 = vmul.f32 %v4162_v46, %v1712_v21  ;;  %vm1969_vm8 = vcmp.lt.f32.partialorder %v4643_v0, 0.0  ;;  %2872 = vpow2.f32 %v1876_v62  ;;  %2309 = vmatprep.mubr.bf16.mxu1 %v2109_v11 }
 0x324   : > { %v1742_v15 = vmul.f32 %v4261_v5, %v1710_v17  ;;  %v2867_v42 = vpop.eup %2866  ;;  %v1937_v27 = vsub.f32 1.0, %v1905_v52  ;;  %v2027_v14 = vsel %vm1963_vm7, %v1995_v10, %v1931_v31  ;;  %2874 = vpow2.f32 %v1874_v41  ;;  %v4644_v31 = vld [vmem:[#allocation23_spill] sm:$0xff] }
 0x325   : > { %v1743_v44 = vmul.f32 %v4270_v37, %v1711_v7  ;;  %v4328_v24 = vpop.eup %2868  ;;  %v1994_v39 = vsub.f32 0.0, %v1930_v38  ;;  %v1684_v4 = vmul.f32 %v4229_v50, %v1652_v6  ;;  %v1717_v9 = vadd.f32 0.2548296, %v1685_v25 }
 0x326   : > { %v1810_v46 = vmul.f32 %v1778_v54, %v4286_v58  ;;  %v4332_v59 = vpop.eup %2870  ;;  %v1490_v5 = vmul.f32 1.0614054, %v4328_v24  ;;  %v1811_v16 = vmul.f32 %v1779_v51, %v4289_v3  ;;  %v2108_v61 = vpack.c.bf16 %v4644_v31, %v4131_v1 }
 0x327   : > { %v1903_v13 = vmul.f32 %v2867_v42, %v1743_v44  ;;  %v2059_v22 = vadd.f32 1.0, %v2027_v14  ;;  %v1902_v37 = vmul.f32 %v2865_v60, %v1742_v15  ;;  %v1491_v28 = vmul.f32 1.0614054, %v4332_v59 }
 0x328   : > { %v2111_v20 = vpack.c.bf16 %v4128_v40, %v2087_v34  ;;  %v1904_v53 = vmul.f32 %v4199_v12, %v1744_v36  ;;  %v2001_v57 = vsub.f32 0.0, %v1937_v27  ;;  %v1522_v21 = vadd.f32 -1.4531521, %v1490_v5 }
 0x329   : > { %v1935_v58 = vsub.f32 1.0, %v1903_v13  ;;  %v2026_v41 = vsel %vm1962_vm6, %v1994_v39, %v1930_v38  ;;  %v1716_v62 = vadd.f32 0.2548296, %v1684_v4  ;;  %v1523_v11 = vadd.f32 -1.4531521, %v1491_v28 }
 0x32a   : > { %v1870_v3 = vmul.f32 1.442695, %v1810_v46  ;;  %v1749_v52 = vmul.f32 %v4213_v8, %v1717_v9  ;;  %v1554_v10 = vmul.f32 %v4328_v24, %v1522_v21  ;;  %v1872_v56 = vmul.f32 1.442695, %v1811_v16  ;;  %2310 = vmatmul.mubr.bf16.gmra.mrb[12].mxu1 %v2108_v61  ;;  %v4646_v9 = vld [vmem:[#allocation42_spill] sm:$0xff]  ;;  %v4647_v16 = vld [vmem:[#allocation8_spill] sm:$0xff] }
 0x32b   : > { %v1999_v1 = vsub.f32 0.0, %v1935_v58  ;;  %v2091_v40 = vmul.f32 %v2059_v22, %v4142_v19  ;;  %v1934_v17 = vsub.f32 1.0, %v1902_v37  ;;  %vm1967_vm9 = vcmp.lt.f32.partialorder %v4184_v23, 0.0  ;;  %2317 = vmatprep.mubr.bf16.mxu1 %v2111_v20  ;;  %v4648_v61 = vld [vmem:[#allocation40_spill] sm:$0xff] }
 0x32c   : > { %v1555_v12 = vmul.f32 %v4332_v59, %v1523_v11  ;;  %v1936_v2 = vsub.f32 1.0, %v1904_v53  ;;  %v2033_v38 = vsel %vm1969_vm8, %v2001_v57, %v1937_v27  ;;  %v1586_v25 = vadd.f32 1.4214138, %v1554_v10 }
 0x32d   : > { %v2031_v6 = vsel %vm1967_vm9, %v1999_v1, %v1935_v58  ;;  %v2873_v8 = vpop.eup %2872  ;;  %v2058_v54 = vadd.f32 1.0, %v2026_v41  ;;  %v1748_v55 = vmul.f32 %v4229_v50, %v1716_v62  ;;  %2876 = vpow2.f32 %v1870_v3  ;;  %v4645_v50 = vld [vmem:[#allocation33_spill] sm:$0xff] }
 0x32e   : > { %v1587_v45 = vadd.f32 1.4214138, %v1555_v12  ;;  %v2875_v7 = vpop.eup %2874  ;;  %v1909_v19 = vmul.f32 %v2873_v8, %v1749_v52  ;;  %v1618_v51 = vmul.f32 %v4328_v24, %v1586_v25  ;;  %2878 = vpow2.f32 %v1872_v56  ;;  %v4650_v12 = vld [vmem:[#allocation11_spill] sm:$0xff] }
 0x32f   : > { %v2110_v23 = vpack.c.bf16 %v4116_v63, %v4319_v26  ;;  %v1998_v60 = vsub.f32 0.0, %v1934_v17  ;;  %v2063_v33 = vadd.f32 1.0, %v2031_v6  ;;  %v2113_v36 = vpack.c.bf16 %v4232_v47, %v2091_v40  ;;  %v4649_v40 = vld [vmem:[#allocation31_spill] sm:$0xff] }
 0x330   : > { %v1619_v34 = vmul.f32 %v4332_v59, %v1587_v45  ;;  %v2060_v0 = vadd.f32 1.0, %v4225_v32  ;;  %v2000_v15 = vsub.f32 0.0, %v1936_v2  ;;  %v1258_v42 = vmul.f32 0.5, %v4645_v50 }
 0x331   : > { %v1650_v27 = vadd.f32 -0.28449672, %v1618_v51  ;;  %v2065_v14 = vadd.f32 1.0, %v2033_v38  ;;  %v1908_v44 = vmul.f32 %v2875_v7, %v1748_v55  ;;  %v1263_v39 = vmul.f32 0.5, %v4167_v49 }
 0x332   : > { %v1651_v4 = vadd.f32 -0.28449672, %v1619_v34  ;;  %v1265_v46 = vmul.f32 0.5, %v4646_v9  ;;  %v2090_v63 = vmul.f32 %v2058_v54, %v1258_v42  ;;  %vm1966_vm10 = vcmp.lt.f32.partialorder %v4178_v48, 0.0  ;;  %2318 = vmatmul.mubr.bf16.gmra.mrb[16].mxu1 %v2110_v23 }
 0x333   : > { %v1682_v26 = vmul.f32 %v4328_v24, %v1650_v27  ;;  %v1941_v47 = vsub.f32 1.0, %v1909_v19  ;;  %v2030_v13 = vsel %vm1966_vm10, %v1998_v60, %v1934_v17  ;;  %v2095_v32 = vmul.f32 %v2063_v33, %v1263_v39  ;;  %2325 = vmatprep.mubr.bf16.mxu1 %v2113_v36  ;;  %v4652_v19 = vld [vmem:[#allocation15_spill] sm:$0xff] }
 0x334   : > { %v1683_v5 = vmul.f32 %v4332_v59, %v1651_v4  ;;  %v2092_v31 = vmul.f32 %v2060_v0, %v4647_v16  ;;  %vm1968_vm11 = vcmp.lt.f32.partialorder %v4648_v61, 0.0  ;;  %v2097_v37 = vmul.f32 %v2065_v14, %v1265_v46 }
 0x335   : > { %v1714_v49 = vadd.f32 0.2548296, %v1682_v26  ;;  %v2032_v22 = vsel %vm1968_vm11, %v2000_v15, %v1936_v2  ;;  %v1940_v28 = vsub.f32 1.0, %v1908_v44  ;;  %v2062_v53 = vadd.f32 1.0, %v2030_v13  ;;  %v4653_v15 = vld [vmem:[#allocation10_spill] sm:$0xff] }
 0x336   : > { %v1715_v20 = vadd.f32 0.2548296, %v1683_v5  ;;  %v2112_v57 = vpack.c.bf16 %v2092_v31, %v2090_v63  ;;  %v2005_v21 = vsub.f32 0.0, %v1941_v47  ;;  %v2115_v62 = vpack.c.bf16 %v2097_v37, %v2095_v32 }
 0x337   : > { %v1746_v48 = vmul.f32 %v4328_v24, %v1714_v49  ;;  %v2877_v58 = vpop.eup %2876  ;;  %v2064_v3 = vadd.f32 1.0, %v2032_v22  ;;  %v1262_v52 = vmul.f32 0.5, %v4164_v29  ;;  %v2004_v10 = vsub.f32 0.0, %v1940_v28 }
 0x338   : > { %v1747_v41 = vmul.f32 %v4332_v59, %v1715_v20  ;;  %v2879_v11 = vpop.eup %2878  ;;  %v1264_v17 = vmul.f32 0.5, %v4649_v40  ;;  %vm1973_vm12 = vcmp.lt.f32.partialorder %v4650_v12, 0.0  ;;  %v4651_v59 = vld [vmem:[#allocation14_spill] sm:$0xff]  ;;  %vm1970_vm14 = vcmp.lt.f32.partialorder %v4274_v43, 0.0 }
 0x339   : > { %v1906_v1 = vmul.f32 %v2877_v58, %v1746_v48  ;;  %v2094_v2 = vmul.f32 %v2062_v53, %v1262_v52  ;;  %v2037_v24 = vsel %vm1973_vm12, %v2005_v21, %v1941_v47  ;;  %vm1972_vm13 = vcmp.lt.f32.partialorder %v4651_v59, 0.0 }
 0x33a   : > { %v1907_v56 = vmul.f32 %v2879_v11, %v1747_v41  ;;  %2326 = vmatmul.mubr.bf16.gmra.mrb[20].mxu1 %v2112_v57  ;;  %v2096_v25 = vmul.f32 %v2064_v3, %v1264_v17  ;;  %v2036_v54 = vsel %vm1972_vm13, %v2004_v10, %v1940_v28  ;;  %v2069_v55 = vadd.f32 1.0, %v2037_v24 }
 0x33b   : > { %v1938_v38 = vsub.f32 1.0, %v1906_v1  ;;  %2333 = vmatprep.mubr.bf16.mxu1 %v2115_v62  ;;  %vm1971_vm15 = vcmp.lt.f32.partialorder %v4277_v18, 0.0  ;;  %v1269_v51 = vmul.f32 0.5, %v4652_v19  ;;  %v2068_v33 = vadd.f32 1.0, %v2036_v54 }
 0x33c   : > { %v1939_v6 = vsub.f32 1.0, %v1907_v56  ;;  %v2114_v7 = vpack.c.bf16 %v2096_v25, %v2094_v2  ;;  %v1266_v34 = vmul.f32 0.5, %v4257_v30  ;;  %v1267_v36 = vmul.f32 0.5, %v4259_v35  ;;  %v4383_v30 = vld [vmem:[%s4489_s6] ss:$0 sm:$0xff] }
 0x33d   : > { %v2002_v8 = vsub.f32 0.0, %v1938_v38  ;;  %v1268_v43 = vmul.f32 0.5, %v4653_v15  ;;  %v2101_v50 = vmul.f32 %v2069_v55, %v1269_v51 }
 0x33e   : > { %v2003_v29 = vsub.f32 0.0, %v1939_v6 }
 0x33f   : > { %v2034_v45 = vsel %vm1970_vm14, %v2002_v8, %v1938_v38  ;;  %v2100_v18 = vmul.f32 %v2068_v33, %v1268_v43 }
 0x340   : > { %v2035_v23 = vsel %vm1971_vm15, %v2003_v29, %v1939_v6  ;;  %v2066_v60 = vadd.f32 1.0, %v2034_v45 }
 0x341   : > { %v2067_v0 = vadd.f32 1.0, %v2035_v23 }
 0x342   : > { %v2098_v42 = vmul.f32 %v2066_v60, %v1266_v34  ;;  %2334 = vmatmul.mubr.bf16.gmra.mrb[24].mxu1 %v2114_v7 }
 0x343   : > { %v2099_v27 = vmul.f32 %v2067_v0, %v1267_v36 }
 0x344   : > { %v2116_v44 = vpack.c.bf16 %v2100_v18, %v2098_v42 }
 0x345   : > { %v2117_v14 = vpack.c.bf16 %v2101_v50, %v2099_v27 }
 0x347   : > { %2341 = vmatprep.mubr.bf16.mxu1 %v2117_v14 }
 0x34a   : > { %2342 = vmatmul.mubr.bf16.gmra.mrb[28].mxu1 %v2116_v44 }
 0x3e5   : > { %v2564_v39 = vpop.f32.mrb[0].mxu1 }
 0x3e6   : > { %v2565_v35 = vpop.f32.mrb[1].mxu1 }
 0x3e7   : > { %v2566_v4 = vadd.f32 %v2565_v35, %v2564_v39  ;;  %v2567_v9 = vpop.f32.mrb[2].mxu1 }
 0x3e8   : > { %v2568_v46 = vpop.f32.mrb[3].mxu1 }
 0x3e9   : > { %v2288_v63 = vadd.f32 %v2566_v4, %v4383_v30  ;;  %v2569_v26 = vadd.f32 %v2568_v46, %v2567_v9 }
 0x3eb   : > { %2350 = vst [vmem:[%s4386_s21] sm:$0xff] %v2288_v63  ;;  %v2291_v47 = vadd.f32 %v2569_v26, %v4383_v30 }
 0x3ed   : > { %2351 = vst [vmem:[%s4386_s21 + $0x8] sm:$0xff] %v2291_v47  ;;  %v2570_v13 = vpop.f32.mrb[4].mxu1 }
 0x3ee   : > { %v2571_v32 = vpop.f32.mrb[5].mxu1 }
 0x3ef   : > { %v2572_v5 = vadd.f32 %v2571_v32, %v2570_v13  ;;  %v2573_v16 = vpop.f32.mrb[6].mxu1 }
 0x3f0   : > { %v2574_v31 = vpop.f32.mrb[7].mxu1 }
 0x3f1   : > { %v2296_v61 = vadd.f32 %v2572_v5, %v4383_v30  ;;  %v2575_v49 = vadd.f32 %v2574_v31, %v2573_v16 }
 0x3f3   : > { %2352 = vst [vmem:[%s4386_s21 + $0x10] sm:$0xff] %v2296_v61  ;;  %v2299_v22 = vadd.f32 %v2575_v49, %v4383_v30 }
 0x3f5   : > { %2353 = vst [vmem:[%s4386_s21 + $0x18] sm:$0xff] %v2299_v22  ;;  %v2576_v37 = vpop.f32.mrb[8].mxu1 }
 0x3f6   : > { %v2577_v28 = vpop.f32.mrb[9].mxu1 }
 0x3f7   : > { %v2578_v20 = vadd.f32 %v2577_v28, %v2576_v37  ;;  %v2579_v53 = vpop.f32.mrb[10].mxu1 }
 0x3f8   : > { %v2580_v48 = vpop.f32.mrb[11].mxu1 }
 0x3f9   : > { %v2304_v57 = vadd.f32 %v2578_v20, %v4383_v30  ;;  %v2581_v58 = vadd.f32 %v2580_v48, %v2579_v53 }
 0x3fb   : > { %2354 = vst [vmem:[%s4386_s21 + $0x20] sm:$0xff] %v2304_v57  ;;  %v2307_v21 = vadd.f32 %v2581_v58, %v4383_v30 }
 0x3fd   : > { %2355 = vst [vmem:[%s4386_s21 + $0x28] sm:$0xff] %v2307_v21  ;;  %v2582_v41 = vpop.f32.mrb[12].mxu1 }
 0x3fe   : > { %v2583_v62 = vpop.f32.mrb[13].mxu1 }
 0x3ff   : > { %v2584_v11 = vadd.f32 %v2583_v62, %v2582_v41  ;;  %v2585_v3 = vpop.f32.mrb[14].mxu1 }
 0x400   : > { %v2586_v52 = vpop.f32.mrb[15].mxu1 }
 0x401   : > { %v2312_v1 = vadd.f32 %v2584_v11, %v4383_v30  ;;  %v2587_v10 = vadd.f32 %v2586_v52, %v2585_v3 }
 0x403   : > { %2356 = vst [vmem:[%s4386_s21 + $0x30] sm:$0xff] %v2312_v1  ;;  %v2315_v56 = vadd.f32 %v2587_v10, %v4383_v30 }
 0x405   : > { %2357 = vst [vmem:[%s4386_s21 + $0x38] sm:$0xff] %v2315_v56  ;;  %v2588_v40 = vpop.f32.mrb[16].mxu1 }
 0x406   : > { %v2589_v17 = vpop.f32.mrb[17].mxu1 }
 0x407   : > { %v2590_v12 = vadd.f32 %v2589_v17, %v2588_v40  ;;  %v2591_v2 = vpop.f32.mrb[18].mxu1 }
 0x408   : > { %v2592_v38 = vpop.f32.mrb[19].mxu1 }
 0x409   : > { %v2320_v24 = vadd.f32 %v2590_v12, %v4383_v30  ;;  %v2593_v6 = vadd.f32 %v2592_v38, %v2591_v2 }
 0x40b   : > { %2358 = vst [vmem:[%s4386_s21 + $0x40] sm:$0xff] %v2320_v24  ;;  %v2323_v25 = vadd.f32 %v2593_v6, %v4383_v30 }
 0x40d   : > { %2359 = vst [vmem:[%s4386_s21 + $0x48] sm:$0xff] %v2323_v25  ;;  %v2594_v59 = vpop.f32.mrb[20].mxu1 }
 0x40e   : > { %v2595_v8 = vpop.f32.mrb[21].mxu1 }
 0x40f   : > { %v2596_v54 = vadd.f32 %v2595_v8, %v2594_v59  ;;  %v2597_v29 = vpop.f32.mrb[22].mxu1 }
 0x410   : > { %v2598_v55 = vpop.f32.mrb[23].mxu1 }
 0x411   : > { %v2328_v45 = vadd.f32 %v2596_v54, %v4383_v30  ;;  %v2599_v7 = vadd.f32 %v2598_v55, %v2597_v29 }
 0x413   : > { %2360 = vst [vmem:[%s4386_s21 + $0x50] sm:$0xff] %v2328_v45  ;;  %v2331_v19 = vadd.f32 %v2599_v7, %v4383_v30 }
 0x415   : > { %2361 = vst [vmem:[%s4386_s21 + $0x58] sm:$0xff] %v2331_v19  ;;  %v2600_v51 = vpop.f32.mrb[24].mxu1 }
 0x416   : > { %v2601_v23 = vpop.f32.mrb[25].mxu1 }
 0x417   : > { %v2602_v60 = vadd.f32 %v2601_v23, %v2600_v51  ;;  %v2603_v33 = vpop.f32.mrb[26].mxu1 }
 0x418   : > { %v2604_v34 = vpop.f32.mrb[27].mxu1 }
 0x419   : > { %v2336_v36 = vadd.f32 %v2602_v60, %v4383_v30  ;;  %v2605_v0 = vadd.f32 %v2604_v34, %v2603_v33 }
 0x41b   : > { %2362 = vst [vmem:[%s4386_s21 + $0x60] sm:$0xff] %v2336_v36  ;;  %v2339_v15 = vadd.f32 %v2605_v0, %v4383_v30 }
 0x41d   : > { %2363 = vst [vmem:[%s4386_s21 + $0x68] sm:$0xff] %v2339_v15  ;;  %v2606_v43 = vpop.f32.mrb[28].mxu1 }
 0x41e   : > { %v2607_v50 = vpop.f32.mrb[29].mxu1 }
 0x41f   : > { %v2608_v42 = vadd.f32 %v2607_v50, %v2606_v43  ;;  %v2609_v27 = vpop.f32.mrb[30].mxu1 }
 0x420   : > { %v2610_v18 = vpop.f32.mrb[31].mxu1 }
 0x421   : > { %v2344_v14 = vadd.f32 %v2608_v42, %v4383_v30  ;;  %v2611_v44 = vadd.f32 %v2610_v18, %v2609_v27 }
 0x423   : > { %2364 = vst [vmem:[%s4386_s21 + $0x70] sm:$0xff] %v2344_v14  ;;  %v2347_v39 = vadd.f32 %v2611_v44, %v4383_v30 }
 0x425   : > { %2365 = vst [vmem:[%s4386_s21 + $0x78] sm:$0xff] %v2347_v39 }
 0x426   : > { %2893 = shalt.err (!%p2890_p7)
}
 0x427   : > { %s2894_s18 = scalar_lea.hbm %s4421_s30, 2048  ;;  %s2898_s17 = scalar_lea.hbm %s4490_s7, 16384 }
 0x428   : > { %p2895_p9 = scmp.ne.s32.totalorder %s4421_s30, %s2894_s18  ;;  %p2899_p12 = scmp.lt.u32.totalorder %s4421_s30, %s4490_s7 }
 0x429   : > { %p2900_p13 = scmp.lt.u32.totalorder %s2898_s17, %s2894_s18  ;;  %p2902_p1 = scmp.lt.u32.totalorder %s2894_s18, %s4421_s30 }
 0x42a   : > { %p2896_p10 = pnand %p2895_p9, %p3071_p3 }
 0x42b   : > { %p2901_p0 = por %p2900_p13, %p2899_p12 }
 0x42c   : > { %p2897_p11 = pneg %p2896_p10 }
 0x42d   : > { %p2903_p2 = por %p2902_p1, %p2901_p0 }
 0x42f   : > { %p2904_p4 = pnand %p2903_p2, %p2897_p11 }
 0x431   : > { %2907 = shalt.err (!%p2904_p4)
}
 0x432   : > { %s2978_s9 = smov 128   ;;  %s2979_s13 = smov 8  }
 0x433   : > { %2612 = dma.vmem_to_hbm [thread:$0]  (%p3071_p3), %s4426_s28, 2048, %s4421_s30, %s4431_s22, %s2978_s9, %s2978_s9, %s2979_s13  }
 0x434 PF: > { %p2618_p5 = scmp.ge.s32.totalorder %s2974_s8, 2  ;;  %s2397_s11 = sand.u32 1, %s2946_s24  }
 0x435   : > { %s2398_s12 = scalar_lea.sflag [#allocation3], %s2397_s11 }
 0x436   : > { %p2615_p6 = pnand %p2618_p5, %p3080_p8 }
 0x438   : > { %2941 = dma.done.wait (!%p2615_p6), %s2398_s12, 2048  }
 0x439   : > { %2943 = vsyncadd (!%p2615_p6), %s2398_s12, 4294965248  ;;  %s20_s8 = sadd.s32 1, %s2974_s8   ;;  %s4654_s28 = sld [smem:[#allocation5_spill]] }
 0x43a   : > { %p17_p7 = scmp.ge.s32.totalorder %s20_s8, 10   ;;  %s4655_s14 = sld [smem:[#allocation6_spill]] }
 0x43b   : > { %s4656_s30 = sld [smem:[#allocation7_spill]]  ;;  %s4657_s24 = smov %s2950_s25 }
 0x43c   : > { %s4658_s25 = smov %s2954_s26  ;;  %s4659_s26 = smov %s3089_s19 }
 0x43d   : > { %s4660_s27 = smov %s2966_s29  ;;  %19 = sbr.rel (!%p17_p7) target bundleno = 5 (0x5), region = 89 }
 0x440   : > { %s4661_s29 = smov %s4655_s14 }
 0x444   :  { %2403 = vsyncpa [#allocation3], 1 }
 0x445   :  { %2405 = vsyncpa [#allocation3 + $0x1], 1 }

// kernel: tpu_custom_call.1
= control target key start
LH: loop header
LB: loop body
LE: loop exit
PB: predicated region body
PF: predicated region fallthrough
CT: control target
= control target key end

     0   :  { %12 = vsyncpa [#allocation3], 0  ;;  %s4483_s0 = inlined_call_operand.vmem [shape: bf16[2,512,128], index: 0, kind: input, shape index: {}]   ;;  %s4484_s1 = inlined_call_operand.vmem [shape: bf16[128,256], index: 1, kind: input, shape index: {}]   ;;  %s4485_s2 = inlined_call_operand.vmem [shape: f32[1,256], index: 2, kind: input, shape index: {}]   ;;  %s4486_s3 = inlined_call_operand.vmem [shape: f32[512,1], index: 3, kind: input, shape index: {}]   ;;  %s4487_s4 = inlined_call_operand.vmem [shape: f32[512,1], index: 4, kind: input, shape index: {}]   ;;  %s4488_s5 = inlined_call_operand.vmem [shape: bf16[256,128], index: 5, kind: input, shape index: {}]   ;;  %s4489_s6 = inlined_call_operand.vmem [shape: f32[1,128], index: 6, kind: input, shape index: {}]   ;;  %s4490_s7 = inlined_call_operand.hbm [shape: f32[2,512,128], index: 7, kind: output, shape index: {}]  }
   0x1   :  { %14 = vsyncpa [#allocation3 + $0x1], 0  ;;  %s3020_s24 = smov 0   ;;  %s3022_s25 = smov 0  }
   0x2   :  { %s3024_s26 = smov 0   ;;  %s3026_s27 = smov 0  }
   0x3   :  { %s3028_s28 = smov 0   ;;  %s3030_s29 = smov 0  }
   0x4   :  { %s3032_s30 = smov 0   ;;  %s3034_s8 = smov 0  }
   0x5 LB: > { %4546 = sst [smem:[#allocation5_spill]] %s2970_s30  ;;  %s2488_s9 = sadd.s32 4294967295, %s2974_s8   ;;  %s2974_s8 = sphi %s3034_s8, %s20_s8   ;;  %s2970_s30 = sphi %s3032_s30, %s4656_s30   ;;  %s2966_s29 = sphi %s3030_s29, %s4661_s29   ;;  %s2962_s28 = sphi %s3028_s28, %s4654_s28   ;;  %s2958_s27 = sphi %s3026_s27, %s4660_s27   ;;  %s2954_s26 = sphi %s3024_s26, %s4659_s26   ;;  %s2950_s25 = sphi %s3022_s25, %s4658_s25   ;;  %s2946_s24 = sphi %s3020_s24, %s4657_s24  }
   0x6   : > { %s2489_s10 = sadd.s32 4294967294, %s2974_s8   ;;  %s29_s11 = sadd.s32 1, %s2966_s29 }
   0x7   : > { %p30_p0 = scmp.ge.s32.totalorder %s29_s11, 4  ;;  %s32_s12 = sadd.s32 1, %s2970_s30 }
   0x8   : > { %p215_p1 = scmp.ne.s32.totalorder %s2954_s26, %s2950_s25  ;;  %p216_p2 = scmp.eq.s32.totalorder %s2488_s9, 7 }
   0x9   : > { %s4663_s11 = smov (%p30_p0, %s29_s11), 0  ;;  %s4665_s12 = smov (!%p30_p0, %s32_s12), %s2970_s30 }
   0xa   : > { %4547 = sst [smem:[#allocation6_spill]] %s4663_s11  ;;  %s201_s13 = ssub.s32 %s2966_s29, %s4663_s11 }
   0xb   : > { %p3071_p3 = por %p216_p2, %p215_p1  ;;  %p34_p4 = scmp.ge.s32.totalorder %s4665_s12, 2 }
   0xc   : > { %p221_p5 = scmp.ne.s32.totalorder %s2950_s25, %s2946_s24  ;;  %p222_p6 = scmp.eq.s32.totalorder %s2489_s10, 7 }
   0xd   : > { %p2492_p7 = scmp.ge.s32.totalorder %s2974_s8, 1  ;;  %s4667_s12 = smov (%p34_p4, %s4665_s12), 0 }
   0xe   : > { %4549 = sst [smem:[#allocation7_spill]] %s4667_s12  ;;  %p3080_p8 = por %p222_p6, %p221_p5 }
   0xf   : > { %p283_p9 = scmp.lt.s32.totalorder %s2974_s8, 9  ;;  %s200_s16 = ssub.s32 %s2970_s30, %s4667_s12 }
  0x10   : > { %s205_s17 = sadd.s32 1, %s2954_s26  ;;  %s202_s18 = sor.u32 %s201_s13, %s200_s16 }
  0x11   : > { %p284_p10 = pnand %p2492_p7, %p283_p9  ;;  %p203_p11 = scmp.eq.s32.totalorder %s202_s18, 0 }
  0x13   : > { %s3089_s19 = scalar_select %p203_p11, %s2954_s26, %s205_s17  }
  0x14   : > { %287 = sbr.rel (%p284_p10) target bundleno = 1076 (0x434), region = 48 }
  0x1b   : > { %v2688_v0 = vld [vmem:[%s4484_s1 + $0x4] ss:$8 sps:$4 sm:$0xff]   ;;  %s3095_s22 = sshll.u32 %s2958_s27, 4  ;;  %v2690_v1 = vld [vmem:[%s4484_s1] ss:$8 sps:$4 sm:$0xff]   ;;  %v2976_v2 = vmov 0   ;;  %v387_v25 = vlaneseq }
  0x1c   : > { %557 = vmatprep.mubr.bf16.mxu0 %v2976_v2  ;;  %p330_p12 = scmp.lt.s32.totalorder %s2962_s28, 1  ;;  %p332_p13 = scmp.lt.s32.totalorder %s3095_s22, 63  ;;  %2687 = vset.pattern.permute.xlu1 %v2976_v2  ;;  %v2691_v3 = vld [vmem:[%s4484_s1 + $0x14] ss:$8 sps:$4 sm:$0xff]   ;;  %v2693_v4 = vld [vmem:[%s4484_s1 + $0x10] ss:$8 sps:$4 sm:$0xff]  }
  0x1d   : > { %525 = vmatprep.subr.bf16.mxu0 %v2688_v0  ;;  %2686 = vset.pattern.permute.xlu0 %v2976_v2  ;;  %v2694_v5 = vld [vmem:[%s4484_s1 + $0x24] ss:$8 sps:$4 sm:$0xff]   ;;  %v2696_v6 = vld [vmem:[%s4484_s1 + $0x20] ss:$8 sps:$4 sm:$0xff]   ;;  %v2697_v7 = vld [vmem:[%s4484_s1 + $0x34] ss:$8 sps:$4 sm:$0xff]  }
  0x1e   : > { %526 = vmatpush1.bf16.msra.mxu0 %v2690_v1  ;;  %s331_s17 = scalar_select %p330_p12, %s2962_s28, 1  ;;  %v2699_v8 = vld [vmem:[%s4484_s1 + $0x30] ss:$8 sps:$4 sm:$0xff]   ;;  %v2700_v9 = vld [vmem:[%s4484_s1 + $0x44] ss:$8 sps:$4 sm:$0xff]   ;;  %v388_v26 = vshrl.u32 %v387_v25, 7 }
  0x1f   : > { %527 = vmatprep.subr.bf16.mxu0 %v2691_v3  ;;  %s3113_s21 = scalar_select %p332_p13, %s3095_s22, 63  ;;  %v2702_v10 = vld [vmem:[%s4484_s1 + $0x40] ss:$8 sps:$4 sm:$0xff]   ;;  %v2703_v11 = vld [vmem:[%s4484_s1 + $0x54] ss:$8 sps:$4 sm:$0xff]  }
  0x20   : > { %s2495_s23 = sshll.u32 %s331_s17, 6  ;;  %v2705_v12 = vld [vmem:[%s4484_s1 + $0x50] ss:$8 sps:$4 sm:$0xff]   ;;  %v2706_v13 = vld [vmem:[%s4484_s1 + $0x64] ss:$8 sps:$4 sm:$0xff]   ;;  %v389_v27 = vsub.s32 0, %v388_v26 }
  0x21   : > { %s335_s9 = sadd.s32 %s2495_s23, %s3113_s21  ;;  %v2708_v14 = vld [vmem:[%s4484_s1 + $0x60] ss:$8 sps:$4 sm:$0xff]   ;;  %v2709_v15 = vld [vmem:[%s4484_s1 + $0x74] ss:$8 sps:$4 sm:$0xff]   ;;  %v2711_v16 = vld [vmem:[%s4484_s1 + $0x70] ss:$8 sps:$4 sm:$0xff]  }
  0x22   : > { %528 = vmatpush1.bf16.msra.mxu0 %v2693_v4  ;;  %s2496_s12 = sshll.u32 %s335_s9, 2  ;;  %v385_v28 = vld [vmem:[%s4485_s2] sm:$0x3]  ;;  %v393_v29 = vsub.s32 1, %v388_v26  ;;  %s2544_s17 = sshll.u32 %s2962_s28, 6 }
  0x23   : > { %529 = vmatprep.subr.bf16.mxu0 %v2694_v5  ;;  %s3125_s18 = scalar_lea.vmem %s4483_s0, %s2496_s12  ;;  %v3165_v30 = vrot.slane %v385_v28, %v389_v27  ;;  %s2977_s12 = smov [#allocation2]  }
  0x24   : > { %v2712_v17 = vld [vmem:[%s3125_s18] sm:$0xff]   ;;  %v2713_v18 = vld [vmem:[%s3125_s18 + $0x8] sm:$0xff]   ;;  %v2714_v19 = vld [vmem:[%s3125_s18 + $0x10] sm:$0xff]   ;;  %v3167_v31 = vrot.slane %v385_v28, %v393_v29 }
  0x25   : > { %v2715_v20 = vld [vmem:[%s3125_s18 + $0x18] sm:$0xff]   ;;  %v2716_v21 = vld [vmem:[%s3125_s18 + $0x20] sm:$0xff]   ;;  %v2717_v22 = vld [vmem:[%s3125_s18 + $0x28] sm:$0xff]  }
  0x26   : > { %530 = vmatpush1.bf16.msra.mxu0 %v2696_v6  ;;  %v2718_v23 = vld [vmem:[%s3125_s18 + $0x30] sm:$0xff]   ;;  %v2719_v24 = vld [vmem:[%s3125_s18 + $0x38] sm:$0xff]   ;;  %s2498_s18 = sshll.u32 %s3113_s21, 3 }
  0x27   : > { %531 = vmatprep.subr.bf16.mxu0 %v2697_v7  ;;  %s3375_s20 = scalar_lea.vmem %s4486_s3, %s2498_s18  ;;  %s3384_s23 = scalar_lea.vmem %s4487_s4, %s2498_s18 }
  0x28   : > { %s326_s18 = sand.u32 1, %s2950_s25  }
  0x29   : > { %s2493_s27 = sshll.u32 %s326_s18, 7 }
  0x2a   : > { %532 = vmatpush1.bf16.msra.mxu0 %v2699_v8  ;;  %s4386_s21 = scalar_lea.vmem [#allocation2], %s2493_s27  ;;  %s2884_s27 = sshll.u32 %s2977_s12, 4  ;;  %s2885_s27 = int_to_ptr.vmem [resolvable:$false] %s2884_s27 }
  0x2b   : > { %533 = vmatprep.subr.bf16.mxu0 %v2700_v9  ;;  %s2382_s28 = sshll.u32 %s4386_s21, 4  ;;  %s2886_s16 = scalar_lea.vmem %s2885_s27, 4096  ;;  %s4426_s28 = int_to_ptr.vmem [resolvable:$true] %s2382_s28 }
  0x2c   : > { %s2880_s11 = scalar_lea.vmem %s4426_s28, 2048  ;;  %p2887_p4 = scmp.lt.s32.totalorder %s4426_s28, %s2885_s27 }
  0x2d   : > { %p2881_p0 = scmp.ne.s32.totalorder %s4426_s28, %s2880_s11  ;;  %p2888_p5 = scmp.lt.s32.totalorder %s2886_s16, %s2880_s11 }
  0x2e   : > { %534 = vmatpush1.bf16.msra.mxu0 %v2702_v10 }
  0x2f   : > { %535 = vmatprep.subr.bf16.mxu0 %v2703_v11  ;;  %p2882_p1 = pnand %p2881_p0, %p3071_p3  ;;  %p2889_p6 = por %p2888_p5, %p2887_p4 }
  0x31   : > { %p2883_p2 = pneg %p2882_p1 }
  0x32   : > { %536 = vmatpush1.bf16.msra.mxu0 %v2705_v12 }
  0x33   : > { %537 = vmatprep.subr.bf16.mxu0 %v2706_v13  ;;  %p2890_p7 = pnand %p2889_p6, %p2883_p2 }
  0x36   : > { %538 = vmatpush1.bf16.msra.mxu0 %v2708_v14 }
  0x37   : > { %539 = vmatprep.subr.bf16.mxu0 %v2709_v15 }
  0x3a   : > { %540 = vmatpush1.bf16.msra.mxu0 %v2711_v16 }
  0x3d   : > { %558 = vmatmul.mubr.bf16.vlgmr.msra.gmra.mrb[0].mxu0 %v2712_v17 }
  0x3e   : > { %567 = vmatprep.mubr.bf16.mxu0 %v2976_v2 }
  0x45   : > { %568 = vmatmul.mubr.bf16.gmra.mrb[4].mxu0 %v2713_v18 }
  0x46   : > { %577 = vmatprep.mubr.bf16.mxu0 %v2976_v2 }
  0x4d   : > { %578 = vmatmul.mubr.bf16.gmra.mrb[8].mxu0 %v2714_v19 }
  0x4e   : > { %587 = vmatprep.mubr.bf16.mxu0 %v2976_v2 }
  0x55   : > { %588 = vmatmul.mubr.bf16.gmra.mrb[12].mxu0 %v2715_v20 }
  0x56   : > { %597 = vmatprep.mubr.bf16.mxu0 %v2976_v2 }
  0x5d   : > { %598 = vmatmul.mubr.bf16.gmra.mrb[16].mxu0 %v2716_v21 }
  0x5e   : > { %607 = vmatprep.mubr.bf16.mxu0 %v2976_v2 }
  0x65   : > { %608 = vmatmul.mubr.bf16.gmra.mrb[20].mxu0 %v2717_v22 }
  0x66   : > { %617 = vmatprep.mubr.bf16.mxu0 %v2976_v2 }
  0x6d   : > { %618 = vmatmul.mubr.bf16.gmra.mrb[24].mxu0 %v2718_v23 }
  0x6e   : > { %627 = vmatprep.mubr.bf16.mxu0 %v2976_v2 }
  0x75   : > { %628 = vmatmul.mubr.bf16.gmra.mrb[28].mxu0 %v2719_v24 }
 0x110   : > { %v559_v32 = vpop.f32.mrb[0].mxu0 }
 0x111   : > { %v3170_v33 = vadd.f32 %v559_v32, %v3165_v30  ;;  %v561_v34 = vpop.f32.mrb[1].mxu0 }
 0x112   : > { %v3173_v35 = vadd.f32 %v561_v34, %v3167_v31  ;;  %v563_v36 = vpop.f32.mrb[2].mxu0 }
 0x113   : > { %v3176_v37 = vadd.f32 %v563_v36, %v3165_v30  ;;  %v565_v38 = vpop.f32.mrb[3].mxu0  ;;  %v742_v39 = vmul.f32 %v3170_v33, %v3170_v33 }
 0x114   : > { %v3181_v40 = vadd.f32 %v565_v38, %v3167_v31  ;;  %v638_v41 = vadd.f32 %v3173_v35, %v3170_v33  ;;  %v743_v42 = vmul.f32 %v3173_v35, %v3173_v35 }
 0x115   : > { %v744_v44 = vmul.f32 %v3176_v37, %v3176_v37 }
 0x116   : > { %639 = vadd.xlane.f32.xlu0 %v638_v41  ;;  %v774_v43 = vadd.f32 %v743_v42, %v742_v39  ;;  %v745_v45 = vmul.f32 %v3181_v40, %v3181_v40  ;;  %v641_v47 = vadd.f32 %v3181_v40, %v3176_v37 }
 0x118   : > { %v569_v46 = vpop.f32.mrb[4].mxu0  ;;  %775 = vadd.xlane.f32.xlu1 %v774_v43  ;;  %v777_v52 = vadd.f32 %v745_v45, %v744_v44 }
 0x119   : > { %v3194_v48 = vadd.f32 %v569_v46, %v3165_v30  ;;  %v571_v49 = vpop.f32.mrb[5].mxu0 }
 0x11a   : > { %v3197_v50 = vadd.f32 %v571_v49, %v3167_v31  ;;  %v573_v51 = vpop.f32.mrb[6].mxu0  ;;  %642 = vadd.xlane.f32.xlu0 %v641_v47 }
 0x11b   : > { %v3200_v53 = vadd.f32 %v573_v51, %v3165_v30  ;;  %v575_v54 = vpop.f32.mrb[7].mxu0  ;;  %v746_v55 = vmul.f32 %v3194_v48, %v3194_v48 }
 0x11c   : > { %v3205_v56 = vadd.f32 %v575_v54, %v3167_v31  ;;  %778 = vadd.xlane.f32.xlu1 %v777_v52  ;;  %v644_v57 = vadd.f32 %v3197_v50, %v3194_v48  ;;  %v747_v58 = vmul.f32 %v3197_v50, %v3197_v50 }
 0x11d   : > { %v748_v59 = vmul.f32 %v3200_v53, %v3200_v53 }
 0x11e   : > { %645 = vadd.xlane.f32.xlu0 %v644_v57  ;;  %v647_v60 = vadd.f32 %v3205_v56, %v3200_v53  ;;  %v780_v61 = vadd.f32 %v747_v58, %v746_v55  ;;  %v749_v62 = vmul.f32 %v3205_v56, %v3205_v56 }
 0x120   : > { %v579_v63 = vpop.f32.mrb[8].mxu0  ;;  %648 = vadd.xlane.f32.xlu1 %v647_v60  ;;  %v783_v0 = vadd.f32 %v749_v62, %v748_v59 }
 0x121   : > { %v3218_v1 = vadd.f32 %v579_v63, %v3165_v30  ;;  %v581_v2 = vpop.f32.mrb[9].mxu0 }
 0x122   : > { %v3221_v3 = vadd.f32 %v581_v2, %v3167_v31  ;;  %v583_v4 = vpop.f32.mrb[10].mxu0  ;;  %781 = vadd.xlane.f32.xlu0 %v780_v61 }
 0x123   : > { %v3224_v5 = vadd.f32 %v583_v4, %v3165_v30  ;;  %v585_v6 = vpop.f32.mrb[11].mxu0  ;;  %v750_v7 = vmul.f32 %v3218_v1, %v3218_v1 }
 0x124   : > { %v3229_v8 = vadd.f32 %v585_v6, %v3167_v31  ;;  %784 = vadd.xlane.f32.xlu1 %v783_v0  ;;  %v650_v9 = vadd.f32 %v3221_v3, %v3218_v1  ;;  %v751_v10 = vmul.f32 %v3221_v3, %v3221_v3 }
 0x125   : > { %v752_v11 = vmul.f32 %v3224_v5, %v3224_v5 }
 0x126   : > { %v653_v12 = vadd.f32 %v3229_v8, %v3224_v5  ;;  %651 = vadd.xlane.f32.xlu0 %v650_v9  ;;  %v753_v13 = vmul.f32 %v3229_v8, %v3229_v8  ;;  %v786_v14 = vadd.f32 %v751_v10, %v750_v7 }
 0x128   : > { %v589_v15 = vpop.f32.mrb[12].mxu0  ;;  %654 = vadd.xlane.f32.xlu1 %v653_v12  ;;  %v789_v16 = vadd.f32 %v753_v13, %v752_v11 }
 0x129   : > { %v3242_v17 = vadd.f32 %v589_v15, %v3165_v30  ;;  %v591_v18 = vpop.f32.mrb[13].mxu0 }
 0x12a   : > { %v3245_v19 = vadd.f32 %v591_v18, %v3167_v31  ;;  %v593_v20 = vpop.f32.mrb[14].mxu0  ;;  %787 = vadd.xlane.f32.xlu0 %v786_v14 }
 0x12b   : > { %v3248_v21 = vadd.f32 %v593_v20, %v3165_v30  ;;  %v595_v22 = vpop.f32.mrb[15].mxu0  ;;  %v754_v23 = vmul.f32 %v3242_v17, %v3242_v17 }
 0x12c   : > { %v3253_v24 = vadd.f32 %v595_v22, %v3167_v31  ;;  %790 = vadd.xlane.f32.xlu1 %v789_v16  ;;  %v656_v25 = vadd.f32 %v3245_v19, %v3242_v17  ;;  %v755_v26 = vmul.f32 %v3245_v19, %v3245_v19 }
 0x12d   : > { %v756_v27 = vmul.f32 %v3248_v21, %v3248_v21 }
 0x12e   : > { %v659_v28 = vadd.f32 %v3253_v24, %v3248_v21  ;;  %657 = vadd.xlane.f32.xlu0 %v656_v25  ;;  %v757_v29 = vmul.f32 %v3253_v24, %v3253_v24  ;;  %v792_v32 = vadd.f32 %v755_v26, %v754_v23 }
 0x130   : > { %v599_v34 = vpop.f32.mrb[16].mxu0  ;;  %660 = vadd.xlane.f32.xlu1 %v659_v28  ;;  %v795_v36 = vadd.f32 %v757_v29, %v756_v27 }
 0x131   : > { %v3266_v38 = vadd.f32 %v599_v34, %v3165_v30  ;;  %v601_v39 = vpop.f32.mrb[17].mxu0 }
 0x132   : > { %v3269_v41 = vadd.f32 %v601_v39, %v3167_v31  ;;  %v603_v42 = vpop.f32.mrb[18].mxu0  ;;  %793 = vadd.xlane.f32.xlu0 %v792_v32 }
 0x133   : > { %4551 = vst [vmem:[#allocation8_spill] sm:$0xff] %v3266_v38  ;;  %v3272_v43 = vadd.f32 %v603_v42, %v3165_v30  ;;  %v605_v44 = vpop.f32.mrb[19].mxu0  ;;  %v758_v45 = vmul.f32 %v3266_v38, %v3266_v38 }
 0x134   : > { %4552 = vst [vmem:[#allocation9_spill] sm:$0xff] %v3269_v41  ;;  %v3277_v46 = vadd.f32 %v605_v44, %v3167_v31  ;;  %796 = vadd.xlane.f32.xlu1 %v795_v36  ;;  %v662_v47 = vadd.f32 %v3269_v41, %v3266_v38  ;;  %v759_v49 = vmul.f32 %v3269_v41, %v3269_v41 }
 0x135   : > { %v760_v51 = vmul.f32 %v3272_v43, %v3272_v43 }
 0x136   : > { %v665_v52 = vadd.f32 %v3277_v46, %v3272_v43  ;;  %663 = vadd.xlane.f32.xlu0 %v662_v47  ;;  %v761_v54 = vmul.f32 %v3277_v46, %v3277_v46  ;;  %v798_v55 = vadd.f32 %v759_v49, %v758_v45 }
 0x138   : > { %v609_v57 = vpop.f32.mrb[20].mxu0  ;;  %666 = vadd.xlane.f32.xlu1 %v665_v52  ;;  %v801_v58 = vadd.f32 %v761_v54, %v760_v51 }
 0x139   : > { %v3290_v59 = vadd.f32 %v609_v57, %v3165_v30  ;;  %v611_v60 = vpop.f32.mrb[21].mxu0 }
 0x13a   : > { %v3293_v61 = vadd.f32 %v611_v60, %v3167_v31  ;;  %v613_v62 = vpop.f32.mrb[22].mxu0  ;;  %799 = vadd.xlane.f32.xlu0 %v798_v55 }
 0x13b   : > { %4553 = vst [vmem:[#allocation10_spill] sm:$0xff] %v3290_v59  ;;  %v3296_v63 = vadd.f32 %v613_v62, %v3165_v30  ;;  %v615_v0 = vpop.f32.mrb[23].mxu0  ;;  %v762_v2 = vmul.f32 %v3290_v59, %v3290_v59 }
 0x13c   : > { %4554 = vst [vmem:[#allocation11_spill] sm:$0xff] %v3293_v61  ;;  %v3301_v4 = vadd.f32 %v615_v0, %v3167_v31  ;;  %802 = vadd.xlane.f32.xlu1 %v801_v58  ;;  %v668_v6 = vadd.f32 %v3293_v61, %v3290_v59  ;;  %v763_v7 = vmul.f32 %v3293_v61, %v3293_v61 }
 0x13d   : > { %v764_v9 = vmul.f32 %v3296_v63, %v3296_v63 }
 0x13e   : > { %v671_v10 = vadd.f32 %v3301_v4, %v3296_v63  ;;  %669 = vadd.xlane.f32.xlu0 %v668_v6  ;;  %v765_v11 = vmul.f32 %v3301_v4, %v3301_v4  ;;  %v804_v12 = vadd.f32 %v763_v7, %v762_v2 }
 0x140   : > { %v619_v13 = vpop.f32.mrb[24].mxu0  ;;  %672 = vadd.xlane.f32.xlu1 %v671_v10  ;;  %v807_v14 = vadd.f32 %v765_v11, %v764_v9 }
 0x141   : > { %v3314_v15 = vadd.f32 %v619_v13, %v3165_v30  ;;  %v621_v16 = vpop.f32.mrb[25].mxu0 }
 0x142   : > { %v3317_v18 = vadd.f32 %v621_v16, %v3167_v31  ;;  %v623_v20 = vpop.f32.mrb[26].mxu0  ;;  %805 = vadd.xlane.f32.xlu0 %v804_v12 }
 0x143   : > { %4555 = vst [vmem:[#allocation12_spill] sm:$0xff] %v3314_v15  ;;  %v3320_v22 = vadd.f32 %v623_v20, %v3165_v30  ;;  %v625_v23 = vpop.f32.mrb[27].mxu0  ;;  %v766_v25 = vmul.f32 %v3314_v15, %v3314_v15 }
 0x144   : > { %4556 = vst [vmem:[#allocation13_spill] sm:$0xff] %v3317_v18  ;;  %v3325_v26 = vadd.f32 %v625_v23, %v3167_v31  ;;  %808 = vadd.xlane.f32.xlu1 %v807_v14  ;;  %v674_v27 = vadd.f32 %v3317_v18, %v3314_v15  ;;  %v767_v28 = vmul.f32 %v3317_v18, %v3317_v18 }
 0x145   : > { %4557 = vst [vmem:[#allocation14_spill] sm:$0xff] %v3320_v22  ;;  %v768_v29 = vmul.f32 %v3320_v22, %v3320_v22 }
 0x146   : > { %4558 = vst [vmem:[#allocation15_spill] sm:$0xff] %v3325_v26  ;;  %v677_v32 = vadd.f32 %v3325_v26, %v3320_v22  ;;  %675 = vadd.xlane.f32.xlu0 %v674_v27  ;;  %v769_v34 = vmul.f32 %v3325_v26, %v3325_v26  ;;  %v810_v36 = vadd.f32 %v767_v28, %v766_v25 }
 0x148   : > { %v629_v39 = vpop.f32.mrb[28].mxu0  ;;  %678 = vadd.xlane.f32.xlu1 %v677_v32  ;;  %v813_v42 = vadd.f32 %v769_v34, %v768_v29 }
 0x149   : > { %v3338_v44 = vadd.f32 %v629_v39, %v3165_v30  ;;  %v631_v45 = vpop.f32.mrb[29].mxu0 }
 0x14a   : > { %v3341_v47 = vadd.f32 %v631_v45, %v3167_v31  ;;  %v633_v49 = vpop.f32.mrb[30].mxu0  ;;  %811 = vadd.xlane.f32.xlu0 %v810_v36 }
 0x14b   : > { %4559 = vst [vmem:[#allocation16_spill] sm:$0xff] %v3338_v44  ;;  %v3344_v51 = vadd.f32 %v633_v49, %v3165_v30  ;;  %v635_v52 = vpop.f32.mrb[31].mxu0  ;;  %v770_v54 = vmul.f32 %v3338_v44, %v3338_v44 }
 0x14c   : > { %4560 = vst [vmem:[#allocation17_spill] sm:$0xff] %v3341_v47  ;;  %v3349_v55 = vadd.f32 %v635_v52, %v3167_v31  ;;  %814 = vadd.xlane.f32.xlu1 %v813_v42  ;;  %v680_v57 = vadd.f32 %v3341_v47, %v3338_v44  ;;  %v771_v58 = vmul.f32 %v3341_v47, %v3341_v47  ;;  %v955_v47 = vld [vmem:[%s3384_s23 + $0x28] sm:$0xff] }
 0x14d   : > { %4561 = vst [vmem:[#allocation18_spill] sm:$0xff] %v3344_v51  ;;  %v772_v60 = vmul.f32 %v3344_v51, %v3344_v51 }
 0x14e   : > { %4562 = vst [vmem:[#allocation19_spill] sm:$0xff] %v3349_v55  ;;  %v683_v30 = vadd.f32 %v3349_v55, %v3344_v51  ;;  %681 = vadd.xlane.f32.xlu0 %v680_v57  ;;  %v773_v62 = vmul.f32 %v3349_v55, %v3349_v55  ;;  %v816_v0 = vadd.f32 %v771_v58, %v770_v54 }
 0x150   : > { %684 = vadd.xlane.f32.xlu1 %v683_v30  ;;  %v819_v31 = vadd.f32 %v773_v62, %v772_v60 }
 0x152   : > { %817 = vadd.xlane.f32.xlu0 %v816_v0 }
 0x154   : > { %820 = vadd.xlane.f32.xlu1 %v819_v31 }
 0x1a3   : > { %v640_v2 = vpop.xlane.xlu0 %639 }
 0x1a5   : > { %v776_v6 = vpop.xlane.xlu1 %775 }
 0x1a7   : > { %v643_v7 = vpop.xlane.xlu0 %642 }
 0x1a8   : > { %v686_v9 = vadd.f32 %v643_v7, %v640_v2 }
 0x1a9   : > { %v779_v10 = vpop.xlane.xlu1 %778 }
 0x1aa   : > { %v687_v11 = vrot.slane %v686_v9, 4  ;;  %v822_v12 = vadd.f32 %v779_v10, %v776_v6 }
 0x1ab   : > { %v646_v13 = vpop.xlane.xlu0 %645 }
 0x1ac   : > { %v688_v14 = vadd.f32 %v687_v11, %v686_v9  ;;  %v823_v16 = vrot.slane %v822_v12, 4 }
 0x1ad   : > { %v649_v20 = vpop.xlane.xlu1 %648 }
 0x1ae   : > { %v689_v23 = vrot.slane %v688_v14, 2  ;;  %v824_v25 = vadd.f32 %v823_v16, %v822_v12  ;;  %v693_v27 = vadd.f32 %v649_v20, %v646_v13 }
 0x1af   : > { %v782_v28 = vpop.xlane.xlu0 %781 }
 0x1b0   : > { %v690_v29 = vadd.f32 %v689_v23, %v688_v14  ;;  %v825_v32 = vrot.slane %v824_v25, 2  ;;  %v694_v34 = vrot.slane %v693_v27, 4 }
 0x1b1   : > { %v785_v36 = vpop.xlane.xlu1 %784 }
 0x1b2   : > { %v691_v39 = vrot.slane %v690_v29, 1  ;;  %v826_v42 = vadd.f32 %v825_v32, %v824_v25  ;;  %v695_v45 = vadd.f32 %v694_v34, %v693_v27  ;;  %v829_v49 = vadd.f32 %v785_v36, %v782_v28 }
 0x1b3   : > { %v652_v52 = vpop.xlane.xlu0 %651 }
 0x1b4   : > { %v692_v54 = vadd.f32 %v691_v39, %v690_v29  ;;  %v827_v57 = vrot.slane %v826_v42, 1  ;;  %v696_v58 = vrot.slane %v695_v45, 2  ;;  %v830_v60 = vrot.slane %v829_v49, 4 }
 0x1b5   : > { %v655_v30 = vpop.xlane.xlu1 %654 }
 0x1b6   : > { %v3361_v62 = vmul.f32 0.00024414063, %v692_v54  ;;  %v828_v0 = vadd.f32 %v827_v57, %v826_v42  ;;  %v697_v31 = vadd.f32 %v696_v58, %v695_v45  ;;  %v831_v2 = vadd.f32 %v830_v60, %v829_v49 }
 0x1b7   : > { %v700_v6 = vadd.f32 %v655_v30, %v652_v52  ;;  %v788_v7 = vpop.xlane.xlu0 %787 }
 0x1b8   : > { %v886_v9 = vmul.f32 0.00024414063, %v828_v0  ;;  %v894_v10 = vmul.f32 %v3361_v62, %v3361_v62  ;;  %v698_v11 = vrot.slane %v697_v31, 1  ;;  %v832_v12 = vrot.slane %v831_v2, 2 }
 0x1b9   : > { %v701_v13 = vrot.slane %v700_v6, 4  ;;  %v791_v14 = vpop.xlane.xlu1 %790 }
 0x1ba   : > { %v902_v16 = vsub.f32 %v886_v9, %v894_v10  ;;  %v699_v20 = vadd.f32 %v698_v11, %v697_v31  ;;  %v833_v23 = vadd.f32 %v832_v12, %v831_v2  ;;  %v836_v25 = vadd.f32 %v791_v14, %v788_v7 }
 0x1bb   : > { %v702_v27 = vadd.f32 %v701_v13, %v700_v6  ;;  %v658_v28 = vpop.xlane.xlu0 %657 }
 0x1bc   : > { %v910_v29 = vmax.f32 %v902_v16, 0.0  ;;  %v3365_v32 = vmul.f32 0.00024414063, %v699_v20  ;;  %v834_v34 = vrot.slane %v833_v23, 1  ;;  %v837_v36 = vrot.slane %v836_v25, 4 }
 0x1bd   : > { %v703_v39 = vrot.slane %v702_v27, 2  ;;  %v661_v42 = vpop.xlane.xlu1 %660 }
 0x1be   : > { %v918_v45 = vadd.f32 1e-05, %v910_v29  ;;  %v835_v49 = vadd.f32 %v834_v34, %v833_v23  ;;  %v838_v52 = vadd.f32 %v837_v36, %v836_v25  ;;  %v707_v57 = vadd.f32 %v661_v42, %v658_v28 }
 0x1bf   : > { %v704_v54 = vadd.f32 %v703_v39, %v702_v27  ;;  %v794_v58 = vpop.xlane.xlu0 %793  ;;  %v895_v30 = vmul.f32 %v3365_v32, %v3365_v32 }
 0x1c0   : > { %2736 = vrsqrt.f32 %v918_v45  ;;  %v887_v60 = vmul.f32 0.00024414063, %v835_v49  ;;  %v839_v0 = vrot.slane %v838_v52, 2  ;;  %v708_v2 = vrot.slane %v707_v57, 4 }
 0x1c1   : > { %v705_v31 = vrot.slane %v704_v54, 1  ;;  %v797_v6 = vpop.xlane.xlu1 %796 }
 0x1c2   : > { %v903_v7 = vsub.f32 %v887_v60, %v895_v30  ;;  %v840_v9 = vadd.f32 %v839_v0, %v838_v52  ;;  %v843_v10 = vadd.f32 %v797_v6, %v794_v58  ;;  %v709_v12 = vadd.f32 %v708_v2, %v707_v57  ;;  %v935_v57 = vld [vmem:[%s3375_s20 + $0x8] sm:$0xff]  ;;  %v934_v58 = vld [vmem:[%s3375_s20] sm:$0xff] }
 0x1c3   : > { %v706_v11 = vadd.f32 %v705_v31, %v704_v54  ;;  %v664_v13 = vpop.xlane.xlu0 %663 }
 0x1c4   : > { %v911_v14 = vmax.f32 %v903_v7, 0.0  ;;  %v841_v16 = vrot.slane %v840_v9, 1  ;;  %v844_v20 = vrot.slane %v843_v10, 4  ;;  %v710_v25 = vrot.slane %v709_v12, 2 }
 0x1c5   : > { %v3370_v23 = vmul.f32 0.00024414063, %v706_v11  ;;  %v667_v27 = vpop.xlane.xlu1 %666 }
 0x1c6   : > { %v919_v28 = vadd.f32 1e-05, %v911_v14  ;;  %v842_v29 = vadd.f32 %v841_v16, %v840_v9  ;;  %v845_v34 = vadd.f32 %v844_v20, %v843_v10  ;;  %v714_v36 = vadd.f32 %v667_v27, %v664_v13 }
 0x1c7   : > { %v896_v39 = vmul.f32 %v3370_v23, %v3370_v23  ;;  %v711_v42 = vadd.f32 %v710_v25, %v709_v12  ;;  %v800_v45 = vpop.xlane.xlu0 %799  ;;  %v950_v25 = vld [vmem:[%s3384_s23] sm:$0xff] }
 0x1c8   : > { %v888_v49 = vmul.f32 0.00024414063, %v842_v29  ;;  %v846_v52 = vrot.slane %v845_v34, 2  ;;  %v715_v54 = vrot.slane %v714_v36, 4  ;;  %2738 = vrsqrt.f32 %v919_v28 }
 0x1c9   : > { %v712_v60 = vrot.slane %v711_v42, 1  ;;  %v803_v30 = vpop.xlane.xlu1 %802 }
 0x1ca   : > { %v2737_v0 = vpop.eup %2736  ;;  %v904_v31 = vsub.f32 %v888_v49, %v896_v39  ;;  %v847_v2 = vadd.f32 %v846_v52, %v845_v34  ;;  %v716_v6 = vadd.f32 %v715_v54, %v714_v36  ;;  %v850_v7 = vadd.f32 %v803_v30, %v800_v45 }
 0x1cb   : > { %v713_v9 = vadd.f32 %v712_v60, %v711_v42  ;;  %v967_v10 = vmul.f32 %v2737_v0, %v935_v57  ;;  %v966_v11 = vmul.f32 %v2737_v0, %v934_v58  ;;  %v670_v12 = vpop.xlane.xlu0 %669  ;;  %v951_v0 = vld [vmem:[%s3384_s23 + $0x8] sm:$0xff] }
 0x1cc   : > { %v912_v13 = vmax.f32 %v904_v31, 0.0  ;;  %v848_v14 = vrot.slane %v847_v2, 1  ;;  %v717_v16 = vrot.slane %v716_v6, 2  ;;  %v851_v20 = vrot.slane %v850_v7, 4 }
 0x1cd   : > { %v3387_v27 = vmul.f32 0.00024414063, %v713_v9  ;;  %v673_v28 = vpop.xlane.xlu1 %672  ;;  %1021 = vperm.xlu1 %2687, %v967_v10   ;;  %1016 = vperm.xlu0 %2686, %v966_v11   ;;  %v982_v29 = vmul.f32 %v966_v11, %v3361_v62  ;;  %v983_v57 = vmul.f32 %v967_v10, %v3361_v62 }
 0x1ce   : > { %v920_v34 = vadd.f32 1e-05, %v912_v13  ;;  %v849_v36 = vadd.f32 %v848_v14, %v847_v2  ;;  %v718_v39 = vadd.f32 %v717_v16, %v716_v6  ;;  %v852_v42 = vadd.f32 %v851_v20, %v850_v7 }
 0x1cf   : > { %v897_v45 = vmul.f32 %v3387_v27, %v3387_v27  ;;  %v721_v49 = vadd.f32 %v673_v28, %v670_v12  ;;  %v998_v52 = vsub.f32 %v950_v25, %v982_v29  ;;  %v806_v54 = vpop.xlane.xlu0 %805  ;;  %v999_v14 = vsub.f32 %v951_v0, %v983_v57  ;;  %v936_v28 = vld [vmem:[%s3375_s20 + $0x10] sm:$0xff]  ;;  %v939_v0 = vld [vmem:[%s3375_s20 + $0x28] sm:$0xff] }
 0x1d0   : > { %2740 = vrsqrt.f32 %v920_v34  ;;  %v889_v58 = vmul.f32 0.00024414063, %v849_v36  ;;  %v719_v60 = vrot.slane %v718_v39, 1  ;;  %v853_v30 = vrot.slane %v852_v42, 2 }
 0x1d1   : > { %v722_v31 = vrot.slane %v721_v49, 4  ;;  %v809_v9 = vpop.xlane.xlu1 %808  ;;  %1128 = vperm.xlu1 %2687, %v998_v52   ;;  %v937_v52 = vld [vmem:[%s3375_s20 + $0x18] sm:$0xff] }
 0x1d2   : > { %v905_v2 = vsub.f32 %v889_v58, %v897_v45  ;;  %v720_v6 = vadd.f32 %v719_v60, %v718_v39  ;;  %v854_v7 = vadd.f32 %v853_v30, %v852_v42  ;;  %v857_v11 = vadd.f32 %v809_v9, %v806_v54  ;;  %v2739_v13 = vpop.eup %2738 }
 0x1d3   : > { %v723_v12 = vadd.f32 %v722_v31, %v721_v49  ;;  %v676_v16 = vpop.xlane.xlu0 %675  ;;  %v968_v57 = vmul.f32 %v2739_v13, %v936_v28 }
 0x1d4   : > { %v913_v20 = vmax.f32 %v905_v2, 0.0  ;;  %v3394_v62 = vmul.f32 0.00024414063, %v720_v6  ;;  %v855_v10 = vrot.slane %v854_v7, 1  ;;  %v858_v25 = vrot.slane %v857_v11, 4 }
 0x1d5   : > { %v724_v29 = vrot.slane %v723_v12, 2  ;;  %v679_v34 = vpop.xlane.xlu1 %678  ;;  %1133 = vperm.xlu1 %2687, %v999_v14   ;;  %v969_v6 = vmul.f32 %v2739_v13, %v937_v52  ;;  %v984_v28 = vmul.f32 %v968_v57, %v3365_v32 }
 0x1d6   : > { %v921_v36 = vadd.f32 1e-05, %v913_v20  ;;  %v898_v39 = vmul.f32 %v3394_v62, %v3394_v62  ;;  %v856_v42 = vadd.f32 %v855_v10, %v854_v7  ;;  %v859_v45 = vadd.f32 %v858_v25, %v857_v11 }
 0x1d7   : > { %v725_v49 = vadd.f32 %v724_v29, %v723_v12  ;;  %v728_v54 = vadd.f32 %v679_v34, %v676_v16  ;;  %v812_v58 = vpop.xlane.xlu0 %811 }
 0x1d8   : > { %2742 = vrsqrt.f32 %v921_v36  ;;  %v890_v60 = vmul.f32 0.00024414063, %v856_v42  ;;  %v860_v30 = vrot.slane %v859_v45, 2  ;;  %v952_v42 = vld [vmem:[%s3384_s23 + $0x10] sm:$0xff] }
 0x1d9   : > { %v726_v31 = vrot.slane %v725_v49, 1  ;;  %v729_v9 = vrot.slane %v728_v54, 4  ;;  %v815_v2 = vpop.xlane.xlu1 %814  ;;  %1026 = vperm.xlu1 %2687, %v968_v57  }
 0x1da   : > { %v2741_v14 = vpop.eup %2740  ;;  %v906_v20 = vsub.f32 %v890_v60, %v898_v39  ;;  %v861_v7 = vadd.f32 %v860_v30, %v859_v45  ;;  %v864_v11 = vadd.f32 %v815_v2, %v812_v58  ;;  %v985_v39 = vmul.f32 %v969_v6, %v3365_v32 }
 0x1db   : > { %v727_v10 = vadd.f32 %v726_v31, %v725_v49  ;;  %v730_v12 = vadd.f32 %v729_v9, %v728_v54  ;;  %v971_v16 = vmul.f32 %v2741_v14, %v939_v0  ;;  %v682_v25 = vpop.xlane.xlu0 %681  ;;  %v1000_v60 = vsub.f32 %v952_v42, %v984_v28 }
 0x1dc   : > { %v914_v29 = vmax.f32 %v906_v20, 0.0  ;;  %v862_v34 = vrot.slane %v861_v7, 1  ;;  %v865_v36 = vrot.slane %v864_v11, 4  ;;  %v953_v20 = vld [vmem:[%s3384_s23 + $0x18] sm:$0xff] }
 0x1dd   : > { %v3404_v44 = vmul.f32 0.00024414063, %v727_v10  ;;  %v731_v18 = vrot.slane %v730_v12, 2  ;;  %v685_v15 = vpop.xlane.xlu1 %684  ;;  %1031 = vperm.xlu1 %2687, %v969_v6   ;;  %1041 = vperm.xlu0 %2686, %v971_v16   ;;  %v987_v13 = vmul.f32 %v971_v16, %v3370_v23  ;;  %v941_v10 = vld [vmem:[%s3375_s20 + $0x38] sm:$0xff]  ;;  %v938_v16 = vld [vmem:[%s3375_s20 + $0x20] sm:$0xff] }
 0x1de   : > { %v922_v45 = vadd.f32 1e-05, %v914_v29  ;;  %v863_v52 = vadd.f32 %v862_v34, %v861_v7  ;;  %v866_v49 = vadd.f32 %v865_v36, %v864_v11  ;;  %v735_v54 = vadd.f32 %v685_v15, %v682_v25 }
 0x1df   : > { %v899_v57 = vmul.f32 %v3404_v44, %v3404_v44  ;;  %v732_v58 = vadd.f32 %v731_v18, %v730_v12  ;;  %v1003_v30 = vsub.f32 %v955_v47, %v987_v13  ;;  %v818_v0 = vpop.xlane.xlu0 %817  ;;  %v1001_v47 = vsub.f32 %v953_v20, %v985_v39  ;;  %v943_v20 = vld [vmem:[%s3375_s20 + $0x48] sm:$0xff] }
 0x1e0   : > { %2744 = vrsqrt.f32 %v922_v45  ;;  %v891_v31 = vmul.f32 0.00024414063, %v863_v52  ;;  %v867_v9 = vrot.slane %v866_v49, 2  ;;  %v736_v2 = vrot.slane %v735_v54, 4  ;;  %v957_v45 = vld [vmem:[%s3384_s23 + $0x38] sm:$0xff] }
 0x1e1   : > { %v733_v32 = vrot.slane %v732_v58, 1  ;;  %v821_v6 = vpop.xlane.xlu1 %820  ;;  %1138 = vperm.xlu1 %2687, %v1000_v60   ;;  %1153 = vperm.xlu0 %2686, %v1003_v30   ;;  %v970_v29 = vmul.f32 %v2741_v14, %v938_v16 }
 0x1e2   : > { %v2743_v15 = vpop.eup %2742  ;;  %v907_v7 = vsub.f32 %v891_v31, %v899_v57  ;;  %v868_v11 = vadd.f32 %v867_v9, %v866_v49  ;;  %v737_v25 = vadd.f32 %v736_v2, %v735_v54  ;;  %v871_v18 = vadd.f32 %v821_v6, %v818_v0  ;;  %v954_v2 = vld [vmem:[%s3384_s23 + $0x20] sm:$0xff] }
 0x1e3   : > { %v734_v12 = vadd.f32 %v733_v32, %v732_v58  ;;  %v973_v28 = vmul.f32 %v2743_v15, %v941_v10  ;;  %v986_v30 = vmul.f32 %v970_v29, %v3370_v23  ;;  %v940_v10 = vld [vmem:[%s3375_s20 + $0x30] sm:$0xff] }
 0x1e4   : > { %v915_v34 = vmax.f32 %v907_v7, 0.0  ;;  %v869_v36 = vrot.slane %v868_v11, 1  ;;  %v738_v42 = vrot.slane %v737_v25, 2  ;;  %v872_v13 = vrot.slane %v871_v18, 4 }
 0x1e5   : > { %v3414_v52 = vmul.f32 0.00024414063, %v734_v12  ;;  %1143 = vperm.xlu1 %2687, %v1001_v47   ;;  %1051 = vperm.xlu0 %2686, %v973_v28   ;;  %v989_v49 = vmul.f32 %v973_v28, %v3387_v27  ;;  %v959_v28 = vld [vmem:[%s3384_s23 + $0x48] sm:$0xff] }
 0x1e6   : > { %v923_v54 = vadd.f32 1e-05, %v915_v34  ;;  %v870_v57 = vadd.f32 %v869_v36, %v868_v11  ;;  %v739_v58 = vadd.f32 %v738_v42, %v737_v25  ;;  %v873_v39 = vadd.f32 %v872_v13, %v871_v18 }
 0x1e7   : > { %v900_v14 = vmul.f32 %v3414_v52, %v3414_v52  ;;  %v1005_v60 = vsub.f32 %v957_v45, %v989_v49  ;;  %v1002_v11 = vsub.f32 %v954_v2, %v986_v30  ;;  %v972_v18 = vmul.f32 %v2743_v15, %v940_v10  ;;  %v956_v49 = vld [vmem:[%s3384_s23 + $0x30] sm:$0xff]  ;;  %v958_v10 = vld [vmem:[%s3384_s23 + $0x40] sm:$0xff] }
 0x1e8   : > { %2746 = vrsqrt.f32 %v923_v54  ;;  %v892_v0 = vmul.f32 0.00024414063, %v870_v57  ;;  %v740_v31 = vrot.slane %v739_v58, 1  ;;  %v874_v9 = vrot.slane %v873_v39, 2  ;;  %v945_v54 = vld [vmem:[%s3375_s20 + $0x58] sm:$0xff]  ;;  %v942_v57 = vld [vmem:[%s3375_s20 + $0x40] sm:$0xff] }
 0x1e9   : > { %1036 = vperm.xlu1 %2687, %v970_v29   ;;  %1163 = vperm.xlu0 %2686, %v1005_v60   ;;  %v988_v15 = vmul.f32 %v972_v18, %v3387_v27 }
 0x1ea   : > { %v2745_v16 = vpop.eup %2744  ;;  %v908_v32 = vsub.f32 %v892_v0, %v900_v14  ;;  %v741_v6 = vadd.f32 %v740_v31, %v739_v58  ;;  %v875_v7 = vadd.f32 %v874_v9, %v873_v39  ;;  %v961_v31 = vld [vmem:[%s3384_s23 + $0x58] sm:$0xff] }
 0x1eb   : > { %v975_v25 = vmul.f32 %v2745_v16, %v943_v20  ;;  %v1004_v14 = vsub.f32 %v956_v49, %v988_v15  ;;  %v974_v30 = vmul.f32 %v2745_v16, %v942_v57  ;;  %v964_v57 = vld [vmem:[%s3384_s23 + $0x70] sm:$0xff] }
 0x1ec   : > { %v916_v23 = vmax.f32 %v908_v32, 0.0  ;;  %v3423_v12 = vmul.f32 0.00024414063, %v741_v6  ;;  %v876_v47 = vrot.slane %v875_v7, 1  ;;  %v947_v32 = vld [vmem:[%s3375_s20 + $0x68] sm:$0xff]  ;;  %v944_v6 = vld [vmem:[%s3375_s20 + $0x50] sm:$0xff] }
 0x1ed   : > { %1148 = vperm.xlu1 %2687, %v1002_v11   ;;  %1061 = vperm.xlu0 %2686, %v975_v25   ;;  %v991_v29 = vmul.f32 %v975_v25, %v3394_v62  ;;  %v990_v20 = vmul.f32 %v974_v30, %v3394_v62 }
 0x1ee   : > { %v924_v34 = vadd.f32 1e-05, %v916_v23  ;;  %v901_v36 = vmul.f32 %v3423_v12, %v3423_v12  ;;  %v877_v42 = vadd.f32 %v876_v47, %v875_v7  ;;  %v960_v47 = vld [vmem:[%s3384_s23 + $0x50] sm:$0xff] }
 0x1ef   : > { %v1007_v13 = vsub.f32 %v959_v28, %v991_v29  ;;  %v1006_v7 = vsub.f32 %v958_v10, %v990_v20  ;;  %v949_v29 = vld [vmem:[%s3375_s20 + $0x78] sm:$0xff] }
 0x1f0   : > { %2748 = vrsqrt.f32 %v924_v34  ;;  %v893_v45 = vmul.f32 0.00024414063, %v877_v42  ;;  %v946_v34 = vld [vmem:[%s3375_s20 + $0x60] sm:$0xff]  ;;  %v2726_v20 = vld [vmem:[%s4488_s5 + $0x58] sm:$0xff]  }
 0x1f1   : > { %1046 = vperm.xlu1 %2687, %v972_v18   ;;  %1173 = vperm.xlu0 %2686, %v1007_v13   ;;  %v963_v18 = vld [vmem:[%s3384_s23 + $0x68] sm:$0xff]  ;;  %v2727_v10 = vld [vmem:[%s4488_s5 + $0x18] sm:$0xff]  }
 0x1f2   : > { %v2747_v58 = vpop.eup %2746  ;;  %v909_v39 = vsub.f32 %v893_v45, %v901_v36  ;;  %v948_v36 = vld [vmem:[%s3375_s20 + $0x70] sm:$0xff] }
 0x1f3   : > { %v977_v60 = vmul.f32 %v2747_v58, %v945_v54  ;;  %v976_v25 = vmul.f32 %v2747_v58, %v944_v6  ;;  %v965_v54 = vld [vmem:[%s3384_s23 + $0x78] sm:$0xff]  ;;  %v2729_v6 = vld [vmem:[%s4488_s5 + $0x20] sm:$0xff]  }
 0x1f4   : > { %v917_v0 = vmax.f32 %v909_v39, 0.0 }
 0x1f5   : > { %1158 = vperm.xlu1 %2687, %v1004_v14   ;;  %1071 = vperm.xlu0 %2686, %v977_v60   ;;  %v993_v27 = vmul.f32 %v977_v60, %v3404_v44  ;;  %v992_v28 = vmul.f32 %v976_v25, %v3404_v44 }
 0x1f6   : > { %v925_v9 = vadd.f32 1e-05, %v917_v0 }
 0x1f7   : > { %v1009_v2 = vsub.f32 %v961_v31, %v993_v27  ;;  %v1008_v13 = vsub.f32 %v960_v47, %v992_v28  ;;  %v2720_v31 = vld [vmem:[%s4488_s5 + $0x40] sm:$0xff]   ;;  %v2730_v28 = vld [vmem:[%s4488_s5 + $0x68] sm:$0xff]  }
 0x1f8   : > { %2750 = vrsqrt.f32 %v925_v9  ;;  %v2721_v27 = vld [vmem:[%s4488_s5] sm:$0xff]   ;;  %2548 = vmatprep.subr.bf16.mxu1 %v2720_v31  ;;  %v2724_v9 = vld [vmem:[%s4488_s5 + $0x50] sm:$0xff]  }
 0x1f9   : > { %1056 = vperm.xlu1 %2687, %v974_v30   ;;  %1183 = vperm.xlu0 %2686, %v1009_v2   ;;  %v962_v30 = vld [vmem:[%s3384_s23 + $0x60] sm:$0xff]  ;;  %v2725_v2 = vld [vmem:[%s4488_s5 + $0x10] sm:$0xff]   ;;  %s2379_s23 = sadd.s32 %s2544_s17, %s3095_s22  ;;  %s4431_s22 = scalar_lea.sflag [#allocation3], %s326_s18 }
 0x1fa   : > { %v2749_v16 = vpop.eup %2748  ;;  %2549 = vmatpush3.bf16.msra.mxu1 %v2721_v27  ;;  %s2545_s10 = sshll.u32 %s2379_s23, 7 }
 0x1fb   : > { %v979_v11 = vmul.f32 %v2749_v16, %v947_v32  ;;  %v978_v45 = vmul.f32 %v2749_v16, %v946_v34  ;;  %v2728_v32 = vld [vmem:[%s4488_s5 + $0x60] sm:$0xff]   ;;  %s4421_s30 = scalar_lea.hbm %s4490_s7, %s2545_s10 }
 0x1fd   : > { %1168 = vperm.xlu1 %2687, %v1006_v7   ;;  %1081 = vperm.xlu0 %2686, %v979_v11   ;;  %v995_v62 = vmul.f32 %v979_v11, %v3414_v52  ;;  %v994_v14 = vmul.f32 %v978_v45, %v3414_v52  ;;  %v2722_v52 = vld [vmem:[%s4488_s5 + $0x48] sm:$0xff]  }
 0x1fe   : > { %2550 = vmatprep.subr.bf16.mxu1 %v2722_v52 }
 0x1ff   : > { %v1011_v23 = vsub.f32 %v963_v18, %v995_v62  ;;  %v1010_v0 = vsub.f32 %v962_v30, %v994_v14  ;;  %v2732_v30 = vld [vmem:[%s4488_s5 + $0x70] sm:$0xff]  }
 0x201   : > { %1066 = vperm.xlu1 %2687, %v976_v25   ;;  %1193 = vperm.xlu0 %2686, %v1011_v23  }
 0x202   : > { %v2751_v42 = vpop.eup %2750 }
 0x203   : > { %v981_v15 = vmul.f32 %v2751_v42, %v949_v29  ;;  %v980_v49 = vmul.f32 %v2751_v42, %v948_v36 }
 0x205   : > { %1178 = vperm.xlu1 %2687, %v1008_v13   ;;  %1091 = vperm.xlu0 %2686, %v981_v15   ;;  %v997_v58 = vmul.f32 %v981_v15, %v3423_v12  ;;  %v996_v39 = vmul.f32 %v980_v49, %v3423_v12  ;;  %v2723_v12 = vld [vmem:[%s4488_s5 + $0x8] sm:$0xff]  }
 0x206   : > { %2551 = vmatpush3.bf16.msra.mxu1 %v2723_v12 }
 0x207   : > { %v1013_v44 = vsub.f32 %v965_v54, %v997_v58  ;;  %v1012_v60 = vsub.f32 %v964_v57, %v996_v39  ;;  %2552 = vmatprep.subr.bf16.mxu1 %v2724_v9 }
 0x209   : > { %1076 = vperm.xlu1 %2687, %v978_v45   ;;  %1203 = vperm.xlu0 %2686, %v1013_v44  }
 0x20a   : > { %2553 = vmatpush3.bf16.msra.mxu1 %v2725_v2 }
 0x20b   : > { %2554 = vmatprep.subr.bf16.mxu1 %v2726_v20 }
 0x20d   : > { %1188 = vperm.xlu1 %2687, %v1010_v0  }
 0x20e   : > { %2555 = vmatpush3.bf16.msra.mxu1 %v2727_v10 }
 0x20f   : > { %2556 = vmatprep.subr.bf16.mxu1 %v2728_v32  ;;  %v2734_v32 = vld [vmem:[%s4488_s5 + $0x78] sm:$0xff]  }
 0x211   : > { %1086 = vperm.xlu1 %2687, %v980_v49  }
 0x212   : > { %2557 = vmatpush3.bf16.msra.mxu1 %v2729_v6  ;;  %v2735_v6 = vld [vmem:[%s4488_s5 + $0x38] sm:$0xff]  }
 0x213   : > { %2558 = vmatprep.subr.bf16.mxu1 %v2730_v28 }
 0x215   : > { %1198 = vperm.xlu1 %2687, %v1012_v60  }
 0x24c   : > { %v1022_v16 = vpop.permute.xlu1 %1021  ;;  %v1017_v7 = vpop.permute.xlu0 %1016 }
 0x24d   : > { %v1094_v25 = vmul.f32 %v1017_v7, %v3170_v33  ;;  %v1096_v62 = vmul.f32 %v1022_v16, %v3176_v37  ;;  %v2731_v33 = vld [vmem:[%s4488_s5 + $0x28] sm:$0xff]  }
 0x24e   : > { %2559 = vmatpush3.bf16.msra.mxu1 %v2731_v33 }
 0x24f   : > { %2560 = vmatprep.subr.bf16.mxu1 %v2732_v30 }
 0x250   : > { %v1129_v11 = vpop.permute.xlu1 %1128 }
 0x251   : > { %v3483_v18 = vadd.f32 %v1129_v11, %v1094_v25  ;;  %v1095_v25 = vmul.f32 %v1017_v7, %v3173_v35 }
 0x253   : > { %v3492_v29 = vmul.f32 0.70710677, %v3483_v18 }
 0x254   : > { %v1134_v23 = vpop.permute.xlu1 %1133 }
 0x255   : > { %v3486_v47 = vadd.f32 %v1134_v23, %v1096_v62  ;;  %v3501_v37 = vand.u32 2147483647, %v3492_v29  ;;  %vm1942_vm0 = vcmp.lt.f32.partialorder %v3492_v29, 0.0 }
 0x257   : > { %v3495_v36 = vmul.f32 0.70710677, %v3486_v47  ;;  %v1334_v45 = vmul.f32 0.3275911, %v3501_v37 }
 0x258   : > { %v1027_v34 = vpop.permute.xlu1 %1026 }
 0x259   : > { %v3504_v15 = vand.u32 2147483647, %v3495_v36  ;;  %v1098_v49 = vmul.f32 %v1027_v34, %v3194_v48  ;;  %v1099_v54 = vmul.f32 %v1027_v34, %v3197_v50  ;;  %v1366_v0 = vadd.f32 1.0, %v1334_v45  ;;  %v2733_v50 = vld [vmem:[%s4488_s5 + $0x30] sm:$0xff]  }
 0x25a   : > { %2561 = vmatpush3.bf16.msra.mxu1 %v2733_v50  ;;  %vm1944_vm1 = vcmp.lt.f32.partialorder %v3495_v36, 0.0 }
 0x25b   : > { %v1336_v58 = vmul.f32 0.3275911, %v3504_v15  ;;  %2752 = vrcp.f32 %v1366_v0  ;;  %2562 = vmatprep.subr.bf16.mxu1 %v2734_v32 }
 0x25c   : > { %v1032_v42 = vpop.permute.xlu1 %1031  ;;  %v1042_v13 = vpop.permute.xlu0 %1041 }
 0x25d   : > { %v1104_v60 = vmul.f32 %v1042_v13, %v3224_v5  ;;  %v1105_v31 = vmul.f32 %v1042_v13, %v3229_v8  ;;  %v1368_v5 = vadd.f32 1.0, %v1336_v58  ;;  %v1207_v13 = vadd.f32 %v1129_v11, %v1095_v25 }
 0x25e   : > { %2563 = vmatpush3.bf16.msra.mxu1 %v2735_v6  ;;  %v1100_v30 = vmul.f32 %v1032_v42, %v3200_v53  ;;  %v1101_v0 = vmul.f32 %v1032_v42, %v3205_v56 }
 0x25f   : > { %2754 = vrcp.f32 %v1368_v5  ;;  %v3564_v7 = vmul.f32 0.70710677, %v1207_v13  ;;  %v3608_v55 = vmul.f32 0.5, %v1207_v13 }
 0x260   : > { %v1139_v57 = vpop.permute.xlu1 %1138  ;;  %v1154_v14 = vpop.permute.xlu0 %1153 }
 0x261   : > { %v3510_v39 = vadd.f32 %v1139_v57, %v1098_v49  ;;  %v3512_v44 = vadd.f32 %v1139_v57, %v1099_v54  ;;  %v3528_v52 = vadd.f32 %v1154_v14, %v1104_v60  ;;  %v3533_v9 = vadd.f32 %v1154_v14, %v1105_v31  ;;  %4563 = vst [vmem:[#allocation20_spill] sm:$0xff] %v3564_v7 }
 0x262   : > { %v1097_v57 = vmul.f32 %v1022_v16, %v3181_v40  ;;  %v1303_v16 = vand.u32 2147483647, %v3564_v7  ;;  %4567 = vst [vmem:[#allocation24_spill] sm:$0xff] %v3608_v55 }
 0x263   : > { %v3520_v48 = vmul.f32 0.70710677, %v3510_v39  ;;  %v3526_v27 = vmul.f32 0.70710677, %v3512_v44  ;;  %v3539_v2 = vmul.f32 0.70710677, %v3528_v52 }
 0x264   : > { %v3543_v10 = vmul.f32 0.70710677, %v3533_v9  ;;  %v1144_v58 = vpop.permute.xlu1 %1143  ;;  %v3568_v60 = vadd.f32 %v1134_v23, %v1097_v57  ;;  %v1750_v23 = vsub.f32 0.0, %v3501_v37  ;;  %v1335_v42 = vmul.f32 0.3275911, %v1303_v16 }
 0x265   : > { %v3531_v12 = vand.u32 2147483647, %v3520_v48  ;;  %v3536_v8 = vand.u32 2147483647, %v3526_v27  ;;  %v3554_v28 = vand.u32 2147483647, %v3539_v2  ;;  %v3560_v54 = vpop.eup %2752  ;;  %v3573_v40 = vadd.f32 %v1144_v58, %v1100_v30 }
 0x266   : > { %v3557_v33 = vand.u32 2147483647, %v3543_v10  ;;  %v1462_v11 = vmul.f32 1.0614054, %v3560_v54  ;;  %v3581_v53 = vmul.f32 0.70710677, %v3568_v60 }
 0x267   : > { %v1338_v20 = vmul.f32 0.3275911, %v3531_v12  ;;  %v1339_v62 = vmul.f32 0.3275911, %v3536_v8  ;;  %v1344_v49 = vmul.f32 0.3275911, %v3554_v28 }
 0x268   : > { %v1345_v35 = vmul.f32 0.3275911, %v3557_v33  ;;  %v1494_v32 = vadd.f32 -1.4531521, %v1462_v11  ;;  %4564 = vst [vmem:[#allocation21_spill] sm:$0xff] %v3581_v53  ;;  %v1367_v11 = vadd.f32 1.0, %v1335_v42 }
 0x269   : > { %v1370_v34 = vadd.f32 1.0, %v1338_v20  ;;  %v1371_v45 = vadd.f32 1.0, %v1339_v62  ;;  %v3566_v14 = vpop.eup %2754  ;;  %v1376_v31 = vadd.f32 1.0, %v1344_v49  ;;  %v3577_v20 = vadd.f32 %v1144_v58, %v1101_v0  ;;  %v1052_v62 = vpop.permute.xlu0 %1051 }
 0x26a   : > { %v1377_v50 = vadd.f32 1.0, %v1345_v35  ;;  %v1464_v5 = vmul.f32 1.0614054, %v3566_v14  ;;  %v3584_v56 = vmul.f32 0.70710677, %v3573_v40  ;;  %v1782_v49 = vmul.f32 %v1750_v23, %v3501_v37 }
 0x26b   : > { %2756 = vrcp.f32 %v1370_v34  ;;  %v3587_v25 = vmul.f32 0.70710677, %v3577_v20  ;;  %v1526_v57 = vmul.f32 %v3560_v54, %v1494_v32  ;;  %v1305_v35 = vand.u32 2147483647, %v3581_v53 }
 0x26c   : > { %2758 = vrcp.f32 %v1371_v45  ;;  %4565 = vst [vmem:[#allocation22_spill] sm:$0xff] %v3584_v56  ;;  %v1496_v6 = vadd.f32 -1.4531521, %v1464_v5  ;;  %v1751_v45 = vsub.f32 0.0, %v1303_v16  ;;  %v3595_v58 = vand.u32 2147483647, %v3584_v56 }
 0x26d   : > { %2760 = vrcp.f32 %v1376_v31  ;;  %4566 = vst [vmem:[#allocation23_spill] sm:$0xff] %v3587_v25  ;;  %v1814_v7 = vmul.f32 1.442695, %v1782_v49  ;;  %v3605_v37 = vmul.f32 0.5, %v3483_v18  ;;  %v1558_v23 = vadd.f32 1.4214138, %v1526_v57  ;;  %v1164_v51 = vpop.permute.xlu0 %1163 }
 0x26e   : > { %2762 = vrcp.f32 %v1377_v50  ;;  %v1528_v0 = vmul.f32 %v3566_v14, %v1496_v6  ;;  %v3602_v50 = vand.u32 2147483647, %v3587_v25  ;;  %v1783_v5 = vmul.f32 %v1751_v45, %v1303_v16 }
 0x26f   : > { %v1752_v32 = vsub.f32 0.0, %v3504_v15  ;;  %v1753_v53 = vsub.f32 0.0, %v1305_v35  ;;  %v1340_v6 = vmul.f32 0.3275911, %v3595_v58  ;;  %v1108_v22 = vmul.f32 %v1052_v62, %v3248_v21 }
 0x270   : > { %2764 = vrcp.f32 %v1367_v11  ;;  %v1560_v16 = vadd.f32 1.4214138, %v1528_v0  ;;  %v1341_v18 = vmul.f32 0.3275911, %v3602_v50  ;;  %v1816_v57 = vmul.f32 1.442695, %v1783_v5 }
 0x271   : > { %2766 = vpow2.f32 %v1814_v7  ;;  %v1337_v59 = vmul.f32 0.3275911, %v1305_v35  ;;  %v3618_v13 = vadd.f32 %v1164_v51, %v1108_v22  ;;  %v1590_v55 = vmul.f32 %v3560_v54, %v1558_v23 }
 0x272   : > { %v1784_v26 = vmul.f32 %v1752_v32, %v3504_v15  ;;  %v1785_v41 = vmul.f32 %v1753_v53, %v1305_v35  ;;  %v1754_v21 = vsub.f32 0.0, %v3531_v12  ;;  %v1372_v0 = vadd.f32 1.0, %v1340_v6 }
 0x273   : > { %v1592_v25 = vmul.f32 %v3566_v14, %v1560_v16  ;;  %v1373_v5 = vadd.f32 1.0, %v1341_v18  ;;  %2768 = vpow2.f32 %v1816_v57  ;;  %v1369_v23 = vadd.f32 1.0, %v1337_v59  ;;  %v1037_v59 = vpop.permute.xlu1 %1036 }
 0x274   : > { %v3631_v15 = vmul.f32 0.70710677, %v3618_v13  ;;  %v1818_v53 = vmul.f32 1.442695, %v1784_v26  ;;  %v1820_v35 = vmul.f32 1.442695, %v1785_v41  ;;  %2770 = vrcp.f32 %v1372_v0 }
 0x275   : > { %v3589_v34 = vpop.eup %2756  ;;  %v1755_v32 = vsub.f32 0.0, %v3536_v8  ;;  %v1624_v16 = vadd.f32 -0.28449672, %v1592_v25  ;;  %2772 = vrcp.f32 %v1373_v5  ;;  %v1760_v25 = vsub.f32 0.0, %v3554_v28 }
 0x276   : > { %v3597_v30 = vpop.eup %2758  ;;  %v1466_v31 = vmul.f32 1.0614054, %v3589_v34  ;;  %2774 = vrcp.f32 %v1369_v23  ;;  %v3643_v26 = vand.u32 2147483647, %v3631_v15  ;;  %vm1946_vm2 = vcmp.lt.f32.partialorder %v3520_v48, 0.0 }
 0x277   : > { %v1467_v42 = vmul.f32 1.0614054, %v3597_v30  ;;  %v3613_v61 = vpop.eup %2760  ;;  %2776 = vpow2.f32 %v1818_v53  ;;  %v1656_v0 = vmul.f32 %v3566_v14, %v1624_v16  ;;  %v1102_v16 = vmul.f32 %v1037_v59, %v3218_v1 }
 0x278   : > { %v1498_v45 = vadd.f32 -1.4531521, %v1466_v31  ;;  %v3616_v49 = vpop.eup %2762  ;;  %v1472_v11 = vmul.f32 1.0614054, %v3613_v61  ;;  %v1109_v31 = vmul.f32 %v1052_v62, %v3253_v24  ;;  %v1786_v24 = vmul.f32 %v1754_v21, %v3531_v12 }
 0x279   : > { %v1499_v38 = vadd.f32 -1.4531521, %v1467_v42  ;;  %v1473_v22 = vmul.f32 1.0614054, %v3616_v49  ;;  %v1622_v62 = vadd.f32 -0.28449672, %v1590_v55  ;;  %v1787_v12 = vmul.f32 %v1755_v32, %v3536_v8 }
 0x27a   : > { %v1530_v7 = vmul.f32 %v3589_v34, %v1498_v45  ;;  %v3628_v56 = vadd.f32 %v1164_v51, %v1109_v31  ;;  %v1504_v6 = vadd.f32 -1.4531521, %v1472_v11  ;;  %v3637_v51 = vmul.f32 0.5, %v3486_v47  ;;  %v3645_v55 = vpop.eup %2764 }
 0x27b   : > { %v1531_v42 = vmul.f32 %v3597_v30, %v1499_v38  ;;  %v1505_v18 = vadd.f32 -1.4531521, %v1473_v22  ;;  %4568 = vst [vmem:[#allocation25_spill] sm:$0xff] %v3645_v55  ;;  %v3648_v38 = vmul.f32 0.5, %v3568_v60  ;;  %v2767_v57 = vpop.eup %2766  ;;  %v1654_v47 = vmul.f32 %v3560_v54, %v1622_v62  ;;  %v1149_v62 = vpop.permute.xlu1 %1148 }
 0x27c   : > { %v1562_v45 = vadd.f32 1.4214138, %v1530_v7  ;;  %v3640_v41 = vmul.f32 0.70710677, %v3628_v56  ;;  %2778 = vpow2.f32 %v1820_v35  ;;  %v1536_v11 = vmul.f32 %v3613_v61, %v1504_v6 }
 0x27d   : > { %4569 = vst [vmem:[#allocation26_spill] sm:$0xff] %v3648_v38  ;;  %v1563_v21 = vadd.f32 1.4214138, %v1531_v42  ;;  %v1822_v7 = vmul.f32 1.442695, %v1786_v24  ;;  %v1537_v60 = vmul.f32 %v3616_v49, %v1505_v18  ;;  %v3658_v22 = vmul.f32 0.5, %v3510_v39  ;;  %v3672_v42 = vpop.eup %2768 }
 0x27e   : > { %v1594_v31 = vmul.f32 %v3589_v34, %v1562_v45  ;;  %v3661_v8 = vmul.f32 0.5, %v3512_v44  ;;  %v3664_v5 = vand.u32 2147483647, %v3640_v41  ;;  %v1348_v23 = vmul.f32 0.3275911, %v3643_v26  ;;  %4570 = vst [vmem:[#allocation27_spill] sm:$0xff] %v3672_v42  ;;  %v3676_v38 = vpop.eup %2770 }
 0x27f   : > { %v1824_v53 = vmul.f32 1.442695, %v1787_v12  ;;  %v3668_v35 = vmul.f32 0.5, %v3528_v52  ;;  %v1761_v32 = vsub.f32 0.0, %v3557_v33  ;;  %v1792_v24 = vmul.f32 %v1760_v25, %v3554_v28  ;;  %v3682_v42 = vpop.eup %2772 }
 0x280   : > { %v1686_v39 = vadd.f32 0.2548296, %v1654_v47  ;;  %v1595_v44 = vmul.f32 %v3597_v30, %v1563_v21  ;;  %v1568_v6 = vadd.f32 1.4214138, %v1536_v11  ;;  %v1688_v45 = vadd.f32 0.2548296, %v1656_v0  ;;  %v3688_v11 = vpop.eup %2774 }
 0x281   : > { %v1626_v18 = vadd.f32 -0.28449672, %v1594_v31  ;;  %2780 = vpow2.f32 %v1822_v7  ;;  %v1569_v12 = vadd.f32 1.4214138, %v1537_v60  ;;  %v1103_v52 = vmul.f32 %v1037_v59, %v3221_v3  ;;  %4571 = vst [vmem:[#allocation28_spill] sm:$0xff] %v3688_v11  ;;  %v2777_v7 = vpop.eup %2776 }
 0x282   : > { %v1349_v55 = vmul.f32 0.3275911, %v3664_v5  ;;  %v1380_v28 = vadd.f32 1.0, %v1348_v23  ;;  %v3680_v25 = vadd.f32 %v1149_v62, %v1102_v16  ;;  %2782 = vpow2.f32 %v1824_v53 }
 0x283   : > { %v3685_v47 = vmul.f32 0.5, %v3533_v9  ;;  %v1793_v1 = vmul.f32 %v1761_v32, %v3557_v33  ;;  %v1834_v21 = vmul.f32 1.442695, %v1792_v24  ;;  %v1718_v0 = vmul.f32 %v3560_v54, %v1686_v39 }
 0x284   : > { %v1627_v31 = vadd.f32 -0.28449672, %v1595_v44  ;;  %v1600_v3 = vmul.f32 %v3613_v61, %v1568_v6  ;;  %v3692_v59 = vadd.f32 %v1149_v62, %v1103_v52  ;;  %v1720_v60 = vmul.f32 %v3566_v14, %v1688_v45 }
 0x285   : > { %v1658_v23 = vmul.f32 %v3589_v34, %v1626_v18  ;;  %v1601_v9 = vmul.f32 %v3616_v49, %v1569_v12  ;;  %v1468_v53 = vmul.f32 1.0614054, %v3676_v38  ;;  %v1469_v32 = vmul.f32 1.0614054, %v3682_v42 }
 0x286   : > { %v3698_v33 = vpop.eup %2778  ;;  %v1381_v24 = vadd.f32 1.0, %v1349_v55  ;;  %2784 = vrcp.f32 %v1380_v28  ;;  %v3702_v54 = vmul.f32 0.70710677, %v3680_v25  ;;  %v1836_v62 = vmul.f32 1.442695, %v1793_v1  ;;  %v1062_v55 = vpop.permute.xlu0 %1061 }
 0x287   : > { %4572 = vst [vmem:[#allocation29_spill] sm:$0xff] %v3698_v33  ;;  %v1756_v39 = vsub.f32 0.0, %v3595_v58  ;;  %v1757_v14 = vsub.f32 0.0, %v3602_v50  ;;  %v3707_v44 = vmul.f32 0.70710677, %v3692_v59  ;;  %v3709_v6 = vmul.f32 %v2767_v57, %v1718_v0 }
 0x288   : > { %4573 = vst [vmem:[#allocation30_spill] sm:$0xff] %v3702_v54  ;;  %v1659_v16 = vmul.f32 %v3597_v30, %v1627_v31  ;;  %v1632_v45 = vadd.f32 -0.28449672, %v1600_v3  ;;  %v3713_v18 = vand.u32 2147483647, %v3702_v54  ;;  %v3715_v12 = vmul.f32 %v2777_v7, %v1720_v60 }
 0x289   : > { %4574 = vst [vmem:[#allocation31_spill] sm:$0xff] %v3707_v44  ;;  %v1690_v52 = vadd.f32 0.2548296, %v1658_v23  ;;  %v1633_v28 = vadd.f32 -0.28449672, %v1601_v9  ;;  %2786 = vrcp.f32 %v1381_v24  ;;  %v3722_v31 = vmul.f32 0.5, %v3573_v40 }
 0x28a   : > { %v3718_v1 = vand.u32 2147483647, %v3707_v44  ;;  %v1500_v33 = vadd.f32 -1.4531521, %v1468_v53  ;;  %v1501_v11 = vadd.f32 -1.4531521, %v1469_v32  ;;  %v1788_v3 = vmul.f32 %v1756_v39, %v3595_v58  ;;  %v1047_v32 = vpop.permute.xlu1 %1046 }
 0x28b   : > { %v1342_v57 = vmul.f32 0.3275911, %v3713_v18  ;;  %v2781_v0 = vpop.eup %2780  ;;  %4575 = vst [vmem:[#allocation32_spill] sm:$0xff] %v3722_v31  ;;  %v1789_v54 = vmul.f32 %v1757_v14, %v3602_v50  ;;  %v1910_v60 = vsub.f32 1.0, %v3709_v6  ;;  %v1691_v23 = vadd.f32 0.2548296, %v1659_v16  ;;  %v1174_v6 = vpop.permute.xlu0 %1173 }
 0x28c   : > { %v1343_v7 = vmul.f32 0.3275911, %v3718_v1  ;;  %v1664_v9 = vmul.f32 %v3613_v61, %v1632_v45  ;;  %v3730_v53 = vmul.f32 0.5, %v3577_v20  ;;  %v2783_v24 = vpop.eup %2782  ;;  %v1912_v44 = vsub.f32 1.0, %v3715_v12 }
 0x28d   : > { %v1722_v40 = vmul.f32 %v3589_v34, %v1690_v52  ;;  %v1665_v58 = vmul.f32 %v3616_v49, %v1633_v28  ;;  %2788 = vpow2.f32 %v1834_v21  ;;  %v1532_v50 = vmul.f32 %v3676_v38, %v1500_v33 }
 0x28e   : > { %4576 = vst [vmem:[#allocation33_spill] sm:$0xff] %v3730_v53  ;;  %2790 = vpow2.f32 %v1836_v62  ;;  %v1533_v39 = vmul.f32 %v3682_v42, %v1501_v11  ;;  %v1374_v14 = vadd.f32 1.0, %v1342_v57  ;;  %v1826_v20 = vmul.f32 1.442695, %v1788_v3 }
 0x28f   : > { %v1828_v16 = vmul.f32 1.442695, %v1789_v54  ;;  %v1375_v45 = vadd.f32 1.0, %v1343_v7  ;;  %v1112_v53 = vmul.f32 %v1062_v55, %v3272_v43  ;;  %v1974_v34 = vsub.f32 0.0, %v1910_v60  ;;  %v1159_v7 = vpop.permute.xlu1 %1158 }
 0x290   : > { %v3739_v12 = vpop.eup %2784  ;;  %v1723_v52 = vmul.f32 %v3597_v30, %v1691_v23  ;;  %v1696_v21 = vadd.f32 0.2548296, %v1664_v9  ;;  %v1113_v62 = vmul.f32 %v1062_v55, %v3277_v46  ;;  %v1976_v11 = vsub.f32 0.0, %v1912_v44 }
 0x291   : > { %v3744_v33 = vmul.f32 %v2781_v0, %v1722_v40  ;;  %v1697_v28 = vadd.f32 0.2548296, %v1665_v58  ;;  %v3746_v57 = vadd.f32 %v1174_v6, %v1112_v53  ;;  %v1564_v54 = vadd.f32 1.4214138, %v1532_v50 }
 0x292   : > { %v1565_v3 = vadd.f32 1.4214138, %v1533_v39  ;;  %2792 = vrcp.f32 %v1374_v14  ;;  %v3748_v43 = vadd.f32 %v1174_v6, %v1113_v62  ;;  %v1476_v31 = vmul.f32 1.0614054, %v3739_v12 }
 0x293   : > { %2794 = vrcp.f32 %v1375_v45  ;;  %v1106_v30 = vmul.f32 %v1047_v32, %v3242_v17  ;;  %v3753_v46 = vmul.f32 0.70710677, %v3746_v57  ;;  %v3755_v55 = vpop.eup %2786  ;;  %v3757_v0 = vmul.f32 %v2783_v24, %v1723_v52 }
 0x294   : > { %v1728_v23 = vmul.f32 %v3613_v61, %v1696_v21  ;;  %v1107_v9 = vmul.f32 %v1047_v32, %v3245_v19  ;;  %v3762_v53 = vmul.f32 0.70710677, %v3748_v43  ;;  %v1914_v40 = vsub.f32 1.0, %v3744_v33 }
 0x295   : > { %4577 = vst [vmem:[#allocation34_spill] sm:$0xff] %v3753_v46  ;;  %v1729_v17 = vmul.f32 %v3616_v49, %v1697_v28  ;;  %v3768_v58 = vand.u32 2147483647, %v3753_v46  ;;  %v3770_v50 = vadd.f32 %v1159_v7, %v1106_v30  ;;  %v1596_v24 = vmul.f32 %v3676_v38, %v1564_v54 }
 0x296   : > { %4578 = vst [vmem:[#allocation35_spill] sm:$0xff] %v3762_v53  ;;  %v1597_v61 = vmul.f32 %v3682_v42, %v1565_v3  ;;  %v3775_v19 = vand.u32 2147483647, %v3762_v53  ;;  %v3777_v32 = vadd.f32 %v1159_v7, %v1107_v9  ;;  %2796 = vpow2.f32 %v1826_v20 }
 0x297   : > { %4579 = vst [vmem:[#allocation36_spill] sm:$0xff] %v3770_v50  ;;  %v2789_v39 = vpop.eup %2788  ;;  %v1477_v14 = vmul.f32 1.0614054, %v3755_v55  ;;  %v1508_v6 = vadd.f32 -1.4531521, %v1476_v31  ;;  %v2006_v52 = vsel %vm1942_vm0, %v1974_v34, %v1910_v60  ;;  %2798 = vpow2.f32 %v1828_v16 }
 0x298   : > { %4580 = vst [vmem:[#allocation37_spill] sm:$0xff] %v3777_v32  ;;  %v1352_v49 = vmul.f32 0.3275911, %v3768_v58  ;;  %v2791_v45 = vpop.eup %2790  ;;  %v1888_v21 = vmul.f32 %v2789_v39, %v1728_v23  ;;  %v1353_v62 = vmul.f32 0.3275911, %v3775_v19  ;;  %v1915_v33 = vsub.f32 1.0, %v3757_v0 }
 0x299   : > { %v1978_v28 = vsub.f32 0.0, %v1914_v40  ;;  %v1889_v54 = vmul.f32 %v2791_v45, %v1729_v17  ;;  %v3786_v3 = vmul.f32 0.70710677, %v3770_v50  ;;  %v2008_v31 = vsel %vm1944_vm1, %v1976_v11, %v1912_v44 }
 0x29a   : > { %vm1947_vm3 = vcmp.lt.f32.partialorder %v3526_v27, 0.0  ;;  %v1628_v20 = vadd.f32 -0.28449672, %v1596_v24  ;;  %v1629_v7 = vadd.f32 -0.28449672, %v1597_v61  ;;  %v2038_v60 = vadd.f32 1.0, %v2006_v52 }
 0x29b   : > { %4581 = vst [vmem:[#allocation38_spill] sm:$0xff] %v3786_v3  ;;  %v3792_v29 = vmul.f32 0.70710677, %v3777_v32  ;;  %vm1952_vm4 = vcmp.lt.f32.partialorder %v3539_v2, 0.0  ;;  %v1509_v16 = vadd.f32 -1.4531521, %v1477_v14  ;;  %v1540_v34 = vmul.f32 %v3739_v12, %v1508_v6 }
 0x29c   : > { %v1384_v30 = vadd.f32 1.0, %v1352_v49  ;;  %v3796_v0 = vpop.eup %2792  ;;  %v1920_v23 = vsub.f32 1.0, %v1888_v21  ;;  %vm1953_vm5 = vcmp.lt.f32.partialorder %v3543_v10, 0.0  ;;  %v3800_v36 = vmul.f32 0.5, %v3618_v13  ;;  %v1072_v21 = vpop.permute.xlu0 %1071 }
 0x29d   : > { %4582 = vst [vmem:[#allocation39_spill] sm:$0xff] %v3792_v29  ;;  %v3803_v44 = vmul.f32 0.5, %v3628_v56  ;;  %v1385_v11 = vadd.f32 1.0, %v1353_v62  ;;  %v3805_v9 = vpop.eup %2794  ;;  %v2040_v17 = vadd.f32 1.0, %v2008_v31  ;;  %v1979_v24 = vsub.f32 0.0, %v1915_v33 }
 0x29e   : > { %4583 = vst [vmem:[#allocation40_spill] sm:$0xff] %v3800_v36  ;;  %v1921_v61 = vsub.f32 1.0, %v1889_v54  ;;  %v3808_v39 = vand.u32 2147483647, %v3786_v3  ;;  %v2010_v14 = vsel %vm1946_vm2, %v1978_v28, %v1914_v40  ;;  %v1660_v6 = vmul.f32 %v3676_v38, %v1628_v20 }
 0x29f   : > { %4584 = vst [vmem:[#allocation41_spill] sm:$0xff] %v3803_v44  ;;  %v1661_v13 = vmul.f32 %v3682_v42, %v1629_v7  ;;  %v3815_v49 = vand.u32 2147483647, %v3792_v29  ;;  %v1541_v56 = vmul.f32 %v3755_v55, %v1509_v16  ;;  %v1572_v45 = vadd.f32 1.4214138, %v1540_v34 }
 0x2a0   : > { %v1470_v52 = vmul.f32 1.0614054, %v3796_v0  ;;  %2800 = vrcp.f32 %v1384_v30  ;;  %v1984_v62 = vsub.f32 0.0, %v1920_v23  ;;  %v1471_v54 = vmul.f32 1.0614054, %v3805_v9  ;;  %v2797_v40 = vpop.eup %2796  ;;  %v1184_v27 = vpop.permute.xlu0 %1183 }
 0x2a1   : > { %4585 = vst [vmem:[#allocation42_spill] sm:$0xff] %v3815_v49  ;;  %2802 = vrcp.f32 %v1385_v11  ;;  %v1346_v48 = vmul.f32 0.3275911, %v3808_v39  ;;  %v1985_v28 = vsub.f32 0.0, %v1921_v61  ;;  %v1764_v31 = vsub.f32 0.0, %v3643_v26  ;;  %v2799_v16 = vpop.eup %2798 }
 0x2a2   : > { %v1765_v20 = vsub.f32 0.0, %v3664_v5  ;;  %v1347_v7 = vmul.f32 0.3275911, %v3815_v49  ;;  %v3825_v34 = vmul.f32 %v2038_v60, %v3605_v37  ;;  %v3828_v30 = vmul.f32 %v2040_v17, %v3637_v51 }
 0x2a3   : > { %v1692_v29 = vadd.f32 0.2548296, %v1660_v6  ;;  %v1693_v3 = vadd.f32 0.2548296, %v1661_v13  ;;  %v2011_v11 = vsel %vm1947_vm3, %v1979_v24, %v1915_v33  ;;  %v1573_v44 = vadd.f32 1.4214138, %v1541_v56 }
 0x2a4   : > { %v1604_v53 = vmul.f32 %v3739_v12, %v1572_v45  ;;  %v1502_v46 = vadd.f32 -1.4531521, %v1470_v52  ;;  %v2042_v36 = vadd.f32 1.0, %v2010_v14  ;;  %v2016_v32 = vsel %vm1952_vm4, %v1984_v62, %v1920_v23 }
 0x2a5   : > { %v1503_v50 = vadd.f32 -1.4531521, %v1471_v54  ;;  %v1378_v49 = vadd.f32 1.0, %v1346_v48  ;;  %v2017_v37 = vsel %vm1953_vm5, %v1985_v28, %v1921_v61  ;;  %v1796_v51 = vmul.f32 %v1764_v31, %v3643_v26 }
 0x2a6   : > { %v1797_v60 = vmul.f32 %v1765_v20, %v3664_v5  ;;  %v1379_v17 = vadd.f32 1.0, %v1347_v7  ;;  %v1724_v33 = vmul.f32 %v3676_v38, %v1692_v29  ;;  %v1725_v24 = vmul.f32 %v3682_v42, %v1693_v3  ;;  %v4586_v20 = vld [vmem:[#allocation22_spill] sm:$0xff]  ;;  %v4587_v7 = vld [vmem:[#allocation23_spill] sm:$0xff] }
 0x2a7   : > { %v1116_v14 = vmul.f32 %v1072_v21, %v3296_v63  ;;  %v1117_v2 = vmul.f32 %v1072_v21, %v3301_v4  ;;  %v2043_v23 = vadd.f32 1.0, %v2011_v11  ;;  %v1605_v6 = vmul.f32 %v3755_v55, %v1573_v44  ;;  %v1057_v21 = vpop.permute.xlu1 %1056 }
 0x2a8   : > { %v1636_v13 = vadd.f32 -0.28449672, %v1604_v53  ;;  %v1534_v10 = vmul.f32 %v3796_v0, %v1502_v46  ;;  %v1535_v26 = vmul.f32 %v3805_v9, %v1503_v50  ;;  %2804 = vrcp.f32 %v1378_v49 }
 0x2a9   : > { %v3846_v5 = vadd.f32 %v1184_v27, %v1116_v14  ;;  %v3848_v61 = vadd.f32 %v1184_v27, %v1117_v2  ;;  %v3853_v42 = vmul.f32 %v2042_v36, %v3658_v22  ;;  %v2048_v63 = vadd.f32 1.0, %v2016_v32 }
 0x2aa   : > { %v3850_v38 = vpop.eup %2800  ;;  %v2049_v4 = vadd.f32 1.0, %v2017_v37  ;;  %2806 = vrcp.f32 %v1379_v17  ;;  %v1884_v53 = vmul.f32 %v2797_v40, %v1724_v33  ;;  %v1885_v29 = vmul.f32 %v2799_v16, %v1725_v24 }
 0x2ab   : > { %v3855_v3 = vpop.eup %2802  ;;  %v1842_v46 = vmul.f32 1.442695, %v1796_v51  ;;  %v1844_v44 = vmul.f32 1.442695, %v1797_v60  ;;  %v1758_v50 = vsub.f32 0.0, %v3713_v18  ;;  %v1759_v49 = vsub.f32 0.0, %v3718_v1 }
 0x2ac   : > { %v3860_v56 = vmul.f32 0.70710677, %v3846_v5  ;;  %v3863_v45 = vmul.f32 0.70710677, %v3848_v61  ;;  %v1637_v22 = vadd.f32 -0.28449672, %v1605_v6  ;;  %v1668_v32 = vmul.f32 %v3739_v12, %v1636_v13  ;;  %v1169_v13 = vpop.permute.xlu1 %1168 }
 0x2ad   : > { %v1566_v36 = vadd.f32 1.4214138, %v1534_v10  ;;  %v1567_v52 = vadd.f32 1.4214138, %v1535_v26  ;;  %v3867_v62 = vmul.f32 %v2043_v23, %v3661_v8  ;;  %v1480_v54 = vmul.f32 1.0614054, %v3850_v38 }
 0x2ae   : > { %v1481_v48 = vmul.f32 1.0614054, %v3855_v3  ;;  %v3872_v40 = vand.u32 2147483647, %v3860_v56  ;;  %v1916_v28 = vsub.f32 1.0, %v1884_v53  ;;  %v1917_v31 = vsub.f32 1.0, %v1885_v29 }
 0x2af   : > { %vm1948_vm6 = vcmp.lt.f32.partialorder %v4586_v20, 0.0  ;;  %vm1949_vm7 = vcmp.lt.f32.partialorder %v4587_v7, 0.0  ;;  %2808 = vpow2.f32 %v1842_v46  ;;  %v3877_v16 = vand.u32 2147483647, %v3863_v45  ;;  %v4589_v53 = vld [vmem:[#allocation8_spill] sm:$0xff] }
 0x2b0   : > { %v3880_v8 = vmul.f32 %v2048_v63, %v3668_v35  ;;  %v1790_v11 = vmul.f32 %v1758_v50, %v3713_v18  ;;  %v1791_v37 = vmul.f32 %v1759_v49, %v3718_v1  ;;  %v1356_v51 = vmul.f32 0.3275911, %v3872_v40 }
 0x2b1   : > { %v1669_v60 = vmul.f32 %v3755_v55, %v1637_v22  ;;  %v1700_v17 = vadd.f32 0.2548296, %v1668_v32  ;;  %v1598_v27 = vmul.f32 %v3796_v0, %v1566_v36  ;;  %v1599_v33 = vmul.f32 %v3805_v9, %v1567_v52  ;;  %v4590_v22 = vld [vmem:[#allocation9_spill] sm:$0xff] }
 0x2b2   : > { %4588 = vst [vmem:[#allocation22_spill] sm:$0xff] %v3880_v8  ;;  %v3889_v24 = vmul.f32 %v2049_v4, %v3685_v47  ;;  %2810 = vpow2.f32 %v1844_v44  ;;  %v1512_v14 = vadd.f32 -1.4531521, %v1480_v54  ;;  %v1513_v35 = vadd.f32 -1.4531521, %v1481_v48  ;;  %v3891_v2 = vpop.eup %2804 }
 0x2b3   : > { %v1980_v18 = vsub.f32 0.0, %v1916_v28  ;;  %v1981_v23 = vsub.f32 0.0, %v1917_v31  ;;  %v3894_v1 = vmul.f32 0.5, %v3680_v25  ;;  %v1357_v6 = vmul.f32 0.3275911, %v3877_v16 }
 0x2b4   : > { %v3897_v10 = vpop.eup %2806  ;;  %v1830_v26 = vmul.f32 1.442695, %v1790_v11  ;;  %v1832_v63 = vmul.f32 1.442695, %v1791_v37  ;;  %v1110_v47 = vmul.f32 %v1057_v21, %v4589_v53  ;;  %v1388_v4 = vadd.f32 1.0, %v1356_v51 }
 0x2b5   : > { %v1701_v29 = vadd.f32 0.2548296, %v1669_v60  ;;  %v1732_v46 = vmul.f32 %v3739_v12, %v1700_v17  ;;  %v1630_v44 = vadd.f32 -0.28449672, %v1598_v27  ;;  %v1631_v50 = vadd.f32 -0.28449672, %v1599_v33 }
 0x2b6   : > { %v1544_v49 = vmul.f32 %v3850_v38, %v1512_v14  ;;  %v1545_v25 = vmul.f32 %v3855_v3, %v1513_v35  ;;  %v1111_v32 = vmul.f32 %v1057_v21, %v4590_v22  ;;  %v3904_v36 = vadd.f32 %v1169_v13, %v1110_v47 }
 0x2b7   : > { %v1474_v52 = vmul.f32 1.0614054, %v3891_v2  ;;  %v1475_v54 = vmul.f32 1.0614054, %v3897_v10  ;;  %v1389_v48 = vadd.f32 1.0, %v1357_v6  ;;  %2812 = vrcp.f32 %v1388_v4 }
 0x2b8   : > { %v2012_v11 = vsel %vm1948_vm6, %v1980_v18, %v1916_v28  ;;  %v2013_v12 = vsel %vm1949_vm7, %v1981_v23, %v1917_v31  ;;  %v1768_v37 = vsub.f32 0.0, %v3768_v58  ;;  %v3913_v51 = vadd.f32 %v1169_v13, %v1111_v32 }
 0x2b9   : > { %v2809_v60 = vpop.eup %2808  ;;  %v1733_v21 = vmul.f32 %v3755_v55, %v1701_v29  ;;  %v1662_v17 = vmul.f32 %v3796_v0, %v1630_v44  ;;  %v1663_v27 = vmul.f32 %v3805_v9, %v1631_v50  ;;  %2814 = vpow2.f32 %v1830_v26 }
 0x2ba   : > { %v1892_v33 = vmul.f32 %v2809_v60, %v1732_v46  ;;  %2816 = vpow2.f32 %v1832_v63  ;;  %v1576_v14 = vadd.f32 1.4214138, %v1544_v49  ;;  %v1577_v20 = vadd.f32 1.4214138, %v1545_v25  ;;  %v4591_v60 = vld [vmem:[#allocation42_spill] sm:$0xff] }
 0x2bb   : > { %v1506_v28 = vadd.f32 -1.4531521, %v1474_v52  ;;  %v1507_v35 = vadd.f32 -1.4531521, %v1475_v54  ;;  %2818 = vrcp.f32 %v1389_v48  ;;  %v3919_v31 = vmul.f32 0.70710677, %v3904_v36 }
 0x2bc   : > { %v2811_v7 = vpop.eup %2810  ;;  %v3922_v18 = vmul.f32 0.5, %v3692_v59  ;;  %v1769_v55 = vsub.f32 0.0, %v3775_v19  ;;  %v1800_v23 = vmul.f32 %v1768_v37, %v3768_v58  ;;  %v3927_v6 = vmul.f32 0.70710677, %v3913_v51 }
 0x2bd   : > { %v2044_v13 = vadd.f32 1.0, %v2012_v11  ;;  %v1893_v26 = vmul.f32 %v2811_v7, %v1733_v21  ;;  %vm1956_vm8 = vcmp.lt.f32.partialorder %v3631_v15, 0.0  ;;  %v1694_v63 = vadd.f32 0.2548296, %v1662_v17  ;;  %v4592_v17 = vld [vmem:[#allocation32_spill] sm:$0xff] }
 0x2be   : > { %v1695_v53 = vadd.f32 0.2548296, %v1663_v27  ;;  %v2045_v47 = vadd.f32 1.0, %v2013_v12  ;;  %v1924_v4 = vsub.f32 1.0, %v1892_v33  ;;  %v1608_v29 = vmul.f32 %v3850_v38, %v1576_v14 }
 0x2bf   : > { %v1609_v59 = vmul.f32 %v3855_v3, %v1577_v20  ;;  %v3933_v46 = vmul.f32 0.5, %v3746_v57  ;;  %v1538_v58 = vmul.f32 %v3891_v2, %v1506_v28  ;;  %v1539_v44 = vmul.f32 %v3897_v10, %v1507_v35  ;;  %v4593_v35 = vld [vmem:[#allocation33_spill] sm:$0xff] }
 0x2c0   : > { %v3938_v50 = vand.u32 2147483647, %v3919_v31  ;;  %v3941_v49 = vmul.f32 0.5, %v3748_v43  ;;  %v1801_v25 = vmul.f32 %v1769_v55, %v3775_v19  ;;  %v1850_v22 = vmul.f32 1.442695, %v1800_v23 }
 0x2c1   : > { %v3945_v32 = vand.u32 2147483647, %v3927_v6  ;;  %v3947_v52 = vpop.eup %2812  ;;  %v1925_v57 = vsub.f32 1.0, %v1893_v26  ;;  %vm1957_vm9 = vcmp.lt.f32.partialorder %v3640_v41, 0.0  ;;  %v1726_v54 = vmul.f32 %v3796_v0, %v1694_v63  ;;  %v4598_v41 = vld [vmem:[#allocation40_spill] sm:$0xff] }
 0x2c2   : > { %v1727_v48 = vmul.f32 %v3805_v9, %v1695_v53  ;;  %v1762_v11 = vsub.f32 0.0, %v3808_v39  ;;  %v1988_v12 = vsub.f32 0.0, %v1924_v4  ;;  %v1640_v43 = vadd.f32 -0.28449672, %v1608_v29 }
 0x2c3   : > { %v1641_v37 = vadd.f32 -0.28449672, %v1609_v59  ;;  %v1763_v19 = vsub.f32 0.0, %v4591_v60  ;;  %v2815_v21 = vpop.eup %2814  ;;  %v3955_v27 = vmul.f32 %v2044_v13, %v4592_v17  ;;  %v1570_v33 = vadd.f32 1.4214138, %v1538_v58 }
 0x2c4   : > { %v1571_v14 = vadd.f32 1.4214138, %v1539_v44  ;;  %v1350_v20 = vmul.f32 0.3275911, %v3938_v50  ;;  %v2817_v28 = vpop.eup %2816  ;;  %v3959_v0 = vmul.f32 %v2045_v47, %v4593_v35  ;;  %v1852_v9 = vmul.f32 1.442695, %v1801_v25 }
 0x2c5   : > { %v1484_v7 = vmul.f32 1.0614054, %v3947_v52  ;;  %v1351_v55 = vmul.f32 0.3275911, %v3945_v32  ;;  %v3963_v23 = vpop.eup %2818  ;;  %v1886_v26 = vmul.f32 %v2815_v21, %v1726_v54  ;;  %v1887_v63 = vmul.f32 %v2817_v28, %v1727_v48  ;;  %v4594_v54 = vld [vmem:[#allocation30_spill] sm:$0xff]  ;;  %v1082_v48 = vpop.permute.xlu0 %1081 }
 0x2c6   : > { %2820 = vpow2.f32 %v1850_v22  ;;  %v1794_v13 = vmul.f32 %v1762_v11, %v3808_v39  ;;  %v1989_v53 = vsub.f32 0.0, %v1925_v57  ;;  %v2020_v29 = vsel %vm1956_vm8, %v1988_v12, %v1924_v4  ;;  %v4595_v22 = vld [vmem:[#allocation31_spill] sm:$0xff] }
 0x2c7   : > { %v1672_v59 = vmul.f32 %v3850_v38, %v1640_v43  ;;  %v1795_v47 = vmul.f32 %v1763_v19, %v4591_v60  ;;  %v1673_v58 = vmul.f32 %v3855_v3, %v1641_v37  ;;  %v1602_v44 = vmul.f32 %v3891_v2, %v1570_v33  ;;  %v4596_v43 = vld [vmem:[#allocation36_spill] sm:$0xff] }
 0x2c8   : > { %v1603_v25 = vmul.f32 %v3897_v10, %v1571_v14  ;;  %v1382_v17 = vadd.f32 1.0, %v1350_v20  ;;  %vm1950_vm10 = vcmp.lt.f32.partialorder %v4594_v54, 0.0  ;;  %vm1951_vm11 = vcmp.lt.f32.partialorder %v4595_v22, 0.0 }
 0x2c9   : > { %2822 = vpow2.f32 %v1852_v9  ;;  %v1485_v39 = vmul.f32 1.0614054, %v3963_v23  ;;  %v1516_v15 = vadd.f32 -1.4531521, %v1484_v7  ;;  %v1383_v4 = vadd.f32 1.0, %v1351_v55  ;;  %v1067_v9 = vpop.permute.xlu1 %1066  ;;  %v4597_v7 = vld [vmem:[#allocation37_spill] sm:$0xff] }
 0x2ca   : > { %v1918_v11 = vsub.f32 1.0, %v1886_v26  ;;  %v1919_v12 = vsub.f32 1.0, %v1887_v63  ;;  %v3977_v60 = vmul.f32 0.5, %v4596_v43  ;;  %v1838_v37 = vmul.f32 1.442695, %v1794_v13 }
 0x2cb   : > { %v2021_v19 = vsel %vm1957_vm9, %v1989_v53, %v1925_v57  ;;  %v2052_v21 = vadd.f32 1.0, %v2020_v29  ;;  %v1704_v33 = vadd.f32 0.2548296, %v1672_v59  ;;  %v1840_v14 = vmul.f32 1.442695, %v1795_v47  ;;  %v1194_v59 = vpop.permute.xlu0 %1193 }
 0x2cc   : > { %v1705_v20 = vadd.f32 0.2548296, %v1673_v58  ;;  %v1634_v28 = vadd.f32 -0.28449672, %v1602_v44  ;;  %v1635_v35 = vadd.f32 -0.28449672, %v1603_v25  ;;  %2824 = vrcp.f32 %v1382_v17 }
 0x2cd   : > { %v3982_v55 = vmul.f32 0.5, %v4597_v7  ;;  %v1517_v26 = vadd.f32 -1.4531521, %v1485_v39  ;;  %v1548_v63 = vmul.f32 %v3947_v52, %v1516_v15  ;;  %2826 = vrcp.f32 %v1383_v4  ;;  %v4600_v17 = vld [vmem:[#allocation15_spill] sm:$0xff] }
 0x2ce   : > { %v2053_v43 = vadd.f32 1.0, %v2021_v19  ;;  %v1982_v13 = vsub.f32 0.0, %v1918_v11  ;;  %v1983_v8 = vsub.f32 0.0, %v1919_v12  ;;  %2828 = vpow2.f32 %v1838_v37 }
 0x2cf   : > { %v3986_v57 = vmul.f32 %v2052_v21, %v4598_v41  ;;  %v1736_v53 = vmul.f32 %v3850_v38, %v1704_v33  ;;  %2830 = vpow2.f32 %v1840_v14  ;;  %v1772_v29 = vsub.f32 0.0, %v3872_v40  ;;  %v1179_v14 = vpop.permute.xlu1 %1178 }
 0x2d0   : > { %v2821_v47 = vpop.eup %2820  ;;  %v1737_v58 = vmul.f32 %v3855_v3, %v1705_v20  ;;  %v1666_v44 = vmul.f32 %v3891_v2, %v1634_v28  ;;  %v1667_v25 = vmul.f32 %v3897_v10, %v1635_v35  ;;  %v1121_v39 = vmul.f32 %v1082_v48, %v4600_v17  ;;  %v4604_v35 = vld [vmem:[#allocation10_spill] sm:$0xff] }
 0x2d1   : > { %4599 = vst [vmem:[#allocation23_spill] sm:$0xff] %v3986_v57  ;;  %v3995_v15 = vmul.f32 0.5, %v3846_v5  ;;  %v3998_v4 = vmul.f32 0.5, %v3848_v61  ;;  %v1549_v38 = vmul.f32 %v3963_v23, %v1517_v26  ;;  %v1580_v37 = vadd.f32 1.4214138, %v1548_v63 }
 0x2d2   : > { %v2014_v19 = vsel %vm1950_vm10, %v1982_v13, %v1918_v11  ;;  %v2015_v3 = vsel %vm1951_vm11, %v1983_v8, %v1919_v12  ;;  %v4006_v21 = vmul.f32 0.5, %v3904_v36  ;;  %v4008_v33 = vadd.f32 %v1194_v59, %v1121_v39  ;;  %v4605_v8 = vld [vmem:[#allocation11_spill] sm:$0xff] }
 0x2d3   : > { %4601 = vst [vmem:[#allocation8_spill] sm:$0xff] %v3995_v15  ;;  %v2823_v5 = vpop.eup %2822  ;;  %v4010_v20 = vmul.f32 %v2821_v47, %v1736_v53  ;;  %v1773_v61 = vsub.f32 0.0, %v3877_v16  ;;  %v1804_v28 = vmul.f32 %v1772_v29, %v3872_v40  ;;  %v1114_v7 = vmul.f32 %v1067_v9, %v4604_v35  ;;  %v4608_v40 = vld [vmem:[#allocation14_spill] sm:$0xff]  ;;  %v4612_v35 = vld [vmem:[#allocation35_spill] sm:$0xff] }
 0x2d4   : > { %4602 = vst [vmem:[#allocation9_spill] sm:$0xff] %v4006_v21  ;;  %4603 = vst [vmem:[#allocation42_spill] sm:$0xff] %v4008_v33  ;;  %v4015_v54 = vmul.f32 %v2823_v5, %v1737_v58  ;;  %v1698_v11 = vadd.f32 0.2548296, %v1666_v44  ;;  %v1699_v22 = vadd.f32 0.2548296, %v1667_v25  ;;  %v1115_v12 = vmul.f32 %v1067_v9, %v4605_v8 }
 0x2d5   : > { %v1581_v36 = vadd.f32 1.4214138, %v1549_v38  ;;  %v1612_v26 = vmul.f32 %v3947_v52, %v1580_v37  ;;  %v4020_v63 = vmul.f32 0.5, %v3913_v51  ;;  %v4022_v13 = vadd.f32 %v1179_v14, %v1114_v7  ;;  %v4610_v37 = vld [vmem:[#allocation34_spill] sm:$0xff] }
 0x2d6   : > { %v4024_v41 = vpop.eup %2824  ;;  %v2046_v53 = vadd.f32 1.0, %v2014_v19  ;;  %v1120_v29 = vmul.f32 %v1082_v48, %v4608_v40  ;;  %v4028_v47 = vmul.f32 0.70710677, %v4008_v33  ;;  %v4030_v58 = vadd.f32 %v1179_v14, %v1115_v12 }
 0x2d7   : > { %4606 = vst [vmem:[#allocation32_spill] sm:$0xff] %v4020_v63  ;;  %4607 = vst [vmem:[#allocation33_spill] sm:$0xff] %v4022_v13  ;;  %v4032_v44 = vpop.eup %2826  ;;  %v2047_v9 = vadd.f32 1.0, %v2015_v3  ;;  %v1928_v25 = vsub.f32 1.0, %v4010_v20  ;;  %v1805_v51 = vmul.f32 %v1773_v61, %v3877_v16  ;;  %v1858_v17 = vmul.f32 1.442695, %v1804_v28 }
 0x2d8   : > { %4609 = vst [vmem:[#allocation30_spill] sm:$0xff] %v4028_v47  ;;  %v2829_v39 = vpop.eup %2828  ;;  %v1929_v38 = vsub.f32 1.0, %v4015_v54  ;;  %vm1960_vm12 = vcmp.lt.f32.partialorder %v4610_v37, 0.0  ;;  %v1730_v48 = vmul.f32 %v3891_v2, %v1698_v11  ;;  %v1731_v19 = vmul.f32 %v3897_v10, %v1699_v22  ;;  %v4614_v28 = vld [vmem:[#allocation41_spill] sm:$0xff]  ;;  %v4619_v37 = vld [vmem:[#allocation19_spill] sm:$0xff] }
 0x2d9   : > { %v4040_v5 = vadd.f32 %v1194_v59, %v1120_v29  ;;  %v2831_v14 = vpop.eup %2830  ;;  %vm1961_vm13 = vcmp.lt.f32.partialorder %v4612_v35, 0.0  ;;  %v1613_v3 = vmul.f32 %v3963_v23, %v1581_v36  ;;  %v1644_v20 = vadd.f32 -0.28449672, %v1612_v26  ;;  %v1092_v26 = vpop.permute.xlu0 %1091  ;;  %v4620_v35 = vld [vmem:[#allocation18_spill] sm:$0xff] }
 0x2da   : > { %v1478_v16 = vmul.f32 1.0614054, %v4024_v41  ;;  %v4046_v61 = vmul.f32 0.70710677, %v4022_v13  ;;  %v4049_v7 = vmul.f32 %v2053_v43, %v4614_v28  ;;  %v1479_v2 = vmul.f32 1.0614054, %v4032_v44 }
 0x2db   : > { %4611 = vst [vmem:[#allocation31_spill] sm:$0xff] %v4040_v5  ;;  %v4053_v10 = vand.u32 2147483647, %v4028_v47  ;;  %v4056_v59 = vmul.f32 0.70710677, %v4030_v58  ;;  %v4059_v54 = vmul.f32 %v2046_v53, %v3894_v1  ;;  %2832 = vpow2.f32 %v1858_v17 }
 0x2dc   : > { %4613 = vst [vmem:[#allocation36_spill] sm:$0xff] %v4046_v61  ;;  %v1860_v11 = vmul.f32 1.442695, %v1805_v51  ;;  %v4062_v22 = vand.u32 2147483647, %v4046_v61  ;;  %v1890_v8 = vmul.f32 %v2829_v39, %v1730_v48  ;;  %v1891_v12 = vmul.f32 %v2831_v14, %v1731_v19  ;;  %v4617_v48 = vld [vmem:[#allocation38_spill] sm:$0xff] }
 0x2dd   : > { %4615 = vst [vmem:[#allocation37_spill] sm:$0xff] %v4056_v59  ;;  %v4065_v43 = vmul.f32 0.70710677, %v4040_v5  ;;  %v4068_v36 = vand.u32 2147483647, %v4056_v59  ;;  %v1992_v40 = vsub.f32 0.0, %v1928_v25  ;;  %v1676_v1 = vmul.f32 %v3947_v52, %v1644_v20  ;;  %v1204_v47 = vpop.permute.xlu0 %1203 }
 0x2de   : > { %v1993_v29 = vsub.f32 0.0, %v1929_v38  ;;  %v1645_v28 = vadd.f32 -0.28449672, %v1613_v3  ;;  %v1510_v15 = vadd.f32 -1.4531521, %v1478_v16  ;;  %v4074_v39 = vmul.f32 %v2047_v9, %v3922_v18  ;;  %v4618_v16 = vld [vmem:[#allocation39_spill] sm:$0xff] }
 0x2df   : > { %4616 = vst [vmem:[#allocation40_spill] sm:$0xff] %v4065_v43  ;;  %v1511_v53 = vadd.f32 -1.4531521, %v1479_v2  ;;  %v1361_v51 = vmul.f32 0.3275911, %v4053_v10  ;;  %vm1954_vm14 = vcmp.lt.f32.partialorder %v4617_v48, 0.0  ;;  %2834 = vpow2.f32 %v1860_v11 }
 0x2e0   : > { %v1355_v17 = vmul.f32 0.3275911, %v4068_v36  ;;  %v1766_v19 = vsub.f32 0.0, %v3938_v50  ;;  %v1354_v14 = vmul.f32 0.3275911, %v4062_v22  ;;  %v1922_v5 = vsub.f32 1.0, %v1890_v8 }
 0x2e1   : > { %v1923_v3 = vsub.f32 1.0, %v1891_v12  ;;  %vm1955_vm15 = vcmp.lt.f32.partialorder %v4618_v16, 0.0  ;;  %v1328_v20 = vand.u32 2147483647, %v4065_v43  ;;  %v2024_v33 = vsel %vm1960_vm12, %v1992_v40, %v1928_v25 }
 0x2e2   : > { %v1387_v2 = vadd.f32 1.0, %v1355_v17  ;;  %v1677_v18 = vmul.f32 %v3963_v23, %v1645_v28  ;;  %v1542_v9 = vmul.f32 %v4024_v41, %v1510_v15  ;;  %v1767_v11 = vsub.f32 0.0, %v3945_v32 }
 0x2e3   : > { %v2025_v13 = vsel %vm1961_vm13, %v1993_v29, %v1929_v38  ;;  %v1708_v57 = vadd.f32 0.2548296, %v1676_v1  ;;  %v1543_v8 = vmul.f32 %v4032_v44, %v1511_v53  ;;  %v1393_v12 = vadd.f32 1.0, %v1361_v51 }
 0x2e4   : > { %v1798_v43 = vmul.f32 %v1766_v19, %v3938_v50  ;;  %v1386_v17 = vadd.f32 1.0, %v1354_v14  ;;  %2836 = vrcp.f32 %v1387_v2  ;;  %v1125_v25 = vmul.f32 %v1092_v26, %v4619_v37  ;;  %v4622_v50 = vld [vmem:[#allocation25_spill] sm:$0xff] }
 0x2e5   : > { %v2056_v40 = vadd.f32 1.0, %v2024_v33  ;;  %v1986_v28 = vsub.f32 0.0, %v1922_v5  ;;  %v1987_v63 = vsub.f32 0.0, %v1923_v3  ;;  %v1360_v15 = vmul.f32 0.3275911, %v1328_v20  ;;  %v2833_v59 = vpop.eup %2832 }
 0x2e6   : > { %v1709_v21 = vadd.f32 0.2548296, %v1677_v18  ;;  %v1574_v61 = vadd.f32 1.4214138, %v1542_v9  ;;  %v1124_v38 = vmul.f32 %v1092_v26, %v4620_v35  ;;  %v4092_v29 = vadd.f32 %v1204_v47, %v1125_v25  ;;  %v4626_v25 = vld [vmem:[#allocation28_spill] sm:$0xff] }
 0x2e7   : > { %v1740_v1 = vmul.f32 %v3947_v52, %v1708_v57  ;;  %v1575_v53 = vadd.f32 1.4214138, %v1543_v8  ;;  %2838 = vrcp.f32 %v1393_v12  ;;  %v1463_v51 = vmul.f32 1.0614054, %v4622_v50 }
 0x2e8   : > { %4621 = vst [vmem:[#allocation15_spill] sm:$0xff] %v4092_v29  ;;  %v1799_v19 = vmul.f32 %v1767_v11, %v3945_v32  ;;  %v1846_v14 = vmul.f32 1.442695, %v1798_v43  ;;  %2840 = vrcp.f32 %v1386_v17  ;;  %v4097_v33 = vadd.f32 %v1204_v47, %v1124_v38  ;;  %v1077_v17 = vpop.permute.xlu1 %1076 }
 0x2e9   : > { %v2057_v2 = vadd.f32 1.0, %v2025_v13  ;;  %v2018_v18 = vsel %vm1954_vm14, %v1986_v28, %v1922_v5  ;;  %v1392_v9 = vadd.f32 1.0, %v1360_v15  ;;  %v4102_v26 = vmul.f32 0.70710677, %v4092_v29  ;;  %v2835_v37 = vpop.eup %2834 }
 0x2ea   : > { %4623 = vst [vmem:[#allocation10_spill] sm:$0xff] %v4097_v33  ;;  %v2019_v52 = vsel %vm1955_vm15, %v1987_v63, %v1923_v3  ;;  %v1741_v57 = vmul.f32 %v3963_v23, %v1709_v21  ;;  %v1606_v32 = vmul.f32 %v4024_v41, %v1574_v61  ;;  %v1776_v43 = vsub.f32 0.0, %v1328_v20 }
 0x2eb   : > { %4624 = vst [vmem:[#allocation11_spill] sm:$0xff] %v4102_v26  ;;  %v4108_v11 = vmul.f32 %v2833_v59, %v1740_v1  ;;  %v1607_v13 = vmul.f32 %v4032_v44, %v1575_v53  ;;  %v1777_v47 = vsub.f32 0.0, %v4053_v10  ;;  %v1495_v5 = vadd.f32 -1.4531521, %v1463_v51 }
 0x2ec   : > { %v2050_v48 = vadd.f32 1.0, %v2018_v18  ;;  %2842 = vpow2.f32 %v1846_v14  ;;  %v1848_v8 = vmul.f32 1.442695, %v1799_v19  ;;  %v4113_v12 = vmul.f32 0.70710677, %v4097_v33 }
 0x2ed   : > { %v4116_v63 = vmul.f32 %v2056_v40, %v3933_v46  ;;  %v2051_v23 = vadd.f32 1.0, %v2019_v52  ;;  %2844 = vrcp.f32 %v1392_v9  ;;  %v4119_v21 = vand.u32 2147483647, %v4102_v26 }
 0x2ee   : > { %4625 = vst [vmem:[#allocation14_spill] sm:$0xff] %v4113_v12  ;;  %v4121_v61 = vpop.eup %2836  ;;  %v1901_v59 = vmul.f32 %v2835_v37, %v1741_v57  ;;  %v1638_v3 = vadd.f32 -0.28449672, %v1606_v32  ;;  %v1808_v16 = vmul.f32 %v1776_v43, %v1328_v20  ;;  %v1465_v28 = vmul.f32 1.0614054, %v4626_v25  ;;  %v4627_v32 = vld [vmem:[#allocation12_spill] sm:$0xff] }
 0x2ef   : > { %v4541_v15 = vsub.f32 1.0, %v4108_v11  ;;  %v1639_v35 = vadd.f32 -0.28449672, %v1607_v13  ;;  %v1809_v38 = vmul.f32 %v1777_v47, %v4053_v10  ;;  %v1527_v46 = vmul.f32 %v4622_v50, %v1495_v5  ;;  %v1189_v5 = vpop.permute.xlu1 %1188 }
 0x2f0   : > { %v4128_v40 = vmul.f32 %v2057_v2, %v3941_v49  ;;  %v4131_v1 = vmul.f32 %v2050_v48, %v3977_v60  ;;  %2846 = vpow2.f32 %v1848_v8  ;;  %v4134_v53 = vand.u32 2147483647, %v4113_v12 }
 0x2f1   : > { %v4136_v20 = vpop.eup %2838  ;;  %v4139_v51 = vmul.f32 %v2051_v23, %v3982_v55  ;;  %v4142_v19 = vmul.f32 0.5, %v4030_v58  ;;  %v1483_v10 = vmul.f32 1.0614054, %v4121_v61  ;;  %v1365_v49 = vmul.f32 0.3275911, %v4119_v21 }
 0x2f2   : > { %v4146_v14 = vpop.eup %2840  ;;  %v1933_v60 = vsub.f32 1.0, %v1901_v59  ;;  %vm1965_vm0 = vcmp.lt.f32.partialorder %v3863_v45, 0.0  ;;  %v1670_v2 = vmul.f32 %v4024_v41, %v1638_v3  ;;  %v1866_v18 = vmul.f32 1.442695, %v1808_v16 }
 0x2f3   : > { %v1497_v9 = vadd.f32 -1.4531521, %v1465_v28  ;;  %v4152_v55 = vsub.f32 0.0, %v4541_v15  ;;  %v1671_v58 = vmul.f32 %v4032_v44, %v1639_v35  ;;  %v1868_v37 = vmul.f32 1.442695, %v1809_v38  ;;  %v4628_v28 = vld [vmem:[#allocation13_spill] sm:$0xff] }
 0x2f4   : > { %v1559_v52 = vadd.f32 1.4214138, %v1527_v46  ;;  %v1489_v57 = vmul.f32 1.0614054, %v4136_v20  ;;  %v1118_v43 = vmul.f32 %v1077_v17, %v4627_v32  ;;  %v1364_v13 = vmul.f32 0.3275911, %v4134_v53 }
 0x2f5   : > { %v1529_v47 = vmul.f32 %v4626_v25, %v1497_v9  ;;  %v1482_v48 = vmul.f32 1.0614054, %v4146_v14  ;;  %v1515_v8 = vadd.f32 -1.4531521, %v1483_v10  ;;  %v1397_v23 = vadd.f32 1.0, %v1365_v49 }
 0x2f6   : > { %v1591_v59 = vmul.f32 %v4622_v50, %v1559_v52  ;;  %v2843_v3 = vpop.eup %2842  ;;  %v1702_v16 = vadd.f32 0.2548296, %v1670_v2  ;;  %2848 = vpow2.f32 %v1866_v18  ;;  %v1119_v35 = vmul.f32 %v1077_v17, %v4628_v28 }
 0x2f7   : > { %v1561_v38 = vadd.f32 1.4214138, %v1529_v47  ;;  %v4162_v46 = vpop.eup %2844  ;;  %v1997_v32 = vsub.f32 0.0, %v1933_v60  ;;  %v1703_v15 = vadd.f32 0.2548296, %v1671_v58  ;;  %v4164_v29 = vadd.f32 %v1189_v5, %v1118_v43 }
 0x2f8   : > { %v1623_v33 = vadd.f32 -0.28449672, %v1591_v59  ;;  %v1521_v9 = vadd.f32 -1.4531521, %v1489_v57  ;;  %v1396_v12 = vadd.f32 1.0, %v1364_v13  ;;  %v4167_v49 = vadd.f32 %v1189_v5, %v1119_v35  ;;  %v4630_v35 = vld [vmem:[#allocation21_spill] sm:$0xff] }
 0x2f9   : > { %v1593_v10 = vmul.f32 %v4626_v25, %v1561_v38  ;;  %v1514_v52 = vadd.f32 -1.4531521, %v1482_v48  ;;  %v1547_v2 = vmul.f32 %v4121_v61, %v1515_v8  ;;  %2850 = vrcp.f32 %v1397_v23 }
 0x2fa   : > { %v1655_v17 = vmul.f32 %v4622_v50, %v1623_v33  ;;  %v2847_v18 = vpop.eup %2846  ;;  %v1734_v47 = vmul.f32 %v4024_v41, %v1702_v16  ;;  %v1488_v58 = vmul.f32 1.0614054, %v4162_v46  ;;  %2852 = vpow2.f32 %v1868_v37 }
 0x2fb   : > { %v1625_v43 = vadd.f32 -0.28449672, %v1593_v10  ;;  %v2029_v57 = vsel %vm1965_vm0, %v1997_v32, %v1933_v60  ;;  %v1735_v13 = vmul.f32 %v4032_v44, %v1703_v15  ;;  %v1770_v5 = vsub.f32 0.0, %v4062_v22  ;;  %v4629_v15 = vld [vmem:[#allocation20_spill] sm:$0xff] }
 0x2fc   : > { %v4178_v48 = vmul.f32 0.70710677, %v4164_v29  ;;  %v1553_v8 = vmul.f32 %v4136_v20, %v1521_v9  ;;  %v1771_v33 = vsub.f32 0.0, %v4068_v36  ;;  %v4184_v23 = vmul.f32 0.70710677, %v4167_v49 }
 0x2fd   : > { %v1657_v41 = vmul.f32 %v4626_v25, %v1625_v43  ;;  %vm1964_vm1 = vcmp.lt.f32.partialorder %v3860_v56, 0.0  ;;  %v1546_v45 = vmul.f32 %v4146_v14, %v1514_v52  ;;  %v1579_v60 = vadd.f32 1.4214138, %v1547_v2 }
 0x2fe   : > { %2854 = vrcp.f32 %v1396_v12  ;;  %v1687_v44 = vadd.f32 0.2548296, %v1655_v17  ;;  %vm1943_vm2 = vcmp.lt.f32.partialorder %v4629_v15, 0.0  ;;  %v2061_v37 = vadd.f32 1.0, %v2029_v57 }
 0x2ff   : > { %v4189_v59 = vmul.f32 %v2843_v3, %v1734_v47  ;;  %v1520_v16 = vadd.f32 -1.4531521, %v1488_v58  ;;  %v1689_v28 = vadd.f32 0.2548296, %v1657_v41  ;;  %vm1945_vm3 = vcmp.lt.f32.partialorder %v4630_v35, 0.0  ;;  %v4631_v58 = vld [vmem:[#allocation27_spill] sm:$0xff] }
 0x300   : > { %v4192_v38 = vmul.f32 %v2847_v18, %v1735_v13  ;;  %v1802_v32 = vmul.f32 %v1770_v5, %v4062_v22  ;;  %v1719_v9 = vmul.f32 %v4622_v50, %v1687_v44  ;;  %v4197_v10 = vand.u32 2147483647, %v4178_v48  ;;  %v4199_v12 = vpop.eup %2848  ;;  %v4632_v13 = vld [vmem:[#allocation29_spill] sm:$0xff]  ;;  %v4635_v35 = vld [vmem:[#allocation26_spill] sm:$0xff] }
 0x301   : > { %v1585_v52 = vadd.f32 1.4214138, %v1553_v8  ;;  %v1803_v2 = vmul.f32 %v1771_v33, %v4068_v36  ;;  %v1721_v3 = vmul.f32 %v4626_v25, %v1689_v28  ;;  %v4204_v17 = vand.u32 2147483647, %v4184_v23 }
 0x302   : > { %v1578_v47 = vadd.f32 1.4214138, %v1546_v45  ;;  %v1611_v18 = vmul.f32 %v4121_v61, %v1579_v60  ;;  %v1879_v22 = vmul.f32 %v4631_v58, %v1719_v9  ;;  %v1358_v50 = vmul.f32 0.3275911, %v4197_v10 }
 0x303   : > { %v1926_v43 = vsub.f32 1.0, %v4189_v59  ;;  %v1552_v57 = vmul.f32 %v4162_v46, %v1520_v16  ;;  %v1881_v5 = vmul.f32 %v4632_v13, %v1721_v3  ;;  %v1359_v36 = vmul.f32 0.3275911, %v4204_v17  ;;  %v4213_v8 = vpop.eup %2850  ;;  %v1087_v13 = vpop.permute.xlu1 %1086 }
 0x304   : > { %v1927_v25 = vsub.f32 1.0, %v4192_v38  ;;  %v1854_v33 = vmul.f32 1.442695, %v1802_v32  ;;  %v1911_v41 = vsub.f32 1.0, %v1879_v22  ;;  %v1390_v45 = vadd.f32 1.0, %v1358_v50  ;;  %v4216_v60 = vpop.eup %2852 }
 0x305   : > { %v1617_v44 = vmul.f32 %v4136_v20, %v1585_v52  ;;  %v1856_v28 = vmul.f32 1.442695, %v1803_v2  ;;  %v1913_v9 = vsub.f32 1.0, %v1881_v5  ;;  %v1391_v59 = vadd.f32 1.0, %v1359_v36 }
 0x306   : > { %v1610_v16 = vmul.f32 %v4146_v14, %v1578_v47  ;;  %v1643_v58 = vadd.f32 -0.28449672, %v1611_v18  ;;  %v1975_v3 = vsub.f32 0.0, %v1911_v41  ;;  %2856 = vrcp.f32 %v1390_v45 }
 0x307   : > { %v4633_v26 = vsub.f32 1.0, %v4108_v11  ;;  %vm1958_vm4 = vcmp.lt.f32.partialorder %v3919_v31, 0.0  ;;  %v1584_v22 = vadd.f32 1.4214138, %v1552_v57  ;;  %v1493_v52 = vmul.f32 1.0614054, %v4213_v8 }
 0x308   : > { %v1977_v2 = vsub.f32 0.0, %v1913_v9  ;;  %v4229_v50 = vpop.eup %2854  ;;  %v4232_v47 = vmul.f32 %v2061_v37, %v3998_v4  ;;  %v1990_v18 = vsub.f32 0.0, %v1926_v43  ;;  %v2007_v11 = vsel %vm1943_vm2, %v1975_v3, %v1911_v41 }
 0x309   : > { %v4225_v32 = vsel %vm1964_vm1, %v4152_v55, %v4633_v26  ;;  %2858 = vrcp.f32 %v1391_v59  ;;  %v1649_v5 = vadd.f32 -0.28449672, %v1617_v44  ;;  %v2039_v26 = vadd.f32 1.0, %v2007_v11 }
 0x30a   : > { %2860 = vpow2.f32 %v1854_v33  ;;  %v2009_v56 = vsel %vm1945_vm3, %v1977_v2, %v1913_v9  ;;  %v1991_v55 = vsub.f32 0.0, %v1927_v25  ;;  %v1642_v57 = vadd.f32 -0.28449672, %v1610_v16  ;;  %v4634_v33 = vld [vmem:[#allocation24_spill] sm:$0xff]  ;;  %v1199_v16 = vpop.permute.xlu1 %1198 }
 0x30b   : > { %v1675_v36 = vmul.f32 %v4121_v61, %v1643_v58  ;;  %v2041_v45 = vadd.f32 1.0, %v2009_v56  ;;  %vm1959_vm5 = vcmp.lt.f32.partialorder %v3927_v6, 0.0  ;;  %v1616_v4 = vmul.f32 %v4162_v46, %v1584_v22  ;;  %v4636_v2 = vld [vmem:[#allocation16_spill] sm:$0xff] }
 0x30c   : > { %2862 = vpow2.f32 %v1856_v28  ;;  %v1492_v15 = vmul.f32 1.0614054, %v4229_v50  ;;  %v1525_v37 = vadd.f32 -1.4531521, %v1493_v52  ;;  %v2071_v41 = vmul.f32 %v2039_v26, %v4634_v33  ;;  %v4637_v28 = vld [vmem:[#allocation17_spill] sm:$0xff] }
 0x30d   : > { %v2073_v44 = vmul.f32 %v2041_v45, %v4635_v35  ;;  %v2102_v9 = vpack.c.bf16 %v3828_v30, %v3825_v34  ;;  %v1774_v59 = vsub.f32 0.0, %v4197_v10  ;;  %v1681_v58 = vmul.f32 %v4136_v20, %v1649_v5 }
 0x30e   : > { %v1775_v3 = vsub.f32 0.0, %v4204_v17  ;;  %v1122_v22 = vmul.f32 %v1087_v13, %v4636_v2  ;;  %v1123_v11 = vmul.f32 %v1087_v13, %v4637_v28  ;;  %v1674_v52 = vmul.f32 %v4146_v14, %v1642_v57 }
 0x30f   : > { %v1707_v56 = vadd.f32 0.2548296, %v1675_v36  ;;  %v2103_v26 = vpack.c.bf16 %v2073_v44, %v2071_v41  ;;  %v2105_v45 = vpack.c.bf16 %v3959_v0, %v3867_v62  ;;  %v1524_v33 = vadd.f32 -1.4531521, %v1492_v15 }
 0x310   : > { %v1557_v34 = vmul.f32 %v4213_v8, %v1525_v37  ;;  %v4257_v30 = vadd.f32 %v1199_v16, %v1122_v22  ;;  %v4259_v35 = vadd.f32 %v1199_v16, %v1123_v11  ;;  %v4261_v5 = vpop.eup %2856  ;;  %v2022_v2 = vsel %vm1958_vm4, %v1990_v18, %v1926_v43 }
 0x311   : > { %v1648_v13 = vadd.f32 -0.28449672, %v1616_v4  ;;  %v1780_v57 = vsub.f32 0.0, %v4134_v53  ;;  %2285 = vmatprep.mubr.bf16.mxu1 %v2103_v26  ;;  %v1806_v36 = vmul.f32 %v1774_v59, %v4197_v10  ;;  %v1713_v41 = vadd.f32 0.2548296, %v1681_v58 }
 0x312   : > { %v1781_v62 = vsub.f32 0.0, %v4119_v21  ;;  %2286 = vmatmul.mubr.bf16.vlgmr.msra.gmra.mrb[0].mxu1 %v2102_v9  ;;  %v1486_v0 = vmul.f32 1.0614054, %v4261_v5  ;;  %v1807_v15 = vmul.f32 %v1775_v3, %v4204_v17  ;;  %v1706_v44 = vadd.f32 0.2548296, %v1674_v52 }
 0x313   : > { %v4270_v37 = vpop.eup %2858  ;;  %v1739_v31 = vmul.f32 %v4121_v61, %v1707_v56  ;;  %v4274_v43 = vmul.f32 0.70710677, %v4257_v30  ;;  %v4277_v18 = vmul.f32 0.70710677, %v4259_v35  ;;  %2293 = vmatprep.mubr.bf16.mxu1 %v2105_v45  ;;  %v1556_v4 = vmul.f32 %v4229_v50, %v1524_v33 }
 0x314   : > { %v2861_v10 = vpop.eup %2860  ;;  %v1589_v9 = vadd.f32 1.4214138, %v1557_v34  ;;  %v1487_v59 = vmul.f32 1.0614054, %v4270_v37  ;;  %v1518_v16 = vadd.f32 -1.4531521, %v1486_v0  ;;  %v2023_v17 = vsel %vm1959_vm5, %v1991_v55, %v1927_v25 }
 0x315   : > { %v1862_v61 = vmul.f32 1.442695, %v1806_v36  ;;  %v4286_v58 = vand.u32 2147483647, %v4274_v43  ;;  %v4289_v3 = vand.u32 2147483647, %v4277_v18  ;;  %v2104_v56 = vpack.c.bf16 %v3955_v27, %v3853_v42 }
 0x316   : > { %v2863_v22 = vpop.eup %2862  ;;  %v1519_v28 = vadd.f32 -1.4531521, %v1487_v59  ;;  %v1550_v11 = vmul.f32 %v4261_v5, %v1518_v16  ;;  %v1864_v52 = vmul.f32 1.442695, %v1807_v15  ;;  %v1738_v38 = vmul.f32 %v4146_v14, %v1706_v44 }
 0x317   : > { %v1362_v6 = vmul.f32 0.3275911, %v4286_v58  ;;  %v1363_v25 = vmul.f32 0.3275911, %v4289_v3  ;;  %v2107_v55 = vpack.c.bf16 %v3889_v24, %v4074_v39  ;;  %v1899_v26 = vmul.f32 %v2863_v22, %v1739_v31 }
 0x318   : > { %v1588_v45 = vadd.f32 1.4214138, %v1556_v4  ;;  %v1551_v33 = vmul.f32 %v4270_v37, %v1519_v28  ;;  %v1582_v34 = vadd.f32 1.4214138, %v1550_v11  ;;  %v1621_v36 = vmul.f32 %v4213_v8, %v1589_v9 }
 0x319   : > { %2864 = vpow2.f32 %v1862_v61  ;;  %v1394_v0 = vadd.f32 1.0, %v1362_v6  ;;  %v1395_v15 = vadd.f32 1.0, %v1363_v25  ;;  %v1680_v42 = vmul.f32 %v4162_v46, %v1648_v13 }
 0x31a   : > { %v1583_v27 = vadd.f32 1.4214138, %v1551_v33  ;;  %v1614_v14 = vmul.f32 %v4261_v5, %v1582_v34  ;;  %2866 = vpow2.f32 %v1864_v52  ;;  %2294 = vmatmul.mubr.bf16.gmra.mrb[4].mxu1 %v2104_v56  ;;  %v1745_v44 = vmul.f32 %v4136_v20, %v1713_v41  ;;  %v4642_v33 = vld [vmem:[#allocation32_spill] sm:$0xff] }
 0x31b   : > { %v1812_v24 = vmul.f32 %v1780_v57, %v4134_v53  ;;  %v1813_v39 = vmul.f32 %v1781_v62, %v4119_v21  ;;  %2868 = vrcp.f32 %v1394_v0  ;;  %2301 = vmatprep.mubr.bf16.mxu1 %v2107_v55  ;;  %v1931_v31 = vsub.f32 1.0, %v1899_v26  ;;  %v4638_v53 = vld [vmem:[#allocation22_spill] sm:$0xff]  ;;  %v4640_v55 = vld [vmem:[#allocation9_spill] sm:$0xff] }
 0x31c   : > { %v1615_v4 = vmul.f32 %v4270_v37, %v1583_v27  ;;  %v1646_v9 = vadd.f32 -0.28449672, %v1614_v14  ;;  %2870 = vrcp.f32 %v1395_v15  ;;  %v2054_v59 = vadd.f32 1.0, %v2022_v2  ;;  %v4639_v2 = vld [vmem:[#allocation36_spill] sm:$0xff]  ;;  %v4643_v0 = vld [vmem:[#allocation30_spill] sm:$0xff] }
 0x31d   : > { %v1898_v13 = vmul.f32 %v2861_v10, %v1738_v38  ;;  %v1620_v16 = vmul.f32 %v4229_v50, %v1588_v45  ;;  %v1653_v61 = vadd.f32 -0.28449672, %v1621_v36  ;;  %v2055_v22 = vadd.f32 1.0, %v2023_v17  ;;  %v4641_v45 = vld [vmem:[#allocation37_spill] sm:$0xff] }
 0x31e   : > { %v1647_v28 = vadd.f32 -0.28449672, %v1615_v4  ;;  %v1678_v20 = vmul.f32 %v4261_v5, %v1646_v9  ;;  %v2106_v57 = vpack.c.bf16 %v4638_v53, %v4059_v54  ;;  %v1712_v21 = vadd.f32 0.2548296, %v1680_v42 }
 0x31f   : > { %v1874_v41 = vmul.f32 1.442695, %v1812_v24  ;;  %v1876_v62 = vmul.f32 1.442695, %v1813_v39  ;;  %v2109_v11 = vpack.c.bf16 %v4049_v7, %v4139_v51  ;;  %v1905_v52 = vmul.f32 %v4216_v60, %v1745_v44 }
 0x320   : > { %vm1962_vm6 = vcmp.lt.f32.partialorder %v4639_v2, 0.0  ;;  %v1995_v10 = vsub.f32 0.0, %v1931_v31  ;;  %v1679_v56 = vmul.f32 %v4270_v37, %v1647_v28  ;;  %v1710_v17 = vadd.f32 0.2548296, %v1678_v20 }
 0x321   : > { %v1930_v38 = vsub.f32 1.0, %v1898_v13  ;;  %v1652_v6 = vadd.f32 -0.28449672, %v1620_v16  ;;  %v1685_v25 = vmul.f32 %v4213_v8, %v1653_v61  ;;  %v1778_v54 = vsub.f32 0.0, %v4286_v58 }
 0x322   : > { %v4319_v26 = vmul.f32 %v2054_v59, %v4640_v55  ;;  %vm1963_vm7 = vcmp.lt.f32.partialorder %v4641_v45, 0.0  ;;  %v1711_v7 = vadd.f32 0.2548296, %v1679_v56  ;;  %v1779_v51 = vsub.f32 0.0, %v4289_v3  ;;  %2302 = vmatmul.mubr.bf16.gmra.mrb[8].mxu1 %v2106_v57 }
 0x323   : > { %v2865_v60 = vpop.eup %2864  ;;  %v2087_v34 = vmul.f32 %v2055_v22, %v4642_v33  ;;  %v1744_v36 = vmul.f32 %v4162_v46, %v1712_v21  ;;  %vm1969_vm8 = vcmp.lt.f32.partialorder %v4643_v0, 0.0  ;;  %2872 = vpow2.f32 %v1876_v62  ;;  %2309 = vmatprep.mubr.bf16.mxu1 %v2109_v11 }
 0x324   : > { %v1742_v15 = vmul.f32 %v4261_v5, %v1710_v17  ;;  %v2867_v42 = vpop.eup %2866  ;;  %v1937_v27 = vsub.f32 1.0, %v1905_v52  ;;  %v2027_v14 = vsel %vm1963_vm7, %v1995_v10, %v1931_v31  ;;  %2874 = vpow2.f32 %v1874_v41  ;;  %v4644_v31 = vld [vmem:[#allocation23_spill] sm:$0xff] }
 0x325   : > { %v1743_v44 = vmul.f32 %v4270_v37, %v1711_v7  ;;  %v4328_v24 = vpop.eup %2868  ;;  %v1994_v39 = vsub.f32 0.0, %v1930_v38  ;;  %v1684_v4 = vmul.f32 %v4229_v50, %v1652_v6  ;;  %v1717_v9 = vadd.f32 0.2548296, %v1685_v25 }
 0x326   : > { %v1810_v46 = vmul.f32 %v1778_v54, %v4286_v58  ;;  %v4332_v59 = vpop.eup %2870  ;;  %v1490_v5 = vmul.f32 1.0614054, %v4328_v24  ;;  %v1811_v16 = vmul.f32 %v1779_v51, %v4289_v3  ;;  %v2108_v61 = vpack.c.bf16 %v4644_v31, %v4131_v1 }
 0x327   : > { %v1903_v13 = vmul.f32 %v2867_v42, %v1743_v44  ;;  %v2059_v22 = vadd.f32 1.0, %v2027_v14  ;;  %v1902_v37 = vmul.f32 %v2865_v60, %v1742_v15  ;;  %v1491_v28 = vmul.f32 1.0614054, %v4332_v59 }
 0x328   : > { %v2111_v20 = vpack.c.bf16 %v4128_v40, %v2087_v34  ;;  %v1904_v53 = vmul.f32 %v4199_v12, %v1744_v36  ;;  %v2001_v57 = vsub.f32 0.0, %v1937_v27  ;;  %v1522_v21 = vadd.f32 -1.4531521, %v1490_v5 }
 0x329   : > { %v1935_v58 = vsub.f32 1.0, %v1903_v13  ;;  %v2026_v41 = vsel %vm1962_vm6, %v1994_v39, %v1930_v38  ;;  %v1716_v62 = vadd.f32 0.2548296, %v1684_v4  ;;  %v1523_v11 = vadd.f32 -1.4531521, %v1491_v28 }
 0x32a   : > { %v1870_v3 = vmul.f32 1.442695, %v1810_v46  ;;  %v1749_v52 = vmul.f32 %v4213_v8, %v1717_v9  ;;  %v1554_v10 = vmul.f32 %v4328_v24, %v1522_v21  ;;  %v1872_v56 = vmul.f32 1.442695, %v1811_v16  ;;  %2310 = vmatmul.mubr.bf16.gmra.mrb[12].mxu1 %v2108_v61  ;;  %v4646_v9 = vld [vmem:[#allocation42_spill] sm:$0xff]  ;;  %v4647_v16 = vld [vmem:[#allocation8_spill] sm:$0xff] }
 0x32b   : > { %v1999_v1 = vsub.f32 0.0, %v1935_v58  ;;  %v2091_v40 = vmul.f32 %v2059_v22, %v4142_v19  ;;  %v1934_v17 = vsub.f32 1.0, %v1902_v37  ;;  %vm1967_vm9 = vcmp.lt.f32.partialorder %v4184_v23, 0.0  ;;  %2317 = vmatprep.mubr.bf16.mxu1 %v2111_v20  ;;  %v4648_v61 = vld [vmem:[#allocation40_spill] sm:$0xff] }
 0x32c   : > { %v1555_v12 = vmul.f32 %v4332_v59, %v1523_v11  ;;  %v1936_v2 = vsub.f32 1.0, %v1904_v53  ;;  %v2033_v38 = vsel %vm1969_vm8, %v2001_v57, %v1937_v27  ;;  %v1586_v25 = vadd.f32 1.4214138, %v1554_v10 }
 0x32d   : > { %v2031_v6 = vsel %vm1967_vm9, %v1999_v1, %v1935_v58  ;;  %v2873_v8 = vpop.eup %2872  ;;  %v2058_v54 = vadd.f32 1.0, %v2026_v41  ;;  %v1748_v55 = vmul.f32 %v4229_v50, %v1716_v62  ;;  %2876 = vpow2.f32 %v1870_v3  ;;  %v4645_v50 = vld [vmem:[#allocation33_spill] sm:$0xff] }
 0x32e   : > { %v1587_v45 = vadd.f32 1.4214138, %v1555_v12  ;;  %v2875_v7 = vpop.eup %2874  ;;  %v1909_v19 = vmul.f32 %v2873_v8, %v1749_v52  ;;  %v1618_v51 = vmul.f32 %v4328_v24, %v1586_v25  ;;  %2878 = vpow2.f32 %v1872_v56  ;;  %v4650_v12 = vld [vmem:[#allocation11_spill] sm:$0xff] }
 0x32f   : > { %v2110_v23 = vpack.c.bf16 %v4116_v63, %v4319_v26  ;;  %v1998_v60 = vsub.f32 0.0, %v1934_v17  ;;  %v2063_v33 = vadd.f32 1.0, %v2031_v6  ;;  %v2113_v36 = vpack.c.bf16 %v4232_v47, %v2091_v40  ;;  %v4649_v40 = vld [vmem:[#allocation31_spill] sm:$0xff] }
 0x330   : > { %v1619_v34 = vmul.f32 %v4332_v59, %v1587_v45  ;;  %v2060_v0 = vadd.f32 1.0, %v4225_v32  ;;  %v2000_v15 = vsub.f32 0.0, %v1936_v2  ;;  %v1258_v42 = vmul.f32 0.5, %v4645_v50 }
 0x331   : > { %v1650_v27 = vadd.f32 -0.28449672, %v1618_v51  ;;  %v2065_v14 = vadd.f32 1.0, %v2033_v38  ;;  %v1908_v44 = vmul.f32 %v2875_v7, %v1748_v55  ;;  %v1263_v39 = vmul.f32 0.5, %v4167_v49 }
 0x332   : > { %v1651_v4 = vadd.f32 -0.28449672, %v1619_v34  ;;  %v1265_v46 = vmul.f32 0.5, %v4646_v9  ;;  %v2090_v63 = vmul.f32 %v2058_v54, %v1258_v42  ;;  %vm1966_vm10 = vcmp.lt.f32.partialorder %v4178_v48, 0.0  ;;  %2318 = vmatmul.mubr.bf16.gmra.mrb[16].mxu1 %v2110_v23 }
 0x333   : > { %v1682_v26 = vmul.f32 %v4328_v24, %v1650_v27  ;;  %v1941_v47 = vsub.f32 1.0, %v1909_v19  ;;  %v2030_v13 = vsel %vm1966_vm10, %v1998_v60, %v1934_v17  ;;  %v2095_v32 = vmul.f32 %v2063_v33, %v1263_v39  ;;  %2325 = vmatprep.mubr.bf16.mxu1 %v2113_v36  ;;  %v4652_v19 = vld [vmem:[#allocation15_spill] sm:$0xff] }
 0x334   : > { %v1683_v5 = vmul.f32 %v4332_v59, %v1651_v4  ;;  %v2092_v31 = vmul.f32 %v2060_v0, %v4647_v16  ;;  %vm1968_vm11 = vcmp.lt.f32.partialorder %v4648_v61, 0.0  ;;  %v2097_v37 = vmul.f32 %v2065_v14, %v1265_v46 }
 0x335   : > { %v1714_v49 = vadd.f32 0.2548296, %v1682_v26  ;;  %v2032_v22 = vsel %vm1968_vm11, %v2000_v15, %v1936_v2  ;;  %v1940_v28 = vsub.f32 1.0, %v1908_v44  ;;  %v2062_v53 = vadd.f32 1.0, %v2030_v13  ;;  %v4653_v15 = vld [vmem:[#allocation10_spill] sm:$0xff] }
 0x336   : > { %v1715_v20 = vadd.f32 0.2548296, %v1683_v5  ;;  %v2112_v57 = vpack.c.bf16 %v2092_v31, %v2090_v63  ;;  %v2005_v21 = vsub.f32 0.0, %v1941_v47  ;;  %v2115_v62 = vpack.c.bf16 %v2097_v37, %v2095_v32 }
 0x337   : > { %v1746_v48 = vmul.f32 %v4328_v24, %v1714_v49  ;;  %v2877_v58 = vpop.eup %2876  ;;  %v2064_v3 = vadd.f32 1.0, %v2032_v22  ;;  %v1262_v52 = vmul.f32 0.5, %v4164_v29  ;;  %v2004_v10 = vsub.f32 0.0, %v1940_v28 }
 0x338   : > { %v1747_v41 = vmul.f32 %v4332_v59, %v1715_v20  ;;  %v2879_v11 = vpop.eup %2878  ;;  %v1264_v17 = vmul.f32 0.5, %v4649_v40  ;;  %vm1973_vm12 = vcmp.lt.f32.partialorder %v4650_v12, 0.0  ;;  %v4651_v59 = vld [vmem:[#allocation14_spill] sm:$0xff]  ;;  %vm1970_vm14 = vcmp.lt.f32.partialorder %v4274_v43, 0.0 }
 0x339   : > { %v1906_v1 = vmul.f32 %v2877_v58, %v1746_v48  ;;  %v2094_v2 = vmul.f32 %v2062_v53, %v1262_v52  ;;  %v2037_v24 = vsel %vm1973_vm12, %v2005_v21, %v1941_v47  ;;  %vm1972_vm13 = vcmp.lt.f32.partialorder %v4651_v59, 0.0 }
 0x33a   : > { %v1907_v56 = vmul.f32 %v2879_v11, %v1747_v41  ;;  %2326 = vmatmul.mubr.bf16.gmra.mrb[20].mxu1 %v2112_v57  ;;  %v2096_v25 = vmul.f32 %v2064_v3, %v1264_v17  ;;  %v2036_v54 = vsel %vm1972_vm13, %v2004_v10, %v1940_v28  ;;  %v2069_v55 = vadd.f32 1.0, %v2037_v24 }
 0x33b   : > { %v1938_v38 = vsub.f32 1.0, %v1906_v1  ;;  %2333 = vmatprep.mubr.bf16.mxu1 %v2115_v62  ;;  %vm1971_vm15 = vcmp.lt.f32.partialorder %v4277_v18, 0.0  ;;  %v1269_v51 = vmul.f32 0.5, %v4652_v19  ;;  %v2068_v33 = vadd.f32 1.0, %v2036_v54 }
 0x33c   : > { %v1939_v6 = vsub.f32 1.0, %v1907_v56  ;;  %v2114_v7 = vpack.c.bf16 %v2096_v25, %v2094_v2  ;;  %v1266_v34 = vmul.f32 0.5, %v4257_v30  ;;  %v1267_v36 = vmul.f32 0.5, %v4259_v35  ;;  %v4383_v30 = vld [vmem:[%s4489_s6] ss:$0 sm:$0xff] }
 0x33d   : > { %v2002_v8 = vsub.f32 0.0, %v1938_v38  ;;  %v1268_v43 = vmul.f32 0.5, %v4653_v15  ;;  %v2101_v50 = vmul.f32 %v2069_v55, %v1269_v51 }
 0x33e   : > { %v2003_v29 = vsub.f32 0.0, %v1939_v6 }
 0x33f   : > { %v2034_v45 = vsel %vm1970_vm14, %v2002_v8, %v1938_v38  ;;  %v2100_v18 = vmul.f32 %v2068_v33, %v1268_v43 }
 0x340   : > { %v2035_v23 = vsel %vm1971_vm15, %v2003_v29, %v1939_v6  ;;  %v2066_v60 = vadd.f32 1.0, %v2034_v45 }
 0x341   : > { %v2067_v0 = vadd.f32 1.0, %v2035_v23 }
 0x342   : > { %v2098_v42 = vmul.f32 %v2066_v60, %v1266_v34  ;;  %2334 = vmatmul.mubr.bf16.gmra.mrb[24].mxu1 %v2114_v7 }
 0x343   : > { %v2099_v27 = vmul.f32 %v2067_v0, %v1267_v36 }
 0x344   : > { %v2116_v44 = vpack.c.bf16 %v2100_v18, %v2098_v42 }
 0x345   : > { %v2117_v14 = vpack.c.bf16 %v2101_v50, %v2099_v27 }
 0x347   : > { %2341 = vmatprep.mubr.bf16.mxu1 %v2117_v14 }
 0x34a   : > { %2342 = vmatmul.mubr.bf16.gmra.mrb[28].mxu1 %v2116_v44 }
 0x3e5   : > { %v2564_v39 = vpop.f32.mrb[0].mxu1 }
 0x3e6   : > { %v2565_v35 = vpop.f32.mrb[1].mxu1 }
 0x3e7   : > { %v2566_v4 = vadd.f32 %v2565_v35, %v2564_v39  ;;  %v2567_v9 = vpop.f32.mrb[2].mxu1 }
 0x3e8   : > { %v2568_v46 = vpop.f32.mrb[3].mxu1 }
 0x3e9   : > { %v2288_v63 = vadd.f32 %v2566_v4, %v4383_v30  ;;  %v2569_v26 = vadd.f32 %v2568_v46, %v2567_v9 }
 0x3eb   : > { %2350 = vst [vmem:[%s4386_s21] sm:$0xff] %v2288_v63  ;;  %v2291_v47 = vadd.f32 %v2569_v26, %v4383_v30 }
 0x3ed   : > { %2351 = vst [vmem:[%s4386_s21 + $0x8] sm:$0xff] %v2291_v47  ;;  %v2570_v13 = vpop.f32.mrb[4].mxu1 }
 0x3ee   : > { %v2571_v32 = vpop.f32.mrb[5].mxu1 }
 0x3ef   : > { %v2572_v5 = vadd.f32 %v2571_v32, %v2570_v13  ;;  %v2573_v16 = vpop.f32.mrb[6].mxu1 }
 0x3f0   : > { %v2574_v31 = vpop.f32.mrb[7].mxu1 }
 0x3f1   : > { %v2296_v61 = vadd.f32 %v2572_v5, %v4383_v30  ;;  %v2575_v49 = vadd.f32 %v2574_v31, %v2573_v16 }
 0x3f3   : > { %2352 = vst [vmem:[%s4386_s21 + $0x10] sm:$0xff] %v2296_v61  ;;  %v2299_v22 = vadd.f32 %v2575_v49, %v4383_v30 }
 0x3f5   : > { %2353 = vst [vmem:[%s4386_s21 + $0x18] sm:$0xff] %v2299_v22  ;;  %v2576_v37 = vpop.f32.mrb[8].mxu1 }
 0x3f6   : > { %v2577_v28 = vpop.f32.mrb[9].mxu1 }
 0x3f7   : > { %v2578_v20 = vadd.f32 %v2577_v28, %v2576_v37  ;;  %v2579_v53 = vpop.f32.mrb[10].mxu1 }
 0x3f8   : > { %v2580_v48 = vpop.f32.mrb[11].mxu1 }
 0x3f9   : > { %v2304_v57 = vadd.f32 %v2578_v20, %v4383_v30  ;;  %v2581_v58 = vadd.f32 %v2580_v48, %v2579_v53 }
 0x3fb   : > { %2354 = vst [vmem:[%s4386_s21 + $0x20] sm:$0xff] %v2304_v57  ;;  %v2307_v21 = vadd.f32 %v2581_v58, %v4383_v30 }
 0x3fd   : > { %2355 = vst [vmem:[%s4386_s21 + $0x28] sm:$0xff] %v2307_v21  ;;  %v2582_v41 = vpop.f32.mrb[12].mxu1 }
 0x3fe   : > { %v2583_v62 = vpop.f32.mrb[13].mxu1 }
 0x3ff   : > { %v2584_v11 = vadd.f32 %v2583_v62, %v2582_v41  ;;  %v2585_v3 = vpop.f32.mrb[14].mxu1 }
 0x400   : > { %v2586_v52 = vpop.f32.mrb[15].mxu1 }
 0x401   : > { %v2312_v1 = vadd.f32 %v2584_v11, %v4383_v30  ;;  %v2587_v10 = vadd.f32 %v2586_v52, %v2585_v3 }
 0x403   : > { %2356 = vst [vmem:[%s4386_s21 + $0x30] sm:$0xff] %v2312_v1  ;;  %v2315_v56 = vadd.f32 %v2587_v10, %v4383_v30 }
 0x405   : > { %2357 = vst [vmem:[%s4386_s21 + $0x38] sm:$0xff] %v2315_v56  ;;  %v2588_v40 = vpop.f32.mrb[16].mxu1 }
 0x406   : > { %v2589_v17 = vpop.f32.mrb[17].mxu1 }
 0x407   : > { %v2590_v12 = vadd.f32 %v2589_v17, %v2588_v40  ;;  %v2591_v2 = vpop.f32.mrb[18].mxu1 }
 0x408   : > { %v2592_v38 = vpop.f32.mrb[19].mxu1 }
 0x409   : > { %v2320_v24 = vadd.f32 %v2590_v12, %v4383_v30  ;;  %v2593_v6 = vadd.f32 %v2592_v38, %v2591_v2 }
 0x40b   : > { %2358 = vst [vmem:[%s4386_s21 + $0x40] sm:$0xff] %v2320_v24  ;;  %v2323_v25 = vadd.f32 %v2593_v6, %v4383_v30 }
 0x40d   : > { %2359 = vst [vmem:[%s4386_s21 + $0x48] sm:$0xff] %v2323_v25  ;;  %v2594_v59 = vpop.f32.mrb[20].mxu1 }
 0x40e   : > { %v2595_v8 = vpop.f32.mrb[21].mxu1 }
 0x40f   : > { %v2596_v54 = vadd.f32 %v2595_v8, %v2594_v59  ;;  %v2597_v29 = vpop.f32.mrb[22].mxu1 }
 0x410   : > { %v2598_v55 = vpop.f32.mrb[23].mxu1 }
 0x411   : > { %v2328_v45 = vadd.f32 %v2596_v54, %v4383_v30  ;;  %v2599_v7 = vadd.f32 %v2598_v55, %v2597_v29 }
 0x413   : > { %2360 = vst [vmem:[%s4386_s21 + $0x50] sm:$0xff] %v2328_v45  ;;  %v2331_v19 = vadd.f32 %v2599_v7, %v4383_v30 }
 0x415   : > { %2361 = vst [vmem:[%s4386_s21 + $0x58] sm:$0xff] %v2331_v19  ;;  %v2600_v51 = vpop.f32.mrb[24].mxu1 }
 0x416   : > { %v2601_v23 = vpop.f32.mrb[25].mxu1 }
 0x417   : > { %v2602_v60 = vadd.f32 %v2601_v23, %v2600_v51  ;;  %v2603_v33 = vpop.f32.mrb[26].mxu1 }
 0x418   : > { %v2604_v34 = vpop.f32.mrb[27].mxu1 }
 0x419   : > { %v2336_v36 = vadd.f32 %v2602_v60, %v4383_v30  ;;  %v2605_v0 = vadd.f32 %v2604_v34, %v2603_v33 }
 0x41b   : > { %2362 = vst [vmem:[%s4386_s21 + $0x60] sm:$0xff] %v2336_v36  ;;  %v2339_v15 = vadd.f32 %v2605_v0, %v4383_v30 }
 0x41d   : > { %2363 = vst [vmem:[%s4386_s21 + $0x68] sm:$0xff] %v2339_v15  ;;  %v2606_v43 = vpop.f32.mrb[28].mxu1 }
 0x41e   : > { %v2607_v50 = vpop.f32.mrb[29].mxu1 }
 0x41f   : > { %v2608_v42 = vadd.f32 %v2607_v50, %v2606_v43  ;;  %v2609_v27 = vpop.f32.mrb[30].mxu1 }
 0x420   : > { %v2610_v18 = vpop.f32.mrb[31].mxu1 }
 0x421   : > { %v2344_v14 = vadd.f32 %v2608_v42, %v4383_v30  ;;  %v2611_v44 = vadd.f32 %v2610_v18, %v2609_v27 }
 0x423   : > { %2364 = vst [vmem:[%s4386_s21 + $0x70] sm:$0xff] %v2344_v14  ;;  %v2347_v39 = vadd.f32 %v2611_v44, %v4383_v30 }
 0x425   : > { %2365 = vst [vmem:[%s4386_s21 + $0x78] sm:$0xff] %v2347_v39 }
 0x426   : > { %2893 = shalt.err (!%p2890_p7)
}
 0x427   : > { %s2894_s18 = scalar_lea.hbm %s4421_s30, 2048  ;;  %s2898_s17 = scalar_lea.hbm %s4490_s7, 16384 }
 0x428   : > { %p2895_p9 = scmp.ne.s32.totalorder %s4421_s30, %s2894_s18  ;;  %p2899_p12 = scmp.lt.u32.totalorder %s4421_s30, %s4490_s7 }
 0x429   : > { %p2900_p13 = scmp.lt.u32.totalorder %s2898_s17, %s2894_s18  ;;  %p2902_p1 = scmp.lt.u32.totalorder %s2894_s18, %s4421_s30 }
 0x42a   : > { %p2896_p10 = pnand %p2895_p9, %p3071_p3 }
 0x42b   : > { %p2901_p0 = por %p2900_p13, %p2899_p12 }
 0x42c   : > { %p2897_p11 = pneg %p2896_p10 }
 0x42d   : > { %p2903_p2 = por %p2902_p1, %p2901_p0 }
 0x42f   : > { %p2904_p4 = pnand %p2903_p2, %p2897_p11 }
 0x431   : > { %2907 = shalt.err (!%p2904_p4)
}
 0x432   : > { %s2978_s9 = smov 128   ;;  %s2979_s13 = smov 8  }
 0x433   : > { %2612 = dma.vmem_to_hbm [thread:$0]  (%p3071_p3), %s4426_s28, 2048, %s4421_s30, %s4431_s22, %s2978_s9, %s2978_s9, %s2979_s13  }
 0x434 PF: > { %p2618_p5 = scmp.ge.s32.totalorder %s2974_s8, 2  ;;  %s2397_s11 = sand.u32 1, %s2946_s24  }
 0x435   : > { %s2398_s12 = scalar_lea.sflag [#allocation3], %s2397_s11 }
 0x436   : > { %p2615_p6 = pnand %p2618_p5, %p3080_p8 }
 0x438   : > { %2941 = dma.done.wait (!%p2615_p6), %s2398_s12, 2048  }
 0x439   : > { %2943 = vsyncadd (!%p2615_p6), %s2398_s12, 4294965248  ;;  %s20_s8 = sadd.s32 1, %s2974_s8   ;;  %s4654_s28 = sld [smem:[#allocation5_spill]] }
 0x43a   : > { %p17_p7 = scmp.ge.s32.totalorder %s20_s8, 10   ;;  %s4655_s14 = sld [smem:[#allocation6_spill]] }
 0x43b   : > { %s4656_s30 = sld [smem:[#allocation7_spill]]  ;;  %s4657_s24 = smov %s2950_s25 }
 0x43c   : > { %s4658_s25 = smov %s2954_s26  ;;  %s4659_s26 = smov %s3089_s19 }
 0x43d   : > { %s4660_s27 = smov %s2966_s29  ;;  %19 = sbr.rel (!%p17_p7) target bundleno = 5 (0x5), region = 89 }
 0x440   : > { %s4661_s29 = smov %s4655_s14 }
 0x444   :  { %2403 = vsyncpa [#allocation3], 1 }
 0x445   :  { %2405 = vsyncpa [#allocation3 + $0x1], 1 }

</bundles_post_ra>
